<compile_context>
chip_gen: v5e
topology: v5e:2x2
jax: 0.10.0
libtpu: 0.0.40
codegen_flags: <defaults>
</compile_context>

<pallas_src>
import functools
import math

import jax
import jax.numpy as jnp
from jax.experimental import pallas as pl
from jax.experimental.pallas import tpu as pltpu


_PREFERRED_LANES = (512, 256, 128)      # lane-dense last-dim candidates
_SMALL_FALLBACK_ELEMS = 64 * 1024       # below this, plain XLA beats a launch
_VMEM_BUDGET_BYTES = 24 * 1024 * 1024   # 3 arrays x 2 buffers per tile
_VMEM_LIMIT_BYTES = 40 * 1024 * 1024    # scoped limit: safe on v5e/v6e/v7x


def _qfl_math(x, t, inv_norm, beta):
    """Core elementwise QFL math in f32 (shared by kernel and XLA fallback)."""
    # binary_cross_entropy (reduction='none') with PyTorch's log clamp at -100.
    log_x = jnp.maximum(jnp.log(x), -100.0)
    log_1mx = jnp.maximum(jnp.log(1.0 - x), -100.0)
    bce = -(t * log_x + (1.0 - t) * log_1mx)

    # |x - t| ** beta : small integer beta -> plain multiplies (VPU only).
    d = x - t
    b = float(beta)
    if b == 2.0:
        scale = d * d
    elif b.is_integer() and 0 < b <= 8:
        ad = jnp.abs(d)
        scale = ad
        for _ in range(int(b) - 1):
            scale = scale * ad
    else:
        # TODO(synk): fractional beta falls back to pow = exp(b*log|d|); this
        # adds 2 EUP ops/elem and pow(0, 0) differs from torch on this path.
        scale = jnp.power(jnp.abs(d), jnp.float32(b))

    return bce * scale * inv_norm


def _qfl_kernel(inv_norm_ref, x_ref, t_ref, o_ref, *, beta):
    x = x_ref[...].astype(jnp.float32)
    t = t_ref[...].astype(jnp.float32)
    o_ref[...] = _qfl_math(x, t, inv_norm_ref[0], beta).astype(o_ref.dtype)


def quality_focal_loss(x, target, pos_normalizer=1.0, beta=2.0):
    assert x.shape == target.shape
    orig_shape = x.shape
    out_dtype = x.dtype
    total = math.prod(orig_shape) if orig_shape else 1

    # Scalar 1 / clamp(pos_normalizer, min=1.0), computed once.
    inv_norm = 1.0 / jnp.maximum(jnp.asarray(pos_normalizer, jnp.float32), 1.0)

    # --- Small-tensor fallback: launch + reshape overhead dominates. -------
    if total < _SMALL_FALLBACK_ELEMS:
        out = _qfl_math(x.astype(jnp.float32), target.astype(jnp.float32),
                        inv_norm, beta)
        return out.astype(out_dtype)

    # --- Choose a pad-free 2D slab factorization (no extra HBM copies). ----
    lanes = None
    for cand in _PREFERRED_LANES:
        if total % cand == 0:
            lanes = cand
            break
    if lanes is None:
        # Ragged total: natural (leading, C) factorization; the last-dim block
        # equals the full dim (legal), stores may be lane-masked but there is
        # still no pad/slice traffic.
        lanes = orig_shape[-1] if x.ndim >= 2 else total
    rows = total // lanes

    itemsize = jnp.dtype(x.dtype).itemsize
    cap = (_VMEM_BUDGET_BYTES // (6 * lanes * itemsize)) // 8 * 8
    if cap < 8:
        # Pathologically wide rows: tiling impossible under budget -> plain XLA.
        out = _qfl_math(x.astype(jnp.float32), target.astype(jnp.float32),
                        inv_norm, beta)
        return out.astype(out_dtype)

    # >= 2 grid steps when rows allow it, so both v7x TensorCores get work.
    half_rows = ((rows + 1) // 2 + 7) // 8 * 8
    tile_rows = max(8, min(cap, half_rows))
    if tile_rows > rows:
        tile_rows = rows  # single full-extent block (always legal)

    x2 = x.reshape(rows, lanes)        # free bitcast, no copy
    t2 = target.reshape(rows, lanes)   # free bitcast, no copy

    kernel = functools.partial(_qfl_kernel, beta=beta)
    cost = pl.CostEstimate(
        flops=10 * total,
        transcendentals=2 * total,     # two logs per element (BCE)
        bytes_accessed=3 * total * itemsize,
    )

    out2 = pl.pallas_call(
        kernel,
        out_shape=jax.ShapeDtypeStruct((rows, lanes), out_dtype),
        grid=(pl.cdiv(rows, tile_rows),),   # partial last block is masked
        in_specs=[
            pl.BlockSpec(memory_space=pltpu.MemorySpace.SMEM),     # 1/norm
            pl.BlockSpec((tile_rows, lanes), lambda i: (i, 0)),    # input
            pl.BlockSpec((tile_rows, lanes), lambda i: (i, 0)),    # target
        ],
        out_specs=pl.BlockSpec((tile_rows, lanes), lambda i: (i, 0)),
        compiler_params=pltpu.CompilerParams(
            dimension_semantics=("parallel",),
            vmem_limit_bytes=_VMEM_LIMIT_BYTES,
        ),
        cost_estimate=cost,
    )(inv_norm.reshape(1), x2, t2)

    return out2.reshape(orig_shape)


def _reference(x, target, pos_normalizer=1.0, beta=2.0):
    x32 = x.astype(jnp.float32)
    t32 = target.astype(jnp.float32)
    log_x = jnp.maximum(jnp.log(x32), -100.0)
    log_1mx = jnp.maximum(jnp.log(1.0 - x32), -100.0)
    bce = -(t32 * log_x + (1.0 - t32) * log_1mx)
    loss = bce * jnp.power(jnp.abs(x32 - t32), beta)
    loss = loss / jnp.maximum(jnp.asarray(pos_normalizer, jnp.float32), 1.0)
    return loss.astype(x.dtype)


if __name__ == "__main__":
    key = jax.random.PRNGKey(0)
    k1, k2, k3, k4, k5, k6 = jax.random.split(key, 6)

    # --- Small [B, M, C]: fused-XLA fallback path (exercises clamp(min=1)) --
    B, M, C = 2, 16, 8
    inp_s = jax.random.uniform(k1, (B, M, C), jnp.float32, 0.01, 0.99)
    tgt_s = jax.random.uniform(k2, (B, M, C), jnp.float32, 0.0, 1.0)
    out_s = jax.block_until_ready(
        quality_focal_loss(inp_s, tgt_s, jnp.float32(0.5), beta=2.0))
    ref_s = _reference(inp_s, tgt_s, jnp.float32(0.5), 2.0)
    assert out_s.shape == (B, M, C)
    assert jnp.allclose(out_s, ref_s, atol=1e-5, rtol=1e-4), "mismatch (small)"

    # --- Lane-dense Pallas path (total % 512 == 0), multi-step grid ---------
    B2, M2, C2 = 2, 1024, 128
    inp = jax.random.uniform(k3, (B2, M2, C2), jnp.float32, 0.01, 0.99)
    tgt = jax.random.uniform(k4, (B2, M2, C2), jnp.float32, 0.0, 1.0)
    out = jax.block_until_ready(
        quality_focal_loss(inp, tgt, jnp.float32(7.0), beta=2.0))
    ref = _reference(inp, tgt, jnp.float32(7.0), 2.0)
    assert out.shape == (B2, M2, C2)
    assert jnp.allclose(out, ref, atol=1e-5, rtol=1e-4), "mismatch (beta=2)"

    # Non-default integer beta hits the repeated-multiply specialization.
    out_b1 = jax.block_until_ready(
        quality_focal_loss(inp, tgt, jnp.float32(3.0), beta=1.0))
    ref_b1 = _reference(inp, tgt, jnp.float32(3.0), 1.0)
    assert jnp.allclose(out_b1, ref_b1, atol=1e-5, rtol=1e-4), "mismatch (beta=1)"

    # --- Ragged total (not a multiple of 128): pad-free (leading, C) slab ---
    # with a masked partial last row-block.
    B3, M3, C3 = 3, 341, 96
    inp_r = jax.random.uniform(k5, (B3, M3, C3), jnp.float32, 0.01, 0.99)
    tgt_r = jax.random.uniform(k6, (B3, M3, C3), jnp.float32, 0.0, 1.0)
    out_r = jax.block_until_ready(
        quality_focal_loss(inp_r, tgt_r, jnp.float32(2.0), beta=2.0))
    ref_r = _reference(inp_r, tgt_r, jnp.float32(2.0), 2.0)
    assert out_r.shape == (B3, M3, C3)
    assert jnp.allclose(out_r, ref_r, atol=1e-5, rtol=1e-4), "mismatch (ragged)"

    print("KERNEL_OK")
</pallas_src>

<mosaic_0001>
module attributes {stable_mosaic.version = 11 : i64} {
  func.func @_qfl_kernel(%arg0: i32, %arg1: memref<1xf32, #tpu.memory_space<smem>>, %arg2: memref<256x512xf32, #tpu.memory_space<vmem>>, %arg3: memref<256x512xf32, #tpu.memory_space<vmem>>, %arg4: memref<256x512xf32, #tpu.memory_space<vmem>>) attributes {dimension_semantics = [#tpu.dimension_semantics<parallel>], iteration_bounds = array<i64: 2>, scalar_prefetch = 0 : i64, scratch_operands = 0 : i64, tpu.core_type = #tpu.core_type<tc>, window_params = [{transform_indices = @transform_0, window_bounds = array<i64: 1>}, {transform_indices = @transform_1, window_bounds = array<i64: 256, 512>}, {transform_indices = @transform_2, window_bounds = array<i64: 256, 512>}, {transform_indices = @transform_3, window_bounds = array<i64: 256, 512>}]} {
    %c0 = arith.constant 0 : index
    %c0_0 = arith.constant 0 : index
    %0 = vector.load %arg2[%c0, %c0_0] : memref<256x512xf32, #tpu.memory_space<vmem>>, vector<256x512xf32>
    %c0_1 = arith.constant 0 : index
    %c0_2 = arith.constant 0 : index
    %1 = vector.load %arg3[%c0_1, %c0_2] : memref<256x512xf32, #tpu.memory_space<vmem>>, vector<256x512xf32>
    %c0_3 = arith.constant 0 : index
    %2 = memref.load %arg1[%c0_3] : memref<1xf32, #tpu.memory_space<smem>>
    %3 = math.log %0 : vector<256x512xf32>
    %cst = arith.constant -1.000000e+02 : f32
    %4 = vector.broadcast %cst : f32 to vector<256x512xf32>
    %5 = arith.maximumf %3, %4 : vector<256x512xf32>
    %cst_4 = arith.constant 1.000000e+00 : f32
    %6 = vector.broadcast %cst_4 : f32 to vector<256x512xf32>
    %7 = arith.subf %6, %0 : vector<256x512xf32>
    %8 = math.log %7 : vector<256x512xf32>
    %cst_5 = arith.constant -1.000000e+02 : f32
    %9 = vector.broadcast %cst_5 : f32 to vector<256x512xf32>
    %10 = arith.maximumf %8, %9 : vector<256x512xf32>
    %11 = arith.mulf %1, %5 : vector<256x512xf32>
    %cst_6 = arith.constant 1.000000e+00 : f32
    %12 = vector.broadcast %cst_6 : f32 to vector<256x512xf32>
    %13 = arith.subf %12, %1 : vector<256x512xf32>
    %14 = arith.mulf %13, %10 : vector<256x512xf32>
    %15 = arith.addf %11, %14 : vector<256x512xf32>
    %cst_7 = arith.constant 0.000000e+00 : f32
    %16 = vector.broadcast %cst_7 : f32 to vector<256x512xf32>
    %17 = arith.subf %16, %15 : vector<256x512xf32>
    %18 = arith.subf %0, %1 : vector<256x512xf32>
    %19 = arith.mulf %18, %18 : vector<256x512xf32>
    %20 = arith.mulf %17, %19 : vector<256x512xf32>
    %21 = vector.broadcast %2 : f32 to vector<256x512xf32>
    %22 = arith.mulf %20, %21 : vector<256x512xf32>
    %c0_8 = arith.constant 0 : index
    %c0_9 = arith.constant 0 : index
    %23 = vector.load %arg4[%c0_8, %c0_9] : memref<256x512xf32, #tpu.memory_space<vmem>>, vector<256x512xf32>
    tpu.vector_store %arg4[%c0_8, %c0_9], %22 {strides = array<i32>} : memref<256x512xf32, #tpu.memory_space<vmem>>, vector<256x512xf32>,
    return
  }
  func.func @transform_0(%arg0: i32) -> i32 {
    %c0_i32 = arith.constant 0 : i32
    %c0_i32_0 = arith.constant 0 : i32
    return %c0_i32 : i32
  }
  func.func @transform_1(%arg0: i32) -> (i32, i32) {
    %c0_i32 = arith.constant 0 : i32
    %c0_i32_0 = arith.constant 0 : i32
    return %arg0, %c0_i32 : i32, i32
  }
  func.func @transform_2(%arg0: i32) -> (i32, i32) {
    %c0_i32 = arith.constant 0 : i32
    %c0_i32_0 = arith.constant 0 : i32
    return %arg0, %c0_i32 : i32, i32
  }
  func.func @transform_3(%arg0: i32) -> (i32, i32) {
    %c0_i32 = arith.constant 0 : i32
    %c0_i32_0 = arith.constant 0 : i32
    return %arg0, %c0_i32 : i32, i32
  }
}

</mosaic_0001>

<bundles_post_ra>
// kernel: tpu_custom_call.1
= control target key start
LH: loop header
LB: loop body
LE: loop exit
PB: predicated region body
PF: predicated region fallthrough
CT: control target
= control target key end

     0   :  { %s4561_s0 = inlined_call_operand.<no memory space> [shape: f32[1], index: 0, kind: input, shape index: {}]   ;;  %s4562_s1 = inlined_call_operand.hbm [shape: f32[512,512], index: 1, kind: input, shape index: {}]   ;;  %s4563_s2 = inlined_call_operand.hbm [shape: f32[512,512], index: 2, kind: input, shape index: {}]   ;;  %s4564_s3 = inlined_call_operand.hbm [shape: f32[512,512], index: 3, kind: output, shape index: {}]  }
   0x1   :  { %8 = sst [smem:[#allocation2]] %s4561_s0 }
   0x2   :  { %9 = vsyncpa [#allocation4], 0 }
   0x3   :  { %11 = vsyncpa [#allocation4 + $0x1], 0 }
   0x4   :  { %12 = vsyncpa [#allocation7], 0 }
   0x5   :  { %14 = vsyncpa [#allocation7 + $0x1], 0 }
   0x6   :  { %15 = vsyncpa [#allocation5], 0 }
   0x7   :  { %17 = vsyncpa [#allocation5 + $0x1], 0  ;;  %s3539_s14 = smov 0   ;;  %s3541_s15 = smov 0  }
   0x8   :  { %s3543_s16 = smov 0   ;;  %s3545_s17 = smov 0  }
   0x9 LB: > { %s3560_s0 = sadd.s32 4294967295, %s3510_s17   ;;  %s2786_s18 = sadd.s32 4294967294, %s3510_s17   ;;  %s3510_s17 = sphi %s3545_s17, %s4575_s17   ;;  %s3506_s16 = sphi %s3543_s16, %s4574_s16   ;;  %s3502_s15 = sphi %s3541_s15, %s4573_s15   ;;  %s3498_s14 = sphi %s3539_s14, %s4572_s14  }
   0xa   : > { %s3564_s19 = sadd.s32 1, %s3510_s17   ;;  %s51_s20 = sadd.s32 1, %s3506_s16 }
   0xb   : > { %s48_s21 = ssub.s32 %s3510_s17, %s3564_s19  ;;  %p58_p0 = scmp.ne.s32.totalorder %s3506_s16, %s3502_s15 }
   0xc   : > { %p49_p1 = scmp.eq.s32.totalorder %s48_s21, 0  ;;  %p59_p2 = scmp.eq.s32.totalorder %s3510_s17, 0 }
   0xd   : > { %p64_p3 = scmp.ne.s32.totalorder %s3502_s15, %s3498_s14  ;;  %p65_p4 = scmp.eq.s32.totalorder %s3560_s0, 0 }
   0xe   : > { %s3576_s22 = scalar_select %p49_p1, %s3506_s16, %s51_s20  }
   0xf   : > { %p3578_p5 = por %p59_p2, %p58_p0  ;;  %p3582_p6 = por %p65_p4, %p64_p3 }
  0x10   : > { %p114_p7 = scmp.eq.s32.totalorder %s3560_s0, 1  ;;  %p120_p8 = scmp.eq.s32.totalorder %s2786_s18, 1 }
  0x11   : > { %p2830_p10 = scmp.lt.s32.totalorder %s3510_s17, 2  ;;  %s3598_s27 = sand.u32 1, %s3506_s16  }
  0x12   : > { %p3589_p11 = por %p114_p7, %p58_p0  ;;  %p3593_p12 = por %p120_p8, %p64_p3 }
  0x13   : > { %s2808_s28 = sshll.u32 %s3510_s17, 10  ;;  %s2789_s29 = sshll.u32 %s3598_s27, 10 }
  0x14   : > { %s153_s5 = scalar_lea.hbm %s4562_s1, %s2808_s28  ;;  %s147_s7 = scalar_lea.vmem [#allocation3], %s2789_s29 }
  0x15   : > { %s154_s6 = sshll.u32 %s153_s5, 4  ;;  %s156_s8 = sshll.u32 %s147_s7, 4  ;;  %s155_s6 = int_to_ptr.hbm [resolvable:$true] %s154_s6  ;;  %s157_s8 = int_to_ptr.vmem [resolvable:$true] %s156_s8 }
  0x16   : > { %p3611_p13 = pnand %p2830_p10, %p3578_p5  ;;  %p2797_p0 = scmp.ge.s32.totalorder %s3510_s17, 1 }
  0x17   : > { %p187_p1 = scmp.lt.s32.totalorder %s3510_s17, 3  ;;  %s144_s10 = scalar_lea.sflag [#allocation4], %s3598_s27 }
  0x18   : > { %s3380_s11 = sshra.s32 %s155_s6, 4  ;;  %p3384_p3 = pneg %p3611_p13  ;;  %s3381_s11 = int_to_ptr.hbm [resolvable:$true] %s3380_s11 }
  0x19   : > { %s3382_s12 = scalar_lea.hbm %s3381_s11, 1024  ;;  %s3387_s20 = scalar_lea.hbm %s4562_s1, 2048 }
  0x1a   : > { %p3383_p2 = scmp.ne.s32.totalorder %s3381_s11, %s3382_s12  ;;  %p3388_p5 = scmp.lt.s32.totalorder %s3381_s11, %s4562_s1 }
  0x1b   : > { %p3389_p8 = scmp.lt.s32.totalorder %s3387_s20, %s3382_s12 }
  0x1c   : > { %p3385_p4 = pnand %p3384_p3, %p3383_p2 }
  0x1d   : > { %p3390_p10 = por %p3389_p8, %p3388_p5 }
  0x1e   : > { %p3386_p7 = pneg %p3385_p4 }
  0x20   : > { %p3391_p9 = pnand %p3390_p10, %p3386_p7 }
  0x22   : > { %3394 = shalt.err (!%p3391_p9)
}
  0x23   : > { %s3512_s30 = smov 512   ;;  %s3513_s4 = smov 32  }
  0x24   : > { %2822 = dma.hbm_to_vmem [thread:$0]  (!%p3611_p13), %s155_s6, 16384, %s157_s8, %s144_s10, %s3512_s30, %s3512_s30, %s3513_s4  }
  0x25   : > { %p3635_p2 = pnand %p2797_p0, %p187_p1  ;;  %s176_s12 = scalar_lea.hbm %s4563_s2, %s2808_s28 }
  0x26   : > { %s177_s13 = sshll.u32 %s176_s12, 4  ;;  %s170_s18 = scalar_lea.vmem [#allocation6], %s2789_s29  ;;  %s178_s13 = int_to_ptr.hbm [resolvable:$true] %s177_s13 }
  0x27   : > { %s179_s20 = sshll.u32 %s170_s18, 4  ;;  %s167_s21 = scalar_lea.sflag [#allocation7], %s3598_s27  ;;  %s180_s20 = int_to_ptr.vmem [resolvable:$true] %s179_s20 }
  0x28   : > { %s3410_s23 = sshra.s32 %s178_s13, 4  ;;  %s3417_s7 = scalar_lea.hbm %s4563_s2, 2048  ;;  %s3411_s23 = int_to_ptr.hbm [resolvable:$true] %s3410_s23 }
  0x29   : > { %s3412_s6 = scalar_lea.hbm %s3411_s23, 1024  ;;  %p3418_p4 = scmp.lt.s32.totalorder %s3411_s23, %s4563_s2 }
  0x2a   : > { %p3413_p9 = scmp.ne.s32.totalorder %s3411_s23, %s3412_s6  ;;  %p3419_p7 = scmp.lt.s32.totalorder %s3417_s7, %s3412_s6 }
  0x2c   : > { %p3415_p0 = pnand %p3413_p9, %p3384_p3  ;;  %p3420_p5 = por %p3419_p7, %p3418_p4 }
  0x2e   : > { %p3416_p1 = pneg %p3415_p0 }
  0x30   : > { %p3421_p8 = pnand %p3420_p5, %p3416_p1 }
  0x32   : > { %3424 = shalt.err (!%p3421_p8)
}
  0x33   : > { %2825 = dma.hbm_to_vmem [thread:$0]  (!%p3611_p13), %s178_s13, 16384, %s180_s20, %s167_s21, %s3512_s30, %s3512_s30, %s3513_s4  }
  0x34   : > { %191 = sbr.rel (%p3635_p2) target bundleno = 588 (0x24c), region = 32  ;;  %s3661_s27 = sand.u32 (!%p3635_p2), 1, %s3502_s15  }
  0x35   : > { %s3664_s29 = sshll.u32 (!%p3635_p2), %s3661_s27, 10  ;;  %s194_s12 = scalar_lea.sflag (!%p3635_p2), [#allocation4], %s3661_s27 }
  0x36   : > { %s3668_s18 = scalar_lea.vmem (!%p3635_p2), [#allocation3], %s3664_s29 }
  0x39   : > { %3485 = dma.done.wait (%p3582_p6), %s194_s12, 16384  }
  0x3a   : > { %3487 = vsyncadd (%p3582_p6), %s194_s12, 4294950912  ;;  %s204_s9 = scalar_lea.sflag [#allocation7], %s3661_s27  ;;  %s3676_s30 = scalar_lea.vmem [#allocation6], %s3664_s29 }
  0x3b   : > { %3489 = dma.done.wait (%p3582_p6), %s204_s9, 16384  }
  0x3c   : > { %3491 = vsyncadd (%p3582_p6), %s204_s9, 4294950912  ;;  %s495_s4 = sld [smem:[#allocation2]]  ;;  %v239_v0 = vld [vmem:[%s3668_s18] sm:$0xff]  ;;  %v240_v2 = vld [vmem:[%s3668_s18 + $0x8] sm:$0xff]  ;;  %s3757_s24 = scalar_lea.vmem [#allocation8], %s3664_s29 }
  0x3d   : > { %v3684_v1 = vld [vmem:[%s3676_s30] sm:$0xff]  ;;  %2868 = vlog2.f32 %v239_v0  ;;  %v880_v3 = vsub.f32 1.0, %v239_v0  ;;  %v3689_v5 = vld [vmem:[%s3676_s30 + $0x8] sm:$0xff]  ;;  %v241_v6 = vld [vmem:[%s3668_s18 + $0x10] sm:$0xff]  ;;  %v881_v8 = vsub.f32 1.0, %v240_v2  ;;  %s2812_s5 = sshll.u32 %s3560_s0, 10 }
  0x3e   : > { %v2032_v4 = vsub.f32 %v239_v0, %v3684_v1  ;;  %2870 = vlog2.f32 %v240_v2  ;;  %v2033_v9 = vsub.f32 %v240_v2, %v3689_v5  ;;  %v3696_v10 = vld [vmem:[%s3676_s30 + $0x10] sm:$0xff]  ;;  %v242_v11 = vld [vmem:[%s3668_s18 + $0x18] sm:$0xff]  ;;  %v1520_v12 = vsub.f32 1.0, %v3684_v1  ;;  %v243_v16 = vld [vmem:[%s3668_s18 + $0x20] sm:$0xff]  ;;  %s2686_s21 = scalar_lea.hbm %s4564_s3, %s2812_s5  ;;  %s2687_s23 = sshll.u32 %s3757_s24, 4  ;;  %s2688_s23 = int_to_ptr.vmem [resolvable:$true] %s2687_s23 }
  0x3f   : > { %2872 = vlog2.f32 %v880_v3  ;;  %v1521_v13 = vsub.f32 1.0, %v3689_v5  ;;  %v882_v14 = vsub.f32 1.0, %v241_v6  ;;  %v3702_v15 = vld [vmem:[%s3676_s30 + $0x18] sm:$0xff]  ;;  %v2034_v18 = vsub.f32 %v241_v6, %v3696_v10  ;;  %v3709_v20 = vld [vmem:[%s3676_s30 + $0x20] sm:$0xff]  ;;  %v244_v24 = vld [vmem:[%s3668_s18 + $0x28] sm:$0xff]  ;;  %s2689_s0 = sshll.u32 %s2686_s21, 4  ;;  %s2690_s0 = int_to_ptr.hbm [resolvable:$true] %s2689_s0 }
  0x40   : > { %v3705_v17 = vmul.f32 %v2032_v4, %v2032_v4  ;;  %2874 = vlog2.f32 %v881_v8  ;;  %v883_v19 = vsub.f32 1.0, %v242_v11  ;;  %v3711_v21 = vmul.f32 %v2033_v9, %v2033_v9  ;;  %v3717_v25 = vld [vmem:[%s3676_s30 + $0x28] sm:$0xff]  ;;  %v245_v33 = vld [vmem:[%s3668_s18 + $0x30] sm:$0xff]  ;;  %s2674_s6 = scalar_lea.sflag [#allocation5], %s3661_s27  ;;  %s3454_s8 = sshra.s32 %s2690_s0, 4  ;;  %s3455_s8 = int_to_ptr.hbm [resolvable:$true] %s3454_s8 }
  0x41   : > { %2876 = vlog2.f32 %v241_v6  ;;  %v1522_v22 = vsub.f32 1.0, %v3696_v10  ;;  %v2035_v23 = vsub.f32 %v242_v11, %v3702_v15  ;;  %v1523_v26 = vsub.f32 1.0, %v3702_v15  ;;  %v3729_v38 = vld [vmem:[%s3676_s30 + $0x30] sm:$0xff]  ;;  %s3456_s10 = scalar_lea.hbm %s3455_s8, 1024  ;;  %s3460_s11 = scalar_lea.hbm %s4564_s3, 2048 }
  0x42   : > { %v3692_v7 = vstv %s495_s4  ;;  %2878 = vlog2.f32 %v882_v14  ;;  %v884_v27 = vsub.f32 1.0, %v243_v16  ;;  %v2036_v28 = vsub.f32 %v243_v16, %v3709_v20  ;;  %p3457_p6 = scmp.ne.s32.totalorder %s3455_s8, %s3456_s10  ;;  %p3461_p10 = scmp.lt.s32.totalorder %s3455_s8, %s4564_s3 }
  0x43   : > { %v2869_v29 = vpop.eup %2868  ;;  %v3721_v30 = vmul.f32 %v2034_v18, %v2034_v18  ;;  %2880 = vlog2.f32 %v242_v11  ;;  %v3723_v31 = vmul.f32 %v2035_v23, %v2035_v23  ;;  %v1524_v32 = vsub.f32 1.0, %v3709_v20  ;;  %p3462_p2 = scmp.lt.s32.totalorder %s3460_s11, %s3456_s10 }
  0x44   : > { %v2871_v34 = vpop.eup %2870  ;;  %v497_v35 = vmul.f32 0.6931472, %v2869_v29  ;;  %2882 = vlog2.f32 %v883_v19  ;;  %v885_v36 = vsub.f32 1.0, %v244_v24  ;;  %v1525_v37 = vsub.f32 1.0, %v3717_v25  ;;  %p3458_p13 = pnand %p3457_p6, %p3589_p11 }
  0x45   : > { %v2873_v39 = vpop.eup %2872  ;;  %v499_v40 = vmul.f32 0.6931472, %v2871_v34  ;;  %2884 = vlog2.f32 %v243_v16  ;;  %v3731_v41 = vmul.f32 %v2036_v28, %v2036_v28  ;;  %v3734_v42 = vsub.f32 %v244_v24, %v3717_v25  ;;  %p3463_p9 = por %p3462_p2, %p3461_p10 }
  0x46   : > { %v2875_v43 = vpop.eup %2874  ;;  %v752_v44 = vmax.f32 %v497_v35, -100.0  ;;  %v1009_v45 = vmul.f32 0.6931472, %v2873_v39  ;;  %2886 = vlog2.f32 %v884_v27  ;;  %v886_v46 = vsub.f32 1.0, %v245_v33  ;;  %p3459_p3 = pneg %p3458_p13 }
  0x47   : > { %v2877_v47 = vpop.eup %2876  ;;  %v753_v48 = vmax.f32 %v499_v40, -100.0  ;;  %v1011_v49 = vmul.f32 0.6931472, %v2875_v43  ;;  %2888 = vlog2.f32 %v244_v24  ;;  %v1526_v50 = vsub.f32 1.0, %v3729_v38 }
  0x48   : > { %v2879_v51 = vpop.eup %2878  ;;  %v1264_v52 = vmax.f32 %v1009_v45, -100.0  ;;  %v1392_v53 = vmul.f32 %v752_v44, %v3684_v1  ;;  %v501_v54 = vmul.f32 0.6931472, %v2877_v47  ;;  %2890 = vlog2.f32 %v885_v36  ;;  %p3464_p0 = pnand %p3463_p9, %p3459_p3 }
  0x49   : > { %v2881_v55 = vpop.eup %2880  ;;  %v1265_v56 = vmax.f32 %v1011_v49, -100.0  ;;  %v1393_v57 = vmul.f32 %v753_v48, %v3689_v5  ;;  %v1013_v58 = vmul.f32 0.6931472, %v2879_v51  ;;  %2892 = vlog2.f32 %v245_v33 }
  0x4a   : > { %v2883_v59 = vpop.eup %2882  ;;  %v1648_v60 = vmul.f32 %v1520_v12, %v1264_v52  ;;  %v754_v61 = vmax.f32 %v501_v54, -100.0  ;;  %v503_v62 = vmul.f32 0.6931472, %v2881_v55  ;;  %v3740_v63 = vsub.f32 %v245_v33, %v3729_v38 }
  0x4b   : > { %v2885_v0 = vpop.eup %2884  ;;  %v1649_v2 = vmul.f32 %v1521_v13, %v1265_v56  ;;  %v1266_v3 = vmax.f32 %v1013_v58, -100.0  ;;  %v1015_v4 = vmul.f32 0.6931472, %v2883_v59  ;;  %2894 = vlog2.f32 %v886_v46 }
  0x4c   : > { %v2887_v1 = vpop.eup %2886  ;;  %v1776_v6 = vadd.f32 %v1648_v60, %v1392_v53  ;;  %v1394_v8 = vmul.f32 %v754_v61, %v3696_v10  ;;  %v755_v9 = vmax.f32 %v503_v62, -100.0  ;;  %v505_v5 = vmul.f32 0.6931472, %v2885_v0  ;;  %v3770_v60 = vld [vmem:[%s3676_s30 + $0x38] sm:$0xff]  ;;  %v248_v0 = vld [vmem:[%s3668_s18 + $0x48] sm:$0xff] }
  0x4d   : > { %v2889_v11 = vpop.eup %2888  ;;  %v1777_v14 = vadd.f32 %v1649_v2, %v1393_v57  ;;  %v1650_v16 = vmul.f32 %v1522_v22, %v1266_v3  ;;  %v1267_v12 = vmax.f32 %v1015_v4, -100.0  ;;  %v1017_v18 = vmul.f32 0.6931472, %v2887_v1  ;;  %v247_v57 = vld [vmem:[%s3668_s18 + $0x40] sm:$0xff] }
  0x4e   : > { %v2891_v19 = vpop.eup %2890  ;;  %v1904_v23 = vsub.f32 0.0, %v1776_v6  ;;  %v1395_v24 = vmul.f32 %v755_v9, %v3702_v15  ;;  %v756_v27 = vmax.f32 %v505_v5, -100.0  ;;  %v507_v13 = vmul.f32 0.6931472, %v2889_v11  ;;  %v3780_v3 = vld [vmem:[%s3676_s30 + $0x40] sm:$0xff]  ;;  %v249_v11 = vld [vmem:[%s3668_s18 + $0x50] sm:$0xff] }
  0x4f   : > { %v2893_v28 = vpop.eup %2892  ;;  %v1905_v29 = vsub.f32 0.0, %v1777_v14  ;;  %v1778_v33 = vadd.f32 %v1650_v16, %v1394_v8  ;;  %v1651_v10 = vmul.f32 %v1523_v26, %v1267_v12  ;;  %v1268_v34 = vmax.f32 %v1017_v18, -100.0  ;;  %v3794_v18 = vld [vmem:[%s3676_s30 + $0x48] sm:$0xff] }
  0x50   : > { %v2288_v35 = vmul.f32 %v3705_v17, %v1904_v23  ;;  %v1396_v22 = vmul.f32 %v756_v27, %v3709_v20  ;;  %v757_v36 = vmax.f32 %v507_v13, -100.0  ;;  %v1019_v39 = vmul.f32 0.6931472, %v2891_v19  ;;  %v246_v17 = vld [vmem:[%s3668_s18 + $0x38] sm:$0xff] }
  0x51   : > { %v2895_v40 = vpop.eup %2894  ;;  %v2289_v43 = vmul.f32 %v3711_v21, %v1905_v29  ;;  %v1906_v44 = vsub.f32 0.0, %v1778_v33  ;;  %v1779_v45 = vadd.f32 %v1651_v10, %v1395_v24  ;;  %v1652_v46 = vmul.f32 %v1524_v32, %v1268_v34  ;;  %v250_v27 = vld [vmem:[%s3668_s18 + $0x58] sm:$0xff] }
  0x52   : > { %v2417_v15 = vmul.f32 %v3692_v7, %v2288_v35  ;;  %v1269_v47 = vmax.f32 %v1019_v39, -100.0  ;;  %v1397_v26 = vmul.f32 %v757_v36, %v3717_v25  ;;  %v509_v48 = vmul.f32 0.6931472, %v2893_v28 }
  0x53   : > { %v2418_v49 = vmul.f32 %v3692_v7, %v2289_v43  ;;  %v2290_v51 = vmul.f32 %v3721_v30, %v1906_v44  ;;  %v1907_v52 = vsub.f32 0.0, %v1779_v45  ;;  %v1780_v53 = vadd.f32 %v1652_v46, %v1396_v22 }
  0x54   : > { %2545 = vst [vmem:[%s3757_s24] sm:$0xff] %v2417_v15  ;;  %v1653_v20 = vmul.f32 %v1525_v37, %v1269_v47  ;;  %v758_v21 = vmax.f32 %v509_v48, -100.0  ;;  %v1021_v32 = vmul.f32 0.6931472, %v2895_v40  ;;  %2896 = vlog2.f32 %v246_v17  ;;  %v3811_v47 = vld [vmem:[%s3668_s18 + $0x60] sm:$0xff] }
  0x55   : > { %2546 = vst [vmem:[%s3757_s24 + $0x8] sm:$0xff] %v2418_v49  ;;  %v2419_v54 = vmul.f32 %v3692_v7, %v2290_v51  ;;  %v2291_v30 = vmul.f32 %v3723_v31, %v1907_v52  ;;  %v1908_v55 = vsub.f32 0.0, %v1780_v53  ;;  %v887_v56 = vsub.f32 1.0, %v246_v17  ;;  %v378_v51 = vld [vmem:[%s3676_s30 + $0x58] sm:$0xff] }
  0x56   : > { %v1781_v58 = vadd.f32 %v1653_v20, %v1397_v26  ;;  %v2165_v25 = vmul.f32 %v3734_v42, %v3734_v42  ;;  %v1270_v59 = vmax.f32 %v1021_v32, -100.0  ;;  %v1398_v37 = vmul.f32 %v758_v21, %v3729_v38 }
  0x57   : > { %2547 = vst [vmem:[%s3757_s24 + $0x10] sm:$0xff] %v2419_v54  ;;  %v2420_v61 = vmul.f32 %v3692_v7, %v2291_v30  ;;  %v2292_v62 = vmul.f32 %v3731_v41, %v1908_v55  ;;  %2898 = vlog2.f32 %v887_v56  ;;  %v2039_v31 = vsub.f32 %v246_v17, %v3770_v60 }
  0x58   : > { %v1909_v2 = vsub.f32 0.0, %v1781_v58  ;;  %v1654_v42 = vmul.f32 %v1526_v50, %v1270_v59  ;;  %2900 = vlog2.f32 %v247_v57  ;;  %v888_v4 = vsub.f32 1.0, %v247_v57 }
  0x59   : > { %2548 = vst [vmem:[%s3757_s24 + $0x18] sm:$0xff] %v2420_v61  ;;  %v2421_v1 = vmul.f32 %v3692_v7, %v2292_v62  ;;  %v2166_v41 = vmul.f32 %v3740_v63, %v3740_v63  ;;  %v1527_v6 = vsub.f32 1.0, %v3770_v60  ;;  %v2040_v8 = vsub.f32 %v247_v57, %v3780_v3  ;;  %v3797_v63 = vld [vmem:[%s3676_s30 + $0x50] sm:$0xff] }
  0x5a   : > { %v2897_v9 = vpop.eup %2896  ;;  %v2293_v38 = vmul.f32 %v2165_v25, %v1909_v2  ;;  %v1782_v50 = vadd.f32 %v1654_v42, %v1398_v37  ;;  %2902 = vlog2.f32 %v888_v4  ;;  %v889_v5 = vsub.f32 1.0, %v248_v0 }
  0x5b   : > { %2549 = vst [vmem:[%s3757_s24 + $0x20] sm:$0xff] %v2421_v1  ;;  %v511_v14 = vmul.f32 0.6931472, %v2897_v9  ;;  %v3790_v16 = vmul.f32 %v2039_v31, %v2039_v31  ;;  %v1528_v12 = vsub.f32 1.0, %v3780_v3  ;;  %2904 = vlog2.f32 %v248_v0  ;;  %v379_v9 = vld [vmem:[%s3676_s30 + $0x60] sm:$0xff] }
  0x5c   : > { %v2422_v19 = vmul.f32 %v3692_v7, %v2293_v38  ;;  %v1910_v23 = vsub.f32 0.0, %v1782_v50  ;;  %v3800_v24 = vmul.f32 %v2040_v8, %v2040_v8  ;;  %2906 = vlog2.f32 %v889_v5 }
  0x5d   : > { %v2899_v13 = vpop.eup %2898  ;;  %v759_v28 = vmax.f32 %v511_v14, -100.0  ;;  %v2041_v29 = vsub.f32 %v248_v0, %v3794_v18  ;;  %2908 = vlog2.f32 %v249_v11  ;;  %v890_v33 = vsub.f32 1.0, %v249_v11 }
  0x5e   : > { %v2901_v10 = vpop.eup %2900  ;;  %2550 = vst [vmem:[%s3757_s24 + $0x28] sm:$0xff] %v2422_v19  ;;  %v2294_v34 = vmul.f32 %v2166_v41, %v1910_v23  ;;  %v1023_v35 = vmul.f32 0.6931472, %v2899_v13  ;;  %v1529_v22 = vsub.f32 1.0, %v3794_v18  ;;  %v1530_v36 = vsub.f32 1.0, %v3797_v63 }
  0x5f   : > { %v513_v39 = vmul.f32 0.6931472, %v2901_v10  ;;  %2910 = vlog2.f32 %v890_v33  ;;  %v2042_v40 = vsub.f32 %v249_v11, %v3797_v63  ;;  %v891_v43 = vsub.f32 1.0, %v250_v27  ;;  %v252_v33 = vld [vmem:[%s3668_s18 + $0x68] sm:$0xff] }
  0x60   : > { %v2903_v44 = vpop.eup %2902  ;;  %v2423_v45 = vmul.f32 %v3692_v7, %v2294_v34  ;;  %v1271_v46 = vmax.f32 %v1023_v35, -100.0  ;;  %v1399_v15 = vmul.f32 %v759_v28, %v3770_v60  ;;  %2912 = vlog2.f32 %v250_v27 }
  0x61   : > { %v2905_v26 = vpop.eup %2904  ;;  %v760_v48 = vmax.f32 %v513_v39, -100.0  ;;  %v1025_v17 = vmul.f32 0.6931472, %v2903_v44  ;;  %v2169_v49 = vmul.f32 %v2041_v29, %v2041_v29  ;;  %2914 = vlog2.f32 %v891_v43  ;;  %v253_v43 = vld [vmem:[%s3668_s18 + $0x70] sm:$0xff] }
  0x62   : > { %v2907_v52 = vpop.eup %2906  ;;  %2551 = vst [vmem:[%s3757_s24 + $0x30] sm:$0xff] %v2423_v45  ;;  %v1655_v53 = vmul.f32 %v1527_v6, %v1271_v46  ;;  %v515_v20 = vmul.f32 0.6931472, %v2905_v26  ;;  %v2043_v21 = vsub.f32 %v250_v27, %v378_v51  ;;  %2916 = vlog2.f32 %v3811_v47 }
  0x63   : > { %v2909_v32 = vpop.eup %2908  ;;  %v1272_v54 = vmax.f32 %v1025_v17, -100.0  ;;  %v1400_v30 = vmul.f32 %v760_v48, %v3780_v3  ;;  %v1027_v55 = vmul.f32 0.6931472, %v2907_v52  ;;  %v892_v56 = vsub.f32 1.0, %v3811_v47  ;;  %v380_v17 = vld [vmem:[%s3676_s30 + $0x68] sm:$0xff] }
  0x64   : > { %v1783_v57 = vadd.f32 %v1655_v53, %v1399_v15  ;;  %v761_v58 = vmax.f32 %v515_v20, -100.0  ;;  %v517_v25 = vmul.f32 0.6931472, %v2909_v32  ;;  %v2170_v59 = vmul.f32 %v2042_v40, %v2042_v40  ;;  %v3833_v32 = vld [vmem:[%s3676_s30 + $0x70] sm:$0xff] }
  0x65   : > { %v2911_v37 = vpop.eup %2910  ;;  %v1656_v60 = vmul.f32 %v1528_v12, %v1272_v54  ;;  %v1273_v61 = vmax.f32 %v1027_v55, -100.0  ;;  %v1531_v62 = vsub.f32 1.0, %v378_v51  ;;  %2918 = vlog2.f32 %v892_v56 }
  0x66   : > { %v2913_v31 = vpop.eup %2912  ;;  %v1911_v0 = vsub.f32 0.0, %v1783_v57  ;;  %v1401_v2 = vmul.f32 %v761_v58, %v3794_v18  ;;  %v762_v42 = vmax.f32 %v517_v25, -100.0  ;;  %v1029_v4 = vmul.f32 0.6931472, %v2911_v37  ;;  %v255_v25 = vld [vmem:[%s3668_s18 + $0x80] sm:$0xff] }
  0x67   : > { %v2915_v3 = vpop.eup %2914  ;;  %v1784_v1 = vadd.f32 %v1656_v60, %v1400_v30  ;;  %v1657_v41 = vmul.f32 %v1529_v22, %v1273_v61  ;;  %v519_v6 = vmul.f32 0.6931472, %v2913_v31  ;;  %v2171_v8 = vmul.f32 %v2043_v21, %v2043_v21  ;;  %v3843_v61 = vld [vmem:[%s3676_s30 + $0x78] sm:$0xff] }
  0x68   : > { %v2917_v38 = vpop.eup %2916  ;;  %v2295_v50 = vmul.f32 %v3790_v16, %v1911_v0  ;;  %v1274_v5 = vmax.f32 %v1029_v4, -100.0  ;;  %v1402_v11 = vmul.f32 %v762_v42, %v3797_v63  ;;  %v1031_v14 = vmul.f32 0.6931472, %v2915_v3  ;;  %v256_v42 = vld [vmem:[%s3668_s18 + $0x88] sm:$0xff] }
  0x69   : > { %v1912_v12 = vsub.f32 0.0, %v1784_v1  ;;  %v1785_v19 = vadd.f32 %v1657_v41, %v1401_v2  ;;  %v763_v18 = vmax.f32 %v519_v6, -100.0  ;;  %v521_v23 = vmul.f32 0.6931472, %v2917_v38 }
  0x6a   : > { %v2424_v27 = vmul.f32 %v3692_v7, %v2295_v50  ;;  %v1658_v13 = vmul.f32 %v1530_v36, %v1274_v5  ;;  %v1275_v28 = vmax.f32 %v1031_v14, -100.0  ;;  %v1532_v29 = vsub.f32 1.0, %v379_v9  ;;  %v383_v5 = vld [vmem:[%s3676_s30 + $0x80] sm:$0xff] }
  0x6b   : > { %v2919_v10 = vpop.eup %2918  ;;  %v2296_v34 = vmul.f32 %v3800_v24, %v1912_v12  ;;  %v1913_v16 = vsub.f32 0.0, %v1785_v19  ;;  %v1403_v35 = vmul.f32 %v763_v18, %v378_v51  ;;  %v764_v63 = vmax.f32 %v521_v23, -100.0 }
  0x6c   : > { %2552 = vst [vmem:[%s3757_s24 + $0x38] sm:$0xff] %v2424_v27  ;;  %v1786_v22 = vadd.f32 %v1658_v13, %v1402_v11  ;;  %v1659_v39 = vmul.f32 %v1531_v62, %v1275_v28  ;;  %v1033_v40 = vmul.f32 0.6931472, %v2919_v10  ;;  %2920 = vlog2.f32 %v252_v33 }
  0x6d   : > { %v2425_v44 = vmul.f32 %v3692_v7, %v2296_v34  ;;  %v2297_v36 = vmul.f32 %v2169_v49, %v1913_v16  ;;  %v2044_v45 = vsub.f32 %v3811_v47, %v379_v9  ;;  %v893_v46 = vsub.f32 1.0, %v252_v33  ;;  %v254_v47 = vld [vmem:[%s3668_s18 + $0x78] sm:$0xff] }
  0x6e   : > { %v1914_v24 = vsub.f32 0.0, %v1786_v22  ;;  %v1787_v15 = vadd.f32 %v1659_v39, %v1403_v35  ;;  %v1276_v26 = vmax.f32 %v1033_v40, -100.0  ;;  %v1404_v48 = vmul.f32 %v764_v63, %v379_v9  ;;  %v257_v22 = vld [vmem:[%s3668_s18 + $0x90] sm:$0xff] }
  0x6f   : > { %2553 = vst [vmem:[%s3757_s24 + $0x40] sm:$0xff] %v2425_v44  ;;  %v2426_v51 = vmul.f32 %v3692_v7, %v2297_v36  ;;  %2922 = vlog2.f32 %v893_v46  ;;  %v2045_v52 = vsub.f32 %v252_v33, %v380_v17  ;;  %v894_v53 = vsub.f32 1.0, %v253_v43 }
  0x70   : > { %v2298_v20 = vmul.f32 %v2170_v59, %v1914_v24  ;;  %v1915_v49 = vsub.f32 0.0, %v1787_v15  ;;  %v1660_v21 = vmul.f32 %v1532_v29, %v1276_v26  ;;  %2924 = vlog2.f32 %v253_v43  ;;  %v384_v15 = vld [vmem:[%s3676_s30 + $0x88] sm:$0xff]  ;;  %v258_v26 = vld [vmem:[%s3668_s18 + $0x98] sm:$0xff] }
  0x71   : > { %2554 = vst [vmem:[%s3757_s24 + $0x48] sm:$0xff] %v2426_v51  ;;  %v2172_v54 = vmul.f32 %v2044_v45, %v2044_v45  ;;  %2926 = vlog2.f32 %v894_v53  ;;  %v2046_v30 = vsub.f32 %v253_v43, %v3833_v32  ;;  %v1533_v37 = vsub.f32 1.0, %v380_v17 }
  0x72   : > { %v2921_v55 = vpop.eup %2920  ;;  %v2427_v56 = vmul.f32 %v3692_v7, %v2298_v20  ;;  %v2299_v57 = vmul.f32 %v2171_v8, %v1915_v49  ;;  %v1788_v58 = vadd.f32 %v1660_v21, %v1404_v48  ;;  %2928 = vlog2.f32 %v254_v47 }
  0x73   : > { %v523_v59 = vmul.f32 0.6931472, %v2921_v55  ;;  %v3840_v60 = vmul.f32 %v2045_v52, %v2045_v52  ;;  %v895_v62 = vsub.f32 1.0, %v254_v47  ;;  %v1534_v2 = vsub.f32 1.0, %v3833_v32 }
  0x74   : > { %2555 = vst [vmem:[%s3757_s24 + $0x50] sm:$0xff] %v2427_v56  ;;  %v2428_v31 = vmul.f32 %v3692_v7, %v2299_v57  ;;  %v1916_v0 = vsub.f32 0.0, %v1788_v58  ;;  %2930 = vlog2.f32 %v255_v25  ;;  %v3849_v1 = vmul.f32 %v2046_v30, %v2046_v30 }
  0x75   : > { %v2923_v4 = vpop.eup %2922  ;;  %v765_v3 = vmax.f32 %v523_v59, -100.0  ;;  %2932 = vlog2.f32 %v895_v62  ;;  %v896_v41 = vsub.f32 1.0, %v255_v25  ;;  %v1535_v38 = vsub.f32 1.0, %v3843_v61 }
  0x76   : > { %v2925_v6 = vpop.eup %2924  ;;  %2556 = vst [vmem:[%s3757_s24 + $0x58] sm:$0xff] %v2428_v31  ;;  %v2300_v8 = vmul.f32 %v2172_v54, %v1916_v0  ;;  %v1035_v9 = vmul.f32 0.6931472, %v2923_v4  ;;  %v2047_v50 = vsub.f32 %v254_v47, %v3843_v61  ;;  %v2048_v12 = vsub.f32 %v255_v25, %v383_v5  ;;  %v385_v0 = vld [vmem:[%s3676_s30 + $0x90] sm:$0xff] }
  0x77   : > { %v2927_v11 = vpop.eup %2926  ;;  %v525_v14 = vmul.f32 0.6931472, %v2925_v6  ;;  %2934 = vlog2.f32 %v896_v41  ;;  %v897_v19 = vsub.f32 1.0, %v256_v42  ;;  %v1405_v13 = vmul.f32 %v765_v3, %v380_v17 }
  0x78   : > { %v2929_v18 = vpop.eup %2928  ;;  %v2429_v23 = vmul.f32 %v3692_v7, %v2300_v8  ;;  %v1277_v27 = vmax.f32 %v1035_v9, -100.0  ;;  %v1037_v28 = vmul.f32 0.6931472, %v2927_v11  ;;  %v1536_v10 = vsub.f32 1.0, %v383_v5 }
  0x79   : > { %v766_v29 = vmax.f32 %v525_v14, -100.0  ;;  %v527_v33 = vmul.f32 0.6931472, %v2929_v18  ;;  %2936 = vlog2.f32 %v256_v42  ;;  %v2175_v63 = vmul.f32 %v2047_v50, %v2047_v50 }
  0x7a   : > { %v2931_v34 = vpop.eup %2930  ;;  %2557 = vst [vmem:[%s3757_s24 + $0x60] sm:$0xff] %v2429_v23  ;;  %v1661_v16 = vmul.f32 %v1533_v37, %v1277_v27  ;;  %v1278_v35 = vmax.f32 %v1037_v28, -100.0  ;;  %2938 = vlog2.f32 %v897_v19  ;;  %v2176_v24 = vmul.f32 %v2048_v12, %v2048_v12 }
  0x7b   : > { %v2933_v39 = vpop.eup %2932  ;;  %v1406_v40 = vmul.f32 %v766_v29, %v3833_v32  ;;  %v767_v43 = vmax.f32 %v527_v33, -100.0  ;;  %v529_v44 = vmul.f32 0.6931472, %v2931_v34  ;;  %2940 = vlog2.f32 %v257_v22 }
  0x7c   : > { %v1789_v36 = vadd.f32 %v1661_v16, %v1405_v13  ;;  %v1662_v45 = vmul.f32 %v1534_v2, %v1278_v35  ;;  %v1039_v46 = vmul.f32 0.6931472, %v2933_v39  ;;  %v2049_v52 = vsub.f32 %v256_v42, %v384_v15  ;;  %v386_v13 = vld [vmem:[%s3676_s30 + $0x98] sm:$0xff] }
  0x7d   : > { %v2935_v48 = vpop.eup %2934  ;;  %v1407_v17 = vmul.f32 %v767_v43, %v3843_v61  ;;  %v768_v51 = vmax.f32 %v529_v44, -100.0  ;;  %v898_v53 = vsub.f32 1.0, %v257_v22  ;;  %v1537_v30 = vsub.f32 1.0, %v384_v15 }
  0x7e   : > { %v1917_v20 = vsub.f32 0.0, %v1789_v36  ;;  %v1790_v49 = vadd.f32 %v1662_v45, %v1406_v40  ;;  %v1279_v21 = vmax.f32 %v1039_v46, -100.0  ;;  %v1041_v32 = vmul.f32 0.6931472, %v2935_v48  ;;  %v387_v48 = vld [vmem:[%s3676_s30 + $0xa0] sm:$0xff] }
  0x7f   : > { %v2937_v47 = vpop.eup %2936  ;;  %v1408_v54 = vmul.f32 %v768_v51, %v383_v5  ;;  %2942 = vlog2.f32 %v898_v53  ;;  %v899_v55 = vsub.f32 1.0, %v258_v26  ;;  %v2177_v31 = vmul.f32 %v2049_v52, %v2049_v52  ;;  %v259_v5 = vld [vmem:[%s3668_s18 + $0xa0] sm:$0xff]  ;;  %v261_v52 = vld [vmem:[%s3668_s18 + $0xb0] sm:$0xff] }
  0x80   : > { %v2939_v56 = vpop.eup %2938  ;;  %v2301_v57 = vmul.f32 %v3840_v60, %v1917_v20  ;;  %v1918_v58 = vsub.f32 0.0, %v1790_v49  ;;  %v1663_v25 = vmul.f32 %v1535_v38, %v1279_v21  ;;  %v1280_v59 = vmax.f32 %v1041_v32, -100.0 }
  0x81   : > { %v2941_v37 = vpop.eup %2940  ;;  %v531_v61 = vmul.f32 0.6931472, %v2937_v47  ;;  %v1043_v62 = vmul.f32 0.6931472, %v2939_v56  ;;  %2944 = vlog2.f32 %v258_v26  ;;  %v1538_v50 = vsub.f32 1.0, %v385_v0  ;;  %v388_v47 = vld [vmem:[%s3676_s30 + $0xa8] sm:$0xff] }
  0x82   : > { %v2430_v2 = vmul.f32 %v3692_v7, %v2301_v57  ;;  %v2302_v42 = vmul.f32 %v3849_v1, %v1918_v58  ;;  %v1791_v4 = vadd.f32 %v1663_v25, %v1407_v17  ;;  %v1664_v3 = vmul.f32 %v1536_v10, %v1280_v59  ;;  %v262_v25 = vld [vmem:[%s3668_s18 + $0xb8] sm:$0xff] }
  0x83   : > { %v769_v41 = vmax.f32 %v531_v61, -100.0  ;;  %v1281_v60 = vmax.f32 %v1043_v62, -100.0  ;;  %v533_v6 = vmul.f32 0.6931472, %v2941_v37  ;;  %2946 = vlog2.f32 %v899_v55 }
  0x84   : > { %2558 = vst [vmem:[%s3757_s24 + $0x68] sm:$0xff] %v2430_v2  ;;  %v2431_v8 = vmul.f32 %v3692_v7, %v2302_v42  ;;  %v1919_v9 = vsub.f32 0.0, %v1791_v4  ;;  %v1792_v38 = vadd.f32 %v1664_v3, %v1408_v54  ;;  %v2050_v1 = vsub.f32 %v257_v22, %v385_v0  ;;  %v260_v22 = vld [vmem:[%s3668_s18 + $0xa8] sm:$0xff]  ;;  %v389_v4 = vld [vmem:[%s3676_s30 + $0xb0] sm:$0xff]  ;;  %v263_v3 = vld [vmem:[%s3668_s18 + $0xc0] sm:$0xff] }
  0x85   : > { %v2943_v11 = vpop.eup %2942  ;;  %v1409_v14 = vmul.f32 %v769_v41, %v384_v15  ;;  %v1665_v12 = vmul.f32 %v1537_v30, %v1281_v60  ;;  %v770_v19 = vmax.f32 %v533_v6, -100.0  ;;  %2948 = vlog2.f32 %v259_v5 }
  0x86   : > { %2559 = vst [vmem:[%s3757_s24 + $0x70] sm:$0xff] %v2431_v8  ;;  %v2303_v18 = vmul.f32 %v2175_v63, %v1919_v9  ;;  %v1920_v23 = vsub.f32 0.0, %v1792_v38  ;;  %v1045_v27 = vmul.f32 0.6931472, %v2943_v11  ;;  %v2051_v10 = vsub.f32 %v258_v26, %v386_v13  ;;  %v390_v11 = vld [vmem:[%s3676_s30 + $0xb8] sm:$0xff] }
  0x87   : > { %v2945_v28 = vpop.eup %2944  ;;  %v1793_v29 = vadd.f32 %v1665_v12, %v1409_v14  ;;  %v1410_v33 = vmul.f32 %v770_v19, %v385_v0  ;;  %v900_v34 = vsub.f32 1.0, %v259_v5  ;;  %v2178_v44 = vmul.f32 %v2050_v1, %v2050_v1 }
  0x88   : > { %v2432_v16 = vmul.f32 %v3692_v7, %v2303_v18  ;;  %v2304_v35 = vmul.f32 %v2176_v24, %v1920_v23  ;;  %v1282_v39 = vmax.f32 %v1045_v27, -100.0  ;;  %v535_v40 = vmul.f32 0.6931472, %v2945_v28 }
  0x89   : > { %v2947_v43 = vpop.eup %2946  ;;  %v1921_v63 = vsub.f32 0.0, %v1793_v29  ;;  %v1539_v36 = vsub.f32 1.0, %v386_v13  ;;  %2950 = vlog2.f32 %v900_v34  ;;  %v2052_v24 = vsub.f32 %v259_v5, %v387_v48 }
  0x8a   : > { %2560 = vst [vmem:[%s3757_s24 + $0x78] sm:$0xff] %v2432_v16  ;;  %v2433_v45 = vmul.f32 %v3692_v7, %v2304_v35  ;;  %v1666_v46 = vmul.f32 %v1538_v50, %v1282_v39  ;;  %v771_v15 = vmax.f32 %v535_v40, -100.0  ;;  %v1047_v26 = vmul.f32 0.6931472, %v2947_v43 }
  0x8b   : > { %v2305_v17 = vmul.f32 %v2177_v31, %v1921_v63  ;;  %2952 = vlog2.f32 %v260_v22  ;;  %v901_v51 = vsub.f32 1.0, %v260_v22  ;;  %v2949_v53 = vpop.eup %2948  ;;  %v2179_v32 = vmul.f32 %v2051_v10, %v2051_v10 }
  0x8c   : > { %2561 = vst [vmem:[%s3757_s24 + $0x80] sm:$0xff] %v2433_v45  ;;  %v1794_v20 = vadd.f32 %v1666_v46, %v1410_v33  ;;  %v1283_v49 = vmax.f32 %v1047_v26, -100.0  ;;  %v1411_v21 = vmul.f32 %v771_v15, %v386_v13  ;;  %v537_v30 = vmul.f32 0.6931472, %v2949_v53  ;;  %v391_v26 = vld [vmem:[%s3676_s30 + $0xc0] sm:$0xff] }
  0x8d   : > { %v2434_v54 = vmul.f32 %v3692_v7, %v2305_v17  ;;  %v1540_v55 = vsub.f32 1.0, %v387_v48  ;;  %2954 = vlog2.f32 %v901_v51  ;;  %v902_v58 = vsub.f32 1.0, %v261_v52 }
  0x8e   : > { %v1922_v56 = vsub.f32 0.0, %v1794_v20  ;;  %v1667_v57 = vmul.f32 %v1539_v36, %v1283_v49  ;;  %2956 = vlog2.f32 %v261_v52  ;;  %v772_v37 = vmax.f32 %v537_v30, -100.0 }
  0x8f   : > { %v2951_v59 = vpop.eup %2950  ;;  %2562 = vst [vmem:[%s3757_s24 + $0x88] sm:$0xff] %v2434_v54  ;;  %v2180_v61 = vmul.f32 %v2052_v24, %v2052_v24  ;;  %v1541_v62 = vsub.f32 1.0, %v388_v47  ;;  %v2053_v31 = vsub.f32 %v260_v22, %v388_v47  ;;  %2958 = vlog2.f32 %v902_v58  ;;  %v264_v22 = vld [vmem:[%s3668_s18 + $0xc8] sm:$0xff] }
  0x90   : > { %v2306_v0 = vmul.f32 %v2178_v44, %v1922_v56  ;;  %v1795_v2 = vadd.f32 %v1667_v57, %v1411_v21  ;;  %v1049_v42 = vmul.f32 0.6931472, %v2951_v59  ;;  %v1412_v60 = vmul.f32 %v772_v37, %v387_v48  ;;  %v392_v59 = vld [vmem:[%s3676_s30 + $0xc8] sm:$0xff] }
  0x91   : > { %v2953_v41 = vpop.eup %2952  ;;  %v2054_v6 = vsub.f32 %v261_v52, %v389_v4  ;;  %2960 = vlog2.f32 %v262_v25  ;;  %v903_v8 = vsub.f32 1.0, %v262_v25  ;;  %v2181_v12 = vmul.f32 %v2053_v31, %v2053_v31 }
  0x92   : > { %v2435_v9 = vmul.f32 %v3692_v7, %v2306_v0  ;;  %v1923_v38 = vsub.f32 0.0, %v1795_v2  ;;  %v1284_v50 = vmax.f32 %v1049_v42, -100.0  ;;  %v539_v5 = vmul.f32 0.6931472, %v2953_v41 }
  0x93   : > { %v2955_v14 = vpop.eup %2954  ;;  %v1542_v19 = vsub.f32 1.0, %v389_v4  ;;  %2962 = vlog2.f32 %v903_v8  ;;  %v904_v1 = vsub.f32 1.0, %v263_v3  ;;  %v2182_v33 = vmul.f32 %v2054_v6, %v2054_v6 }
  0x94   : > { %v2957_v18 = vpop.eup %2956  ;;  %2563 = vst [vmem:[%s3757_s24 + $0x90] sm:$0xff] %v2435_v9  ;;  %v2307_v23 = vmul.f32 %v2179_v32, %v1923_v38  ;;  %v1668_v27 = vmul.f32 %v1540_v55, %v1284_v50  ;;  %v773_v13 = vmax.f32 %v539_v5, -100.0  ;;  %v1051_v28 = vmul.f32 0.6931472, %v2955_v14  ;;  %v265_v55 = vld [vmem:[%s3668_s18 + $0xd0] sm:$0xff]  ;;  %v266_v5 = vld [vmem:[%s3668_s18 + $0xd8] sm:$0xff] }
  0x95   : > { %v541_v29 = vmul.f32 0.6931472, %v2957_v18  ;;  %v1543_v10 = vsub.f32 1.0, %v390_v11  ;;  %2964 = vlog2.f32 %v263_v3  ;;  %v2959_v34 = vpop.eup %2958  ;;  %v2055_v36 = vsub.f32 %v262_v25, %v390_v11 }
  0x96   : > { %v2436_v16 = vmul.f32 %v3692_v7, %v2307_v23  ;;  %v1796_v35 = vadd.f32 %v1668_v27, %v1412_v60  ;;  %v1285_v39 = vmax.f32 %v1051_v28, -100.0  ;;  %v1413_v40 = vmul.f32 %v773_v13, %v388_v47  ;;  %v393_v13 = vld [vmem:[%s3676_s30 + $0xd0] sm:$0xff]  ;;  %v267_v28 = vld [vmem:[%s3668_s18 + $0xe0] sm:$0xff] }
  0x97   : > { %v2961_v43 = vpop.eup %2960  ;;  %v774_v63 = vmax.f32 %v541_v29, -100.0  ;;  %v1053_v44 = vmul.f32 0.6931472, %v2959_v34  ;;  %2966 = vlog2.f32 %v904_v1  ;;  %v2056_v51 = vsub.f32 %v263_v3, %v391_v26 }
  0x98   : > { %2564 = vst [vmem:[%s3757_s24 + $0x98] sm:$0xff] %v2436_v16  ;;  %v1924_v45 = vsub.f32 0.0, %v1796_v35  ;;  %v1669_v46 = vmul.f32 %v1541_v62, %v1285_v39  ;;  %v543_v15 = vmul.f32 0.6931472, %v2961_v43  ;;  %2968 = vlog2.f32 %v264_v22 }
  0x99   : > { %v2963_v48 = vpop.eup %2962  ;;  %v1286_v17 = vmax.f32 %v1053_v44, -100.0  ;;  %v1414_v24 = vmul.f32 %v774_v63, %v389_v4  ;;  %v905_v52 = vsub.f32 1.0, %v264_v22  ;;  %v2183_v54 = vmul.f32 %v2055_v36, %v2055_v36 }
  0x9a   : > { %v2308_v53 = vmul.f32 %v2180_v61, %v1924_v45  ;;  %v1797_v20 = vadd.f32 %v1669_v46, %v1413_v40  ;;  %v775_v49 = vmax.f32 %v543_v15, -100.0  ;;  %v1055_v21 = vmul.f32 0.6931472, %v2963_v48 }
  0x9b   : > { %v2965_v32 = vpop.eup %2964  ;;  %v1670_v47 = vmul.f32 %v1542_v19, %v1286_v17  ;;  %v1544_v30 = vsub.f32 1.0, %v391_v26  ;;  %2970 = vlog2.f32 %v905_v52  ;;  %v2184_v61 = vmul.f32 %v2056_v51, %v2056_v51  ;;  %v268_v51 = vld [vmem:[%s3668_s18 + $0xe8] sm:$0xff] }
  0x9c   : > { %v2437_v56 = vmul.f32 %v3692_v7, %v2308_v53  ;;  %v1925_v57 = vsub.f32 0.0, %v1797_v20  ;;  %v1287_v58 = vmax.f32 %v1055_v21, -100.0  ;;  %v1415_v25 = vmul.f32 %v775_v49, %v390_v11 }
  0x9d   : > { %v2967_v37 = vpop.eup %2966  ;;  %v1798_v62 = vadd.f32 %v1670_v47, %v1414_v24  ;;  %v545_v31 = vmul.f32 0.6931472, %v2965_v32  ;;  %2972 = vlog2.f32 %v265_v55  ;;  %v906_v3 = vsub.f32 1.0, %v265_v55 }
  0x9e   : > { %v2969_v0 = vpop.eup %2968  ;;  %2565 = vst [vmem:[%s3757_s24 + $0xa0] sm:$0xff] %v2437_v56  ;;  %v2309_v2 = vmul.f32 %v2181_v12, %v1925_v57  ;;  %v1671_v42 = vmul.f32 %v1543_v10, %v1287_v58  ;;  %v1057_v4 = vmul.f32 0.6931472, %v2967_v37  ;;  %v1545_v8 = vsub.f32 1.0, %v392_v59  ;;  %v395_v57 = vld [vmem:[%s3676_s30 + $0xe0] sm:$0xff] }
  0x9f   : > { %v1926_v41 = vsub.f32 0.0, %v1798_v62  ;;  %v776_v60 = vmax.f32 %v545_v31, -100.0  ;;  %v547_v6 = vmul.f32 0.6931472, %v2969_v0  ;;  %2974 = vlog2.f32 %v906_v3 }
  0xa0   : > { %v2438_v9 = vmul.f32 %v3692_v7, %v2309_v2  ;;  %v1799_v38 = vadd.f32 %v1671_v42, %v1415_v25  ;;  %v1288_v50 = vmax.f32 %v1057_v4, -100.0  ;;  %v2057_v1 = vsub.f32 %v264_v22, %v392_v59  ;;  %v396_v2 = vld [vmem:[%s3676_s30 + $0xe8] sm:$0xff] }
  0xa1   : > { %v2971_v11 = vpop.eup %2970  ;;  %v2310_v14 = vmul.f32 %v2182_v33, %v1926_v41  ;;  %v1416_v19 = vmul.f32 %v776_v60, %v391_v26  ;;  %v777_v12 = vmax.f32 %v547_v6, -100.0  ;;  %2976 = vlog2.f32 %v266_v5  ;;  %v394_v26 = vld [vmem:[%s3676_s30 + $0xd8] sm:$0xff] }
  0xa2   : > { %2566 = vst [vmem:[%s3757_s24 + $0xa8] sm:$0xff] %v2438_v9  ;;  %v1927_v18 = vsub.f32 0.0, %v1799_v38  ;;  %v1672_v23 = vmul.f32 %v1544_v30, %v1288_v50  ;;  %v1059_v27 = vmul.f32 0.6931472, %v2971_v11  ;;  %v2058_v16 = vsub.f32 %v265_v55, %v393_v13  ;;  %v3913_v50 = vld [vmem:[%s3668_s18 + $0xf8] sm:$0xff] }
  0xa3   : > { %v2973_v29 = vpop.eup %2972  ;;  %v2439_v10 = vmul.f32 %v3692_v7, %v2310_v14  ;;  %v1417_v34 = vmul.f32 %v777_v12, %v392_v59  ;;  %v907_v35 = vsub.f32 1.0, %v266_v5  ;;  %v2185_v43 = vmul.f32 %v2057_v1, %v2057_v1  ;;  %v397_v1 = vld [vmem:[%s3676_s30 + $0xf0] sm:$0xff] }
  0xa4   : > { %v2311_v39 = vmul.f32 %v2183_v54, %v1927_v18  ;;  %v1800_v33 = vadd.f32 %v1672_v23, %v1416_v19  ;;  %v1289_v40 = vmax.f32 %v1059_v27, -100.0  ;;  %v549_v22 = vmul.f32 0.6931472, %v2973_v29  ;;  %v269_v54 = vld [vmem:[%s3668_s18 + $0xf0] sm:$0xff] }
  0xa5   : > { %2567 = vst [vmem:[%s3757_s24 + $0xb0] sm:$0xff] %v2439_v10  ;;  %2978 = vlog2.f32 %v907_v35  ;;  %v908_v63 = vsub.f32 1.0, %v267_v28  ;;  %v2975_v44 = vpop.eup %2974  ;;  %v1546_v17 = vsub.f32 1.0, %v393_v13  ;;  %v2059_v24 = vsub.f32 %v266_v5, %v394_v26 }
  0xa6   : > { %v2440_v36 = vmul.f32 %v3692_v7, %v2311_v39  ;;  %v1928_v45 = vsub.f32 0.0, %v1800_v33  ;;  %v1673_v46 = vmul.f32 %v1545_v8, %v1289_v40  ;;  %v778_v15 = vmax.f32 %v549_v22, -100.0 }
  0xa7   : > { %v1061_v48 = vmul.f32 0.6931472, %v2975_v44  ;;  %2980 = vlog2.f32 %v267_v28  ;;  %v2977_v52 = vpop.eup %2976  ;;  %v2186_v49 = vmul.f32 %v2058_v16, %v2058_v16  ;;  %v1547_v56 = vsub.f32 1.0, %v394_v26  ;;  %v271_v44 = vld [vmem:[%s3668_s18 + $0x100] sm:$0xff] }
  0xa8   : > { %2568 = vst [vmem:[%s3757_s24 + $0xb8] sm:$0xff] %v2440_v36  ;;  %v2312_v53 = vmul.f32 %v2184_v61, %v1928_v45  ;;  %v1801_v20 = vadd.f32 %v1673_v46, %v1417_v34  ;;  %2982 = vlog2.f32 %v908_v63  ;;  %v1418_v32 = vmul.f32 %v778_v15, %v393_v13 }
  0xa9   : > { %v1290_v21 = vmax.f32 %v1061_v48, -100.0  ;;  %v551_v47 = vmul.f32 0.6931472, %v2977_v52  ;;  %2984 = vlog2.f32 %v268_v51  ;;  %v909_v58 = vsub.f32 1.0, %v268_v51 }
  0xaa   : > { %v2441_v30 = vmul.f32 %v3692_v7, %v2312_v53  ;;  %v1929_v55 = vsub.f32 0.0, %v1801_v20  ;;  %v2187_v62 = vmul.f32 %v2059_v24, %v2059_v24  ;;  %v2060_v31 = vsub.f32 %v267_v28, %v395_v57 }
  0xab   : > { %v2979_v25 = vpop.eup %2978  ;;  %v1674_v59 = vmul.f32 %v1546_v17, %v1290_v21  ;;  %v779_v37 = vmax.f32 %v551_v47, -100.0  ;;  %2986 = vlog2.f32 %v909_v58  ;;  %v910_v42 = vsub.f32 1.0, %v269_v54 }
  0xac   : > { %2569 = vst [vmem:[%s3757_s24 + $0xc0] sm:$0xff] %v2441_v30  ;;  %v2313_v61 = vmul.f32 %v2185_v43, %v1929_v55  ;;  %v1063_v0 = vmul.f32 0.6931472, %v2979_v25  ;;  %v1548_v60 = vsub.f32 1.0, %v395_v57  ;;  %2988 = vlog2.f32 %v269_v54  ;;  %v398_v30 = vld [vmem:[%s3676_s30 + $0xf8] sm:$0xff] }
  0xad   : > { %v2981_v4 = vpop.eup %2980  ;;  %v1802_v3 = vadd.f32 %v1674_v59, %v1418_v32  ;;  %v1419_v41 = vmul.f32 %v779_v37, %v394_v26  ;;  %2990 = vlog2.f32 %v910_v42  ;;  %v2188_v19 = vmul.f32 %v2060_v31, %v2060_v31 }
  0xae   : > { %v2983_v6 = vpop.eup %2982  ;;  %v2442_v8 = vmul.f32 %v3692_v7, %v2313_v61  ;;  %v1291_v9 = vmax.f32 %v1063_v0, -100.0  ;;  %v553_v38 = vmul.f32 0.6931472, %v2981_v4  ;;  %v1549_v12 = vsub.f32 1.0, %v396_v2 }
  0xaf   : > { %v2985_v5 = vpop.eup %2984  ;;  %v1930_v11 = vsub.f32 0.0, %v1802_v3  ;;  %v1065_v14 = vmul.f32 0.6931472, %v2983_v6  ;;  %2992 = vlog2.f32 %v3913_v50  ;;  %v2061_v29 = vsub.f32 %v268_v51, %v396_v2  ;;  %v273_v6 = vld [vmem:[%s3668_s18 + $0x110] sm:$0xff] }
  0xb0   : > { %2570 = vst [vmem:[%s3757_s24 + $0xc8] sm:$0xff] %v2442_v8  ;;  %v1675_v18 = vmul.f32 %v1547_v56, %v1291_v9  ;;  %v780_v23 = vmax.f32 %v553_v38, -100.0  ;;  %v555_v27 = vmul.f32 0.6931472, %v2985_v5  ;;  %v911_v10 = vsub.f32 1.0, %v3913_v50  ;;  %v3924_v56 = vld [vmem:[%s3668_s18 + $0x108] sm:$0xff] }
  0xb1   : > { %v2314_v13 = vmul.f32 %v2186_v49, %v1930_v11  ;;  %v1292_v28 = vmax.f32 %v1065_v14, -100.0  ;;  %v2987_v34 = vpop.eup %2986  ;;  %v1550_v33 = vsub.f32 1.0, %v397_v1  ;;  %v2062_v26 = vsub.f32 %v269_v54, %v397_v1  ;;  %v399_v38 = vld [vmem:[%s3676_s30 + $0x100] sm:$0xff] }
  0xb2   : > { %v1803_v16 = vadd.f32 %v1675_v18, %v1419_v41  ;;  %v1420_v35 = vmul.f32 %v780_v23, %v395_v57  ;;  %v781_v39 = vmax.f32 %v555_v27, -100.0  ;;  %v2989_v40 = vpop.eup %2988  ;;  %v1067_v63 = vmul.f32 0.6931472, %v2987_v34 }
  0xb3   : > { %v2443_v22 = vmul.f32 %v3692_v7, %v2314_v13  ;;  %v1676_v43 = vmul.f32 %v1548_v60, %v1292_v28  ;;  %2994 = vlog2.f32 %v911_v10  ;;  %v2991_v36 = vpop.eup %2990  ;;  %v557_v15 = vmul.f32 0.6931472, %v2989_v40 }
  0xb4   : > { %v1931_v45 = vsub.f32 0.0, %v1803_v16  ;;  %v1421_v46 = vmul.f32 %v781_v39, %v396_v2  ;;  %v1293_v17 = vmax.f32 %v1067_v63, -100.0  ;;  %v1069_v24 = vmul.f32 0.6931472, %v2991_v36 }
  0xb5   : > { %2571 = vst [vmem:[%s3757_s24 + $0xd0] sm:$0xff] %v2443_v22  ;;  %v1804_v48 = vadd.f32 %v1676_v43, %v1420_v35  ;;  %2996 = vlog2.f32 %v271_v44  ;;  %v2993_v51 = vpop.eup %2992  ;;  %v2189_v53 = vmul.f32 %v2061_v29, %v2061_v29  ;;  %v782_v20 = vmax.f32 %v557_v15, -100.0  ;;  %v274_v29 = vld [vmem:[%s3668_s18 + $0x118] sm:$0xff]  ;;  %v400_v35 = vld [vmem:[%s3676_s30 + $0x108] sm:$0xff]  ;;  %v3941_v43 = vld [vmem:[%s3668_s18 + $0x120] sm:$0xff] }
  0xb6   : > { %v2315_v52 = vmul.f32 %v2187_v62, %v1931_v45  ;;  %v912_v49 = vsub.f32 1.0, %v271_v44  ;;  %v1677_v32 = vmul.f32 %v1549_v12, %v1293_v17  ;;  %v1294_v47 = vmax.f32 %v1069_v24, -100.0  ;;  %v401_v17 = vld [vmem:[%s3676_s30 + $0x110] sm:$0xff] }
  0xb7   : > { %v1932_v21 = vsub.f32 0.0, %v1804_v48  ;;  %v559_v55 = vmul.f32 0.6931472, %v2993_v51  ;;  %v1422_v57 = vmul.f32 %v782_v20, %v397_v1  ;;  %v2190_v58 = vmul.f32 %v2062_v26, %v2062_v26 }
  0xb8   : > { %v2444_v54 = vmul.f32 %v3692_v7, %v2315_v52  ;;  %2998 = vlog2.f32 %v912_v49  ;;  %v1805_v37 = vadd.f32 %v1677_v32, %v1421_v46  ;;  %v1678_v62 = vmul.f32 %v1550_v33, %v1294_v47  ;;  %v276_v47 = vld [vmem:[%s3668_s18 + $0x128] sm:$0xff] }
  0xb9   : > { %v2995_v25 = vpop.eup %2994  ;;  %v2316_v59 = vmul.f32 %v2188_v19, %v1932_v21  ;;  %v783_v31 = vmax.f32 %v559_v55, -100.0  ;;  %v1551_v0 = vsub.f32 1.0, %v398_v30  ;;  %3000 = vlog2.f32 %v3924_v56 }
  0xba   : > { %2572 = vst [vmem:[%s3757_s24 + $0xd8] sm:$0xff] %v2444_v54  ;;  %v1071_v61 = vmul.f32 0.6931472, %v2995_v25  ;;  %v913_v2 = vsub.f32 1.0, %v3924_v56  ;;  %v1933_v3 = vsub.f32 0.0, %v1805_v37  ;;  %v1806_v41 = vadd.f32 %v1678_v62, %v1422_v57  ;;  %v402_v37 = vld [vmem:[%s3676_s30 + $0x118] sm:$0xff] }
  0xbb   : > { %v2997_v42 = vpop.eup %2996  ;;  %v2445_v4 = vmul.f32 %v3692_v7, %v2316_v59  ;;  %v2063_v60 = vsub.f32 %v3913_v50, %v398_v30  ;;  %v1423_v9 = vmul.f32 %v783_v31, %v398_v30  ;;  %v2064_v19 = vsub.f32 %v271_v44, %v399_v38 }
  0xbc   : > { %v1295_v8 = vmax.f32 %v1071_v61, -100.0  ;;  %v561_v5 = vmul.f32 0.6931472, %v2997_v42  ;;  %3002 = vlog2.f32 %v913_v2  ;;  %v2317_v11 = vmul.f32 %v2189_v53, %v1933_v3 }
  0xbd   : > { %2573 = vst [vmem:[%s3757_s24 + $0xe0] sm:$0xff] %v2445_v4  ;;  %v1934_v14 = vsub.f32 0.0, %v1806_v41  ;;  %3004 = vlog2.f32 %v273_v6  ;;  %v914_v23 = vsub.f32 1.0, %v273_v6  ;;  %v1552_v28 = vsub.f32 1.0, %v399_v38  ;;  %v3953_v41 = vld [vmem:[%s3668_s18 + $0x130] sm:$0xff] }
  0xbe   : > { %v2999_v12 = vpop.eup %2998  ;;  %v1679_v1 = vmul.f32 %v1551_v0, %v1295_v8  ;;  %v784_v18 = vmax.f32 %v561_v5, -100.0  ;;  %v2446_v50 = vmul.f32 %v3692_v7, %v2317_v11  ;;  %v2191_v16 = vmul.f32 %v2063_v60, %v2063_v60 }
  0xbf   : > { %v2318_v27 = vmul.f32 %v2190_v58, %v1934_v14  ;;  %v1073_v13 = vmul.f32 0.6931472, %v2999_v12  ;;  %v3001_v10 = vpop.eup %3000  ;;  %3006 = vlog2.f32 %v914_v23  ;;  %v2192_v36 = vmul.f32 %v2064_v19, %v2064_v19  ;;  %v403_v19 = vld [vmem:[%s3676_s30 + $0x120] sm:$0xff] }
  0xc0   : > { %v1807_v34 = vadd.f32 %v1679_v1, %v1423_v9  ;;  %2574 = vst [vmem:[%s3757_s24 + $0xe8] sm:$0xff] %v2446_v50  ;;  %v1424_v40 = vmul.f32 %v784_v18, %v399_v38  ;;  %v563_v22 = vmul.f32 0.6931472, %v3001_v10  ;;  %3008 = vlog2.f32 %v274_v29 }
  0xc1   : > { %v2447_v39 = vmul.f32 %v3692_v7, %v2318_v27  ;;  %v1296_v33 = vmax.f32 %v1073_v13, -100.0  ;;  %v915_v45 = vsub.f32 1.0, %v274_v29  ;;  %v1553_v48 = vsub.f32 1.0, %v400_v35 }
  0xc2   : > { %v3003_v63 = vpop.eup %3002  ;;  %v1935_v44 = vsub.f32 0.0, %v1807_v34  ;;  %v785_v15 = vmax.f32 %v563_v22, -100.0  ;;  %v2065_v52 = vsub.f32 %v3924_v56, %v400_v35  ;;  %v916_v53 = vsub.f32 1.0, %v3941_v43 }
  0xc3   : > { %2575 = vst [vmem:[%s3757_s24 + $0xf0] sm:$0xff] %v2447_v39  ;;  %v1680_v46 = vmul.f32 %v1552_v28, %v1296_v33  ;;  %v1075_v26 = vmul.f32 0.6931472, %v3003_v63  ;;  %v3005_v24 = vpop.eup %3004  ;;  %3010 = vlog2.f32 %v915_v45  ;;  %v1554_v54 = vsub.f32 1.0, %v401_v17  ;;  %v404_v39 = vld [vmem:[%s3676_s30 + $0x128] sm:$0xff] }
  0xc4   : > { %v2319_v51 = vmul.f32 %v2191_v16, %v1935_v44  ;;  %v1425_v21 = vmul.f32 %v785_v15, %v400_v35  ;;  %v565_v32 = vmul.f32 0.6931472, %v3005_v24  ;;  %v2066_v57 = vsub.f32 %v273_v6, %v401_v17 }
  0xc5   : > { %v1808_v20 = vadd.f32 %v1680_v46, %v1424_v40  ;;  %v1297_v49 = vmax.f32 %v1075_v26, -100.0  ;;  %v3007_v30 = vpop.eup %3006  ;;  %3012 = vlog2.f32 %v3941_v43  ;;  %v2193_v31 = vmul.f32 %v2065_v52, %v2065_v52 }
  0xc6   : > { %v2448_v55 = vmul.f32 %v3692_v7, %v2319_v51  ;;  %v786_v25 = vmax.f32 %v565_v32, -100.0  ;;  %v1077_v59 = vmul.f32 0.6931472, %v3007_v30  ;;  %v3009_v62 = vpop.eup %3008  ;;  %v2067_v61 = vsub.f32 %v274_v29, %v402_v37  ;;  %v278_v29 = vld [vmem:[%s3668_s18 + $0x138] sm:$0xff] }
  0xc7   : > { %v1936_v58 = vsub.f32 0.0, %v1808_v20  ;;  %v1681_v56 = vmul.f32 %v1553_v48, %v1297_v49  ;;  %3014 = vlog2.f32 %v916_v53  ;;  %v917_v0 = vsub.f32 1.0, %v276_v47 }
  0xc8   : > { %2576 = vst [vmem:[%s3757_s24 + $0xf8] sm:$0xff] %v2448_v55  ;;  %v1298_v4 = vmax.f32 %v1077_v59, -100.0  ;;  %v1426_v3 = vmul.f32 %v786_v25, %v401_v17  ;;  %v2194_v6 = vmul.f32 %v2066_v57, %v2066_v57  ;;  %v567_v8 = vmul.f32 0.6931472, %v3009_v62  ;;  %v3966_v17 = vld [vmem:[%s3668_s18 + $0x140] sm:$0xff] }
  0xc9   : > { %v2320_v2 = vmul.f32 %v2192_v36, %v1936_v58  ;;  %v1809_v42 = vadd.f32 %v1681_v56, %v1425_v21  ;;  %v3011_v60 = vpop.eup %3010  ;;  %v1555_v9 = vsub.f32 1.0, %v402_v37  ;;  %3016 = vlog2.f32 %v276_v47 }
  0xca   : > { %v1682_v11 = vmul.f32 %v1554_v54, %v1298_v4  ;;  %v1079_v14 = vmul.f32 0.6931472, %v3011_v60  ;;  %v787_v1 = vmax.f32 %v567_v8, -100.0  ;;  %v2195_v18 = vmul.f32 %v2067_v61, %v2067_v61  ;;  %v406_v60 = vld [vmem:[%s3676_s30 + $0x138] sm:$0xff] }
  0xcb   : > { %v2449_v38 = vmul.f32 %v3692_v7, %v2320_v2  ;;  %v1937_v5 = vsub.f32 0.0, %v1809_v42  ;;  %v3013_v12 = vpop.eup %3012  ;;  %3018 = vlog2.f32 %v917_v0  ;;  %v918_v23 = vsub.f32 1.0, %v3953_v41 }
  0xcc   : > { %v1810_v27 = vadd.f32 %v1682_v11, %v1426_v3  ;;  %v1299_v13 = vmax.f32 %v1079_v14, -100.0  ;;  %v569_v28 = vmul.f32 0.6931472, %v3013_v12  ;;  %v1427_v34 = vmul.f32 %v787_v1, %v402_v37  ;;  %v280_v37 = vld [vmem:[%s3668_s18 + $0x148] sm:$0xff] }
  0xcd   : > { %2577 = vst [vmem:[%s3757_s24 + $0x100] sm:$0xff] %v2449_v38  ;;  %v2321_v50 = vmul.f32 %v2193_v31, %v1937_v5  ;;  %v3015_v10 = vpop.eup %3014  ;;  %v1556_v16 = vsub.f32 1.0, %v403_v19  ;;  %v2068_v35 = vsub.f32 %v3941_v43, %v403_v19  ;;  %3020 = vlog2.f32 %v3953_v41 }
  0xce   : > { %v1938_v40 = vsub.f32 0.0, %v1810_v27  ;;  %v1683_v22 = vmul.f32 %v1555_v9, %v1299_v13  ;;  %v788_v63 = vmax.f32 %v569_v28, -100.0  ;;  %v1081_v36 = vmul.f32 0.6931472, %v3015_v10 }
  0xcf   : > { %v2450_v33 = vmul.f32 %v3692_v7, %v2321_v50  ;;  %v3017_v44 = vpop.eup %3016  ;;  %v2069_v45 = vsub.f32 %v276_v47, %v404_v39  ;;  %3022 = vlog2.f32 %v918_v23  ;;  %v919_v46 = vsub.f32 1.0, %v278_v29  ;;  %v405_v47 = vld [vmem:[%s3676_s30 + $0x130] sm:$0xff] }
  0xd0   : > { %v2322_v15 = vmul.f32 %v2194_v6, %v1938_v40  ;;  %v1811_v26 = vadd.f32 %v1683_v22, %v1427_v34  ;;  %v571_v48 = vmul.f32 0.6931472, %v3017_v44  ;;  %v1557_v43 = vsub.f32 1.0, %v404_v39 }
  0xd1   : > { %2578 = vst [vmem:[%s3757_s24 + $0x108] sm:$0xff] %v2450_v33  ;;  %v3019_v24 = vpop.eup %3018  ;;  %v1300_v51 = vmax.f32 %v1081_v36, -100.0  ;;  %v1428_v52 = vmul.f32 %v788_v63, %v403_v19  ;;  %v2196_v53 = vmul.f32 %v2068_v35, %v2068_v35  ;;  %3024 = vlog2.f32 %v278_v29  ;;  %v281_v19 = vld [vmem:[%s3668_s18 + $0x150] sm:$0xff]  ;;  %v3982_v63 = vld [vmem:[%s3668_s18 + $0x158] sm:$0xff] }
  0xd2   : > { %v2451_v20 = vmul.f32 %v3692_v7, %v2322_v15  ;;  %v1939_v49 = vsub.f32 0.0, %v1811_v26  ;;  %v789_v21 = vmax.f32 %v571_v48, -100.0  ;;  %v1083_v32 = vmul.f32 0.6931472, %v3019_v24  ;;  %v408_v24 = vld [vmem:[%s3676_s30 + $0x148] sm:$0xff] }
  0xd3   : > { %v3021_v30 = vpop.eup %3020  ;;  %v1684_v55 = vmul.f32 %v1556_v16, %v1300_v51  ;;  %v2197_v54 = vmul.f32 %v2069_v45, %v2069_v45  ;;  %3026 = vlog2.f32 %v919_v46  ;;  %v920_v57 = vsub.f32 1.0, %v3966_v17 }
  0xd4   : > { %2579 = vst [vmem:[%s3757_s24 + $0x110] sm:$0xff] %v2451_v20  ;;  %v2323_v58 = vmul.f32 %v2195_v18, %v1939_v49  ;;  %v1301_v56 = vmax.f32 %v1083_v32, -100.0  ;;  %v1429_v25 = vmul.f32 %v789_v21, %v404_v39  ;;  %v573_v59 = vmul.f32 0.6931472, %v3021_v30 }
  0xd5   : > { %v3023_v62 = vpop.eup %3022  ;;  %v1812_v31 = vadd.f32 %v1684_v55, %v1428_v52  ;;  %v1558_v61 = vsub.f32 1.0, %v405_v47  ;;  %v2070_v0 = vsub.f32 %v3953_v41, %v405_v47  ;;  %3028 = vlog2.f32 %v3966_v17 }
  0xd6   : > { %v2452_v2 = vmul.f32 %v3692_v7, %v2323_v58  ;;  %v1685_v42 = vmul.f32 %v1557_v43, %v1301_v56  ;;  %v790_v4 = vmax.f32 %v573_v59, -100.0  ;;  %v1085_v3 = vmul.f32 0.6931472, %v3023_v62 }
  0xd7   : > { %v3025_v6 = vpop.eup %3024  ;;  %v1940_v8 = vsub.f32 0.0, %v1812_v31  ;;  %v2071_v9 = vsub.f32 %v278_v29, %v406_v60  ;;  %3030 = vlog2.f32 %v920_v57  ;;  %v921_v38 = vsub.f32 1.0, %v280_v37  ;;  %v407_v29 = vld [vmem:[%s3676_s30 + $0x140] sm:$0xff] }
  0xd8   : > { %2580 = vst [vmem:[%s3757_s24 + $0x118] sm:$0xff] %v2452_v2  ;;  %v1813_v5 = vadd.f32 %v1685_v42, %v1429_v25  ;;  %v1302_v11 = vmax.f32 %v1085_v3, -100.0  ;;  %v1430_v14 = vmul.f32 %v790_v4, %v405_v47  ;;  %v575_v41 = vmul.f32 0.6931472, %v3025_v6  ;;  %v283_v47 = vld [vmem:[%s3668_s18 + $0x160] sm:$0xff] }
  0xd9   : > { %v3027_v12 = vpop.eup %3026  ;;  %v2324_v1 = vmul.f32 %v2196_v53, %v1940_v8  ;;  %v2198_v18 = vmul.f32 %v2070_v0, %v2070_v0  ;;  %v1559_v23 = vsub.f32 1.0, %v406_v60  ;;  %3032 = vlog2.f32 %v280_v37 }
  0xda   : > { %v1941_v50 = vsub.f32 0.0, %v1813_v5  ;;  %v1686_v27 = vmul.f32 %v1558_v61, %v1302_v11  ;;  %v791_v13 = vmax.f32 %v575_v41, -100.0  ;;  %v1087_v28 = vmul.f32 0.6931472, %v3027_v12 }
  0xdb   : > { %v3029_v10 = vpop.eup %3028  ;;  %v2453_v34 = vmul.f32 %v3692_v7, %v2324_v1  ;;  %v2199_v16 = vmul.f32 %v2071_v9, %v2071_v9  ;;  %3034 = vlog2.f32 %v921_v38  ;;  %v922_v35 = vsub.f32 1.0, %v281_v19 }
  0xdc   : > { %v2325_v39 = vmul.f32 %v2197_v54, %v1941_v50  ;;  %v1814_v33 = vadd.f32 %v1686_v27, %v1430_v14  ;;  %v1303_v40 = vmax.f32 %v1087_v28, -100.0  ;;  %v1431_v22 = vmul.f32 %v791_v13, %v406_v60  ;;  %v3996_v60 = vld [vmem:[%s3668_s18 + $0x168] sm:$0xff] }
  0xdd   : > { %v3031_v44 = vpop.eup %3030  ;;  %2581 = vst [vmem:[%s3757_s24 + $0x120] sm:$0xff] %v2453_v34  ;;  %v577_v36 = vmul.f32 0.6931472, %v3029_v10  ;;  %v1560_v45 = vsub.f32 1.0, %v407_v29  ;;  %v2072_v46 = vsub.f32 %v3966_v17, %v407_v29  ;;  %3036 = vlog2.f32 %v281_v19 }
  0xde   : > { %v2454_v15 = vmul.f32 %v3692_v7, %v2325_v39  ;;  %v1942_v26 = vsub.f32 0.0, %v1814_v33  ;;  %v1687_v48 = vmul.f32 %v1559_v23, %v1303_v40  ;;  %v1089_v43 = vmul.f32 0.6931472, %v3031_v44  ;;  %v411_v44 = vld [vmem:[%s3676_s30 + $0x160] sm:$0xff] }
  0xdf   : > { %v3033_v51 = vpop.eup %3032  ;;  %v792_v52 = vmax.f32 %v577_v36, -100.0  ;;  %v2073_v53 = vsub.f32 %v280_v37, %v408_v24  ;;  %3038 = vlog2.f32 %v922_v35  ;;  %v923_v20 = vsub.f32 1.0, %v3982_v63  ;;  %v409_v37 = vld [vmem:[%s3676_s30 + $0x150] sm:$0xff] }
  0xe0   : > { %2582 = vst [vmem:[%s3757_s24 + $0x128] sm:$0xff] %v2454_v15  ;;  %v2326_v49 = vmul.f32 %v2198_v18, %v1942_v26  ;;  %v1815_v21 = vadd.f32 %v1687_v48, %v1431_v22  ;;  %v1304_v32 = vmax.f32 %v1089_v43, -100.0  ;;  %v579_v17 = vmul.f32 0.6931472, %v3033_v51 }
  0xe1   : > { %v3035_v30 = vpop.eup %3034  ;;  %v1432_v55 = vmul.f32 %v792_v52, %v407_v29  ;;  %v2200_v54 = vmul.f32 %v2072_v46, %v2072_v46  ;;  %v1561_v57 = vsub.f32 1.0, %v408_v24  ;;  %3040 = vlog2.f32 %v3982_v63  ;;  %v285_v29 = vld [vmem:[%s3668_s18 + $0x170] sm:$0xff] }
  0xe2   : > { %v2455_v58 = vmul.f32 %v3692_v7, %v2326_v49  ;;  %v1943_v56 = vsub.f32 0.0, %v1815_v21  ;;  %v1688_v25 = vmul.f32 %v1560_v45, %v1304_v32  ;;  %v793_v59 = vmax.f32 %v579_v17, -100.0 }
  0xe3   : > { %v3037_v62 = vpop.eup %3036  ;;  %v1091_v31 = vmul.f32 0.6931472, %v3035_v30  ;;  %v2074_v61 = vsub.f32 %v281_v19, %v409_v37  ;;  %3042 = vlog2.f32 %v923_v20  ;;  %v924_v0 = vsub.f32 1.0, %v283_v47  ;;  %v410_v19 = vld [vmem:[%s3676_s30 + $0x158] sm:$0xff] }
  0xe4   : > { %2583 = vst [vmem:[%s3757_s24 + $0x130] sm:$0xff] %v2455_v58  ;;  %v2327_v2 = vmul.f32 %v2199_v16, %v1943_v56  ;;  %v1816_v42 = vadd.f32 %v1688_v25, %v1432_v55  ;;  %v2201_v4 = vmul.f32 %v2073_v53, %v2073_v53  ;;  %v581_v3 = vmul.f32 0.6931472, %v3037_v62 }
  0xe5   : > { %v3039_v6 = vpop.eup %3038  ;;  %v1305_v8 = vmax.f32 %v1091_v31, -100.0  ;;  %v1433_v9 = vmul.f32 %v793_v59, %v408_v24  ;;  %v1562_v38 = vsub.f32 1.0, %v409_v37  ;;  %3044 = vlog2.f32 %v283_v47  ;;  %v286_v24 = vld [vmem:[%s3668_s18 + $0x178] sm:$0xff] }
  0xe6   : > { %v2456_v5 = vmul.f32 %v3692_v7, %v2327_v2  ;;  %v1944_v11 = vsub.f32 0.0, %v1816_v42  ;;  %v794_v14 = vmax.f32 %v581_v3, -100.0  ;;  %v1093_v41 = vmul.f32 0.6931472, %v3039_v6  ;;  %v413_v6 = vld [vmem:[%s3676_s30 + $0x170] sm:$0xff] }
  0xe7   : > { %v3041_v12 = vpop.eup %3040  ;;  %v1689_v1 = vmul.f32 %v1561_v57, %v1305_v8  ;;  %v2202_v18 = vmul.f32 %v2074_v61, %v2074_v61  ;;  %3046 = vlog2.f32 %v924_v0  ;;  %v925_v23 = vsub.f32 1.0, %v3996_v60 }
  0xe8   : > { %2584 = vst [vmem:[%s3757_s24 + $0x138] sm:$0xff] %v2456_v5  ;;  %v2328_v50 = vmul.f32 %v2200_v54, %v1944_v11  ;;  %v1306_v27 = vmax.f32 %v1093_v41, -100.0  ;;  %v1434_v13 = vmul.f32 %v794_v14, %v409_v37  ;;  %v583_v28 = vmul.f32 0.6931472, %v3041_v12  ;;  %v4012_v37 = vld [vmem:[%s3668_s18 + $0x180] sm:$0xff] }
  0xe9   : > { %v3043_v10 = vpop.eup %3042  ;;  %v1817_v34 = vadd.f32 %v1689_v1, %v1433_v9  ;;  %v1563_v16 = vsub.f32 1.0, %v410_v19  ;;  %v2075_v35 = vsub.f32 %v3982_v63, %v410_v19  ;;  %3048 = vlog2.f32 %v3996_v60 }
  0xea   : > { %v2457_v39 = vmul.f32 %v3692_v7, %v2328_v50  ;;  %v1690_v33 = vmul.f32 %v1562_v38, %v1306_v27  ;;  %v795_v40 = vmax.f32 %v583_v28, -100.0  ;;  %v1095_v22 = vmul.f32 0.6931472, %v3043_v10 }
  0xeb   : > { %v3045_v36 = vpop.eup %3044  ;;  %v1945_v45 = vsub.f32 0.0, %v1817_v34  ;;  %v2076_v46 = vsub.f32 %v283_v47, %v411_v44  ;;  %3050 = vlog2.f32 %v925_v23  ;;  %v926_v15 = vsub.f32 1.0, %v285_v29  ;;  %v412_v47 = vld [vmem:[%s3676_s30 + $0x168] sm:$0xff] }
  0xec   : > { %2585 = vst [vmem:[%s3757_s24 + $0x140] sm:$0xff] %v2457_v39  ;;  %v1818_v26 = vadd.f32 %v1690_v33, %v1434_v13  ;;  %v1307_v48 = vmax.f32 %v1095_v22, -100.0  ;;  %v1435_v43 = vmul.f32 %v795_v40, %v410_v19  ;;  %v585_v63 = vmul.f32 0.6931472, %v3045_v36  ;;  %v288_v19 = vld [vmem:[%s3668_s18 + $0x188] sm:$0xff] }
  0xed   : > { %v3047_v51 = vpop.eup %3046  ;;  %v2329_v52 = vmul.f32 %v2201_v4, %v1945_v45  ;;  %v2203_v53 = vmul.f32 %v2075_v35, %v2075_v35  ;;  %v1564_v20 = vsub.f32 1.0, %v411_v44  ;;  %3052 = vlog2.f32 %v285_v29 }
  0xee   : > { %v1946_v49 = vsub.f32 0.0, %v1818_v26  ;;  %v1691_v21 = vmul.f32 %v1563_v16, %v1307_v48  ;;  %v796_v32 = vmax.f32 %v585_v63, -100.0  ;;  %v1097_v17 = vmul.f32 0.6931472, %v3047_v51 }
  0xef   : > { %v3049_v30 = vpop.eup %3048  ;;  %v2458_v55 = vmul.f32 %v3692_v7, %v2329_v52  ;;  %v2204_v54 = vmul.f32 %v2076_v46, %v2076_v46  ;;  %3054 = vlog2.f32 %v926_v15  ;;  %v927_v57 = vsub.f32 1.0, %v286_v24 }
  0xf0   : > { %v2330_v58 = vmul.f32 %v2202_v18, %v1946_v49  ;;  %v1819_v56 = vadd.f32 %v1691_v21, %v1435_v43  ;;  %v1308_v25 = vmax.f32 %v1097_v17, -100.0  ;;  %v1436_v59 = vmul.f32 %v796_v32, %v411_v44  ;;  %v4026_v44 = vld [vmem:[%s3668_s18 + $0x190] sm:$0xff] }
  0xf1   : > { %v3051_v62 = vpop.eup %3050  ;;  %2586 = vst [vmem:[%s3757_s24 + $0x148] sm:$0xff] %v2458_v55  ;;  %v587_v31 = vmul.f32 0.6931472, %v3049_v30  ;;  %v1565_v61 = vsub.f32 1.0, %v412_v47  ;;  %v2077_v0 = vsub.f32 %v3996_v60, %v412_v47  ;;  %3056 = vlog2.f32 %v286_v24 }
  0xf2   : > { %v2459_v2 = vmul.f32 %v3692_v7, %v2330_v58  ;;  %v1947_v42 = vsub.f32 0.0, %v1819_v56  ;;  %v1692_v4 = vmul.f32 %v1564_v20, %v1308_v25  ;;  %v1099_v3 = vmul.f32 0.6931472, %v3051_v62  ;;  %v416_v62 = vld [vmem:[%s3676_s30 + $0x188] sm:$0xff] }
  0xf3   : > { %v3053_v8 = vpop.eup %3052  ;;  %v797_v9 = vmax.f32 %v587_v31, -100.0  ;;  %v2078_v38 = vsub.f32 %v285_v29, %v413_v6  ;;  %3058 = vlog2.f32 %v927_v57  ;;  %v928_v5 = vsub.f32 1.0, %v4012_v37  ;;  %v414_v29 = vld [vmem:[%s3676_s30 + $0x178] sm:$0xff] }
  0xf4   : > { %2587 = vst [vmem:[%s3757_s24 + $0x150] sm:$0xff] %v2459_v2  ;;  %v2331_v11 = vmul.f32 %v2203_v53, %v1947_v42  ;;  %v1820_v14 = vadd.f32 %v1692_v4, %v1436_v59  ;;  %v1309_v41 = vmax.f32 %v1099_v3, -100.0  ;;  %v589_v60 = vmul.f32 0.6931472, %v3053_v8 }
  0xf5   : > { %v3055_v12 = vpop.eup %3054  ;;  %v1437_v1 = vmul.f32 %v797_v9, %v412_v47  ;;  %v2205_v18 = vmul.f32 %v2077_v0, %v2077_v0  ;;  %v1566_v23 = vsub.f32 1.0, %v413_v6  ;;  %3060 = vlog2.f32 %v4012_v37  ;;  %v290_v47 = vld [vmem:[%s3668_s18 + $0x198] sm:$0xff] }
  0xf6   : > { %v2460_v50 = vmul.f32 %v3692_v7, %v2331_v11  ;;  %v1948_v27 = vsub.f32 0.0, %v1820_v14  ;;  %v1693_v13 = vmul.f32 %v1565_v61, %v1309_v41  ;;  %v798_v28 = vmax.f32 %v589_v60, -100.0 }
  0xf7   : > { %v3057_v10 = vpop.eup %3056  ;;  %v1101_v34 = vmul.f32 0.6931472, %v3055_v12  ;;  %v2079_v16 = vsub.f32 %v286_v24, %v414_v29  ;;  %3062 = vlog2.f32 %v928_v5  ;;  %v929_v35 = vsub.f32 1.0, %v288_v19  ;;  %v415_v24 = vld [vmem:[%s3676_s30 + $0x180] sm:$0xff] }
  0xf8   : > { %2588 = vst [vmem:[%s3757_s24 + $0x158] sm:$0xff] %v2460_v50  ;;  %v2332_v39 = vmul.f32 %v2204_v54, %v1948_v27  ;;  %v1821_v33 = vadd.f32 %v1693_v13, %v1437_v1  ;;  %v2206_v40 = vmul.f32 %v2078_v38, %v2078_v38  ;;  %v591_v22 = vmul.f32 0.6931472, %v3057_v10 }
  0xf9   : > { %v3059_v36 = vpop.eup %3058  ;;  %v1310_v45 = vmax.f32 %v1101_v34, -100.0  ;;  %v1438_v46 = vmul.f32 %v798_v28, %v413_v6  ;;  %v1567_v15 = vsub.f32 1.0, %v414_v29  ;;  %3064 = vlog2.f32 %v288_v19  ;;  %v291_v6 = vld [vmem:[%s3668_s18 + $0x1a0] sm:$0xff] }
  0xfa   : > { %v2461_v26 = vmul.f32 %v3692_v7, %v2332_v39  ;;  %v1949_v48 = vsub.f32 0.0, %v1821_v33  ;;  %v799_v43 = vmax.f32 %v591_v22, -100.0  ;;  %v1103_v63 = vmul.f32 0.6931472, %v3059_v36  ;;  %v418_v36 = vld [vmem:[%s3676_s30 + $0x198] sm:$0xff] }
  0xfb   : > { %v3061_v51 = vpop.eup %3060  ;;  %v1694_v52 = vmul.f32 %v1566_v23, %v1310_v45  ;;  %v2207_v53 = vmul.f32 %v2079_v16, %v2079_v16  ;;  %3066 = vlog2.f32 %v929_v35  ;;  %v930_v20 = vsub.f32 1.0, %v4026_v44 }
  0xfc   : > { %2589 = vst [vmem:[%s3757_s24 + $0x160] sm:$0xff] %v2461_v26  ;;  %v2333_v49 = vmul.f32 %v2205_v18, %v1949_v48  ;;  %v1311_v21 = vmax.f32 %v1103_v63, -100.0  ;;  %v1439_v32 = vmul.f32 %v799_v43, %v414_v29  ;;  %v593_v17 = vmul.f32 0.6931472, %v3061_v51  ;;  %v4042_v29 = vld [vmem:[%s3668_s18 + $0x1a8] sm:$0xff] }
  0xfd   : > { %v3063_v30 = vpop.eup %3062  ;;  %v1822_v55 = vadd.f32 %v1694_v52, %v1438_v46  ;;  %v1568_v54 = vsub.f32 1.0, %v415_v24  ;;  %v2080_v57 = vsub.f32 %v4012_v37, %v415_v24  ;;  %3068 = vlog2.f32 %v4026_v44 }
  0xfe   : > { %v2462_v58 = vmul.f32 %v3692_v7, %v2333_v49  ;;  %v1695_v56 = vmul.f32 %v1567_v15, %v1311_v21  ;;  %v800_v25 = vmax.f32 %v593_v17, -100.0  ;;  %v1105_v59 = vmul.f32 0.6931472, %v3063_v30 }
  0xff   : > { %v3065_v31 = vpop.eup %3064  ;;  %v1950_v61 = vsub.f32 0.0, %v1822_v55  ;;  %v2081_v0 = vsub.f32 %v288_v19, %v416_v62  ;;  %3070 = vlog2.f32 %v930_v20  ;;  %v931_v2 = vsub.f32 1.0, %v290_v47  ;;  %v417_v19 = vld [vmem:[%s3676_s30 + $0x190] sm:$0xff] }
 0x100   : > { %2590 = vst [vmem:[%s3757_s24 + $0x168] sm:$0xff] %v2462_v58  ;;  %v1823_v42 = vadd.f32 %v1695_v56, %v1439_v32  ;;  %v1312_v4 = vmax.f32 %v1105_v59, -100.0  ;;  %v1440_v3 = vmul.f32 %v800_v25, %v415_v24  ;;  %v595_v37 = vmul.f32 0.6931472, %v3065_v31  ;;  %v293_v24 = vld [vmem:[%s3668_s18 + $0x1b0] sm:$0xff] }
 0x101   : > { %v3067_v8 = vpop.eup %3066  ;;  %v2334_v9 = vmul.f32 %v2206_v40, %v1950_v61  ;;  %v2208_v38 = vmul.f32 %v2080_v57, %v2080_v57  ;;  %v1569_v5 = vsub.f32 1.0, %v416_v62  ;;  %3072 = vlog2.f32 %v290_v47 }
 0x102   : > { %v1951_v11 = vsub.f32 0.0, %v1823_v42  ;;  %v1696_v14 = vmul.f32 %v1568_v54, %v1312_v4  ;;  %v801_v41 = vmax.f32 %v595_v37, -100.0  ;;  %v1107_v60 = vmul.f32 0.6931472, %v3067_v8 }
 0x103   : > { %v3069_v12 = vpop.eup %3068  ;;  %v2463_v1 = vmul.f32 %v3692_v7, %v2334_v9  ;;  %v2209_v18 = vmul.f32 %v2081_v0, %v2081_v0  ;;  %3074 = vlog2.f32 %v931_v2  ;;  %v932_v23 = vsub.f32 1.0, %v291_v6 }
 0x104   : > { %v2335_v50 = vmul.f32 %v2207_v53, %v1951_v11  ;;  %v1824_v27 = vadd.f32 %v1696_v14, %v1440_v3  ;;  %v1313_v13 = vmax.f32 %v1107_v60, -100.0  ;;  %v1441_v28 = vmul.f32 %v801_v41, %v416_v62  ;;  %v4056_v62 = vld [vmem:[%s3668_s18 + $0x1b8] sm:$0xff] }
 0x105   : > { %v3071_v10 = vpop.eup %3070  ;;  %2591 = vst [vmem:[%s3757_s24 + $0x170] sm:$0xff] %v2463_v1  ;;  %v597_v34 = vmul.f32 0.6931472, %v3069_v12  ;;  %v1570_v16 = vsub.f32 1.0, %v417_v19  ;;  %v2082_v35 = vsub.f32 %v4026_v44, %v417_v19  ;;  %3076 = vlog2.f32 %v291_v6 }
 0x106   : > { %v2464_v39 = vmul.f32 %v3692_v7, %v2335_v50  ;;  %v1952_v33 = vsub.f32 0.0, %v1824_v27  ;;  %v1697_v40 = vmul.f32 %v1569_v5, %v1313_v13  ;;  %v1109_v22 = vmul.f32 0.6931472, %v3071_v10  ;;  %v421_v10 = vld [vmem:[%s3676_s30 + $0x1b0] sm:$0xff] }
 0x107   : > { %v3073_v45 = vpop.eup %3072  ;;  %v802_v46 = vmax.f32 %v597_v34, -100.0  ;;  %v2083_v15 = vsub.f32 %v290_v47, %v418_v36  ;;  %3078 = vlog2.f32 %v932_v23  ;;  %v933_v26 = vsub.f32 1.0, %v4042_v29  ;;  %v419_v47 = vld [vmem:[%s3676_s30 + $0x1a0] sm:$0xff] }
 0x108   : > { %2592 = vst [vmem:[%s3757_s24 + $0x178] sm:$0xff] %v2464_v39  ;;  %v2336_v48 = vmul.f32 %v2208_v38, %v1952_v33  ;;  %v1825_v43 = vadd.f32 %v1697_v40, %v1441_v28  ;;  %v1314_v63 = vmax.f32 %v1109_v22, -100.0  ;;  %v599_v44 = vmul.f32 0.6931472, %v3073_v45 }
 0x109   : > { %v3075_v51 = vpop.eup %3074  ;;  %v1442_v52 = vmul.f32 %v802_v46, %v417_v19  ;;  %v2210_v53 = vmul.f32 %v2082_v35, %v2082_v35  ;;  %v1571_v20 = vsub.f32 1.0, %v418_v36  ;;  %3080 = vlog2.f32 %v4042_v29  ;;  %v295_v19 = vld [vmem:[%s3668_s18 + $0x1c0] sm:$0xff] }
 0x10a   : > { %v2465_v49 = vmul.f32 %v3692_v7, %v2336_v48  ;;  %v1953_v21 = vsub.f32 0.0, %v1825_v43  ;;  %v1698_v32 = vmul.f32 %v1570_v16, %v1314_v63  ;;  %v803_v17 = vmax.f32 %v599_v44, -100.0 }
 0x10b   : > { %v3077_v30 = vpop.eup %3076  ;;  %v1111_v55 = vmul.f32 0.6931472, %v3075_v51  ;;  %v2084_v54 = vsub.f32 %v291_v6, %v419_v47  ;;  %3082 = vlog2.f32 %v933_v26  ;;  %v934_v57 = vsub.f32 1.0, %v293_v24  ;;  %v420_v6 = vld [vmem:[%s3676_s30 + $0x1a8] sm:$0xff] }
 0x10c   : > { %2593 = vst [vmem:[%s3757_s24 + $0x180] sm:$0xff] %v2465_v49  ;;  %v2337_v58 = vmul.f32 %v2209_v18, %v1953_v21  ;;  %v1826_v56 = vadd.f32 %v1698_v32, %v1442_v52  ;;  %v2211_v25 = vmul.f32 %v2083_v15, %v2083_v15  ;;  %v601_v59 = vmul.f32 0.6931472, %v3077_v30 }
 0x10d   : > { %v3079_v31 = vpop.eup %3078  ;;  %v1315_v61 = vmax.f32 %v1111_v55, -100.0  ;;  %v1443_v0 = vmul.f32 %v803_v17, %v418_v36  ;;  %v1572_v2 = vsub.f32 1.0, %v419_v47  ;;  %3084 = vlog2.f32 %v293_v24  ;;  %v296_v36 = vld [vmem:[%s3668_s18 + $0x1c8] sm:$0xff] }
 0x10e   : > { %v2466_v42 = vmul.f32 %v3692_v7, %v2337_v58  ;;  %v1954_v4 = vsub.f32 0.0, %v1826_v56  ;;  %v804_v3 = vmax.f32 %v601_v59, -100.0  ;;  %v1113_v37 = vmul.f32 0.6931472, %v3079_v31  ;;  %v423_v31 = vld [vmem:[%s3676_s30 + $0x1c0] sm:$0xff] }
 0x10f   : > { %v3081_v8 = vpop.eup %3080  ;;  %v1699_v9 = vmul.f32 %v1571_v20, %v1315_v61  ;;  %v2212_v38 = vmul.f32 %v2084_v54, %v2084_v54  ;;  %3086 = vlog2.f32 %v934_v57  ;;  %v935_v5 = vsub.f32 1.0, %v4056_v62 }
 0x110   : > { %2594 = vst [vmem:[%s3757_s24 + $0x188] sm:$0xff] %v2466_v42  ;;  %v2338_v11 = vmul.f32 %v2210_v53, %v1954_v4  ;;  %v1316_v14 = vmax.f32 %v1113_v37, -100.0  ;;  %v1444_v41 = vmul.f32 %v804_v3, %v419_v47  ;;  %v603_v60 = vmul.f32 0.6931472, %v3081_v8  ;;  %v4072_v47 = vld [vmem:[%s3668_s18 + $0x1d0] sm:$0xff] }
 0x111   : > { %v3083_v12 = vpop.eup %3082  ;;  %v1827_v1 = vadd.f32 %v1699_v9, %v1443_v0  ;;  %v1573_v18 = vsub.f32 1.0, %v420_v6  ;;  %v2085_v23 = vsub.f32 %v4042_v29, %v420_v6  ;;  %3088 = vlog2.f32 %v4056_v62 }
 0x112   : > { %v2467_v50 = vmul.f32 %v3692_v7, %v2338_v11  ;;  %v1700_v27 = vmul.f32 %v1572_v2, %v1316_v14  ;;  %v805_v13 = vmax.f32 %v603_v60, -100.0  ;;  %v1115_v28 = vmul.f32 0.6931472, %v3083_v12 }
 0x113   : > { %v3085_v34 = vpop.eup %3084  ;;  %v1955_v16 = vsub.f32 0.0, %v1827_v1  ;;  %v2086_v35 = vsub.f32 %v293_v24, %v421_v10  ;;  %3090 = vlog2.f32 %v935_v5  ;;  %v936_v39 = vsub.f32 1.0, %v295_v19  ;;  %v422_v24 = vld [vmem:[%s3676_s30 + $0x1b8] sm:$0xff] }
 0x114   : > { %2595 = vst [vmem:[%s3757_s24 + $0x190] sm:$0xff] %v2467_v50  ;;  %v1828_v33 = vadd.f32 %v1700_v27, %v1444_v41  ;;  %v1317_v40 = vmax.f32 %v1115_v28, -100.0  ;;  %v1445_v22 = vmul.f32 %v805_v13, %v420_v6  ;;  %v605_v29 = vmul.f32 0.6931472, %v3085_v34  ;;  %v298_v6 = vld [vmem:[%s3668_s18 + $0x1d8] sm:$0xff] }
 0x115   : > { %v3087_v45 = vpop.eup %3086  ;;  %v2339_v46 = vmul.f32 %v2211_v25, %v1955_v16  ;;  %v2213_v15 = vmul.f32 %v2085_v23, %v2085_v23  ;;  %v1574_v26 = vsub.f32 1.0, %v421_v10  ;;  %3092 = vlog2.f32 %v295_v19 }
 0x116   : > { %v1956_v48 = vsub.f32 0.0, %v1828_v33  ;;  %v1701_v43 = vmul.f32 %v1573_v18, %v1317_v40  ;;  %v806_v63 = vmax.f32 %v605_v29, -100.0  ;;  %v1117_v44 = vmul.f32 0.6931472, %v3087_v45 }
 0x117   : > { %v3089_v51 = vpop.eup %3088  ;;  %v2468_v52 = vmul.f32 %v3692_v7, %v2339_v46  ;;  %v2214_v53 = vmul.f32 %v2086_v35, %v2086_v35  ;;  %3094 = vlog2.f32 %v936_v39  ;;  %v937_v20 = vsub.f32 1.0, %v296_v36 }
 0x118   : > { %v2340_v49 = vmul.f32 %v2212_v38, %v1956_v48  ;;  %v1829_v21 = vadd.f32 %v1701_v43, %v1445_v22  ;;  %v1318_v32 = vmax.f32 %v1117_v44, -100.0  ;;  %v1446_v17 = vmul.f32 %v806_v63, %v421_v10  ;;  %v4086_v10 = vld [vmem:[%s3668_s18 + $0x1e0] sm:$0xff] }
 0x119   : > { %v3091_v30 = vpop.eup %3090  ;;  %2596 = vst [vmem:[%s3757_s24 + $0x198] sm:$0xff] %v2468_v52  ;;  %v607_v55 = vmul.f32 0.6931472, %v3089_v51  ;;  %v1575_v54 = vsub.f32 1.0, %v422_v24  ;;  %v2087_v57 = vsub.f32 %v4056_v62, %v422_v24  ;;  %3096 = vlog2.f32 %v296_v36 }
 0x11a   : > { %v2469_v58 = vmul.f32 %v3692_v7, %v2340_v49  ;;  %v1957_v56 = vsub.f32 0.0, %v1829_v21  ;;  %v1702_v25 = vmul.f32 %v1574_v26, %v1318_v32  ;;  %v1119_v59 = vmul.f32 0.6931472, %v3091_v30  ;;  %v426_v30 = vld [vmem:[%s3676_s30 + $0x1d8] sm:$0xff] }
 0x11b   : > { %v3093_v61 = vpop.eup %3092  ;;  %v807_v0 = vmax.f32 %v607_v55, -100.0  ;;  %v2088_v2 = vsub.f32 %v295_v19, %v423_v31  ;;  %3098 = vlog2.f32 %v937_v20  ;;  %v938_v42 = vsub.f32 1.0, %v4072_v47  ;;  %v424_v19 = vld [vmem:[%s3676_s30 + $0x1c8] sm:$0xff] }
 0x11c   : > { %2597 = vst [vmem:[%s3757_s24 + $0x1a0] sm:$0xff] %v2469_v58  ;;  %v2341_v4 = vmul.f32 %v2213_v15, %v1957_v56  ;;  %v1830_v3 = vadd.f32 %v1702_v25, %v1446_v17  ;;  %v1319_v37 = vmax.f32 %v1119_v59, -100.0  ;;  %v609_v62 = vmul.f32 0.6931472, %v3093_v61 }
 0x11d   : > { %v3095_v8 = vpop.eup %3094  ;;  %v1447_v9 = vmul.f32 %v807_v0, %v422_v24  ;;  %v2215_v38 = vmul.f32 %v2087_v57, %v2087_v57  ;;  %v1576_v5 = vsub.f32 1.0, %v423_v31  ;;  %3100 = vlog2.f32 %v4072_v47  ;;  %v300_v24 = vld [vmem:[%s3668_s18 + $0x1e8] sm:$0xff] }
 0x11e   : > { %v2470_v11 = vmul.f32 %v3692_v7, %v2341_v4  ;;  %v1958_v14 = vsub.f32 0.0, %v1830_v3  ;;  %v1703_v41 = vmul.f32 %v1575_v54, %v1319_v37  ;;  %v808_v60 = vmax.f32 %v609_v62, -100.0 }
 0x11f   : > { %v3097_v12 = vpop.eup %3096  ;;  %v1121_v1 = vmul.f32 0.6931472, %v3095_v8  ;;  %v2089_v18 = vsub.f32 %v296_v36, %v424_v19  ;;  %3102 = vlog2.f32 %v938_v42  ;;  %v939_v23 = vsub.f32 1.0, %v298_v6  ;;  %v425_v36 = vld [vmem:[%s3676_s30 + $0x1d0] sm:$0xff] }
 0x120   : > { %2598 = vst [vmem:[%s3757_s24 + $0x1a8] sm:$0xff] %v2470_v11  ;;  %v2342_v50 = vmul.f32 %v2214_v53, %v1958_v14  ;;  %v1831_v27 = vadd.f32 %v1703_v41, %v1447_v9  ;;  %v2216_v13 = vmul.f32 %v2088_v2, %v2088_v2  ;;  %v611_v28 = vmul.f32 0.6931472, %v3097_v12 }
 0x121   : > { %v3099_v34 = vpop.eup %3098  ;;  %v1320_v16 = vmax.f32 %v1121_v1, -100.0  ;;  %v1448_v35 = vmul.f32 %v808_v60, %v423_v31  ;;  %v1577_v39 = vsub.f32 1.0, %v424_v19  ;;  %3104 = vlog2.f32 %v298_v6  ;;  %v301_v31 = vld [vmem:[%s3668_s18 + $0x1f0] sm:$0xff] }
 0x122   : > { %v2471_v33 = vmul.f32 %v3692_v7, %v2342_v50  ;;  %v1959_v40 = vsub.f32 0.0, %v1831_v27  ;;  %v809_v22 = vmax.f32 %v611_v28, -100.0  ;;  %v1123_v29 = vmul.f32 0.6931472, %v3099_v34  ;;  %v428_v34 = vld [vmem:[%s3676_s30 + $0x1e8] sm:$0xff] }
 0x123   : > { %v3101_v45 = vpop.eup %3100  ;;  %v1704_v46 = vmul.f32 %v1576_v5, %v1320_v16  ;;  %v2217_v15 = vmul.f32 %v2089_v18, %v2089_v18  ;;  %3106 = vlog2.f32 %v939_v23  ;;  %v940_v26 = vsub.f32 1.0, %v4086_v10 }
 0x124   : > { %2599 = vst [vmem:[%s3757_s24 + $0x1b0] sm:$0xff] %v2471_v33  ;;  %v2343_v48 = vmul.f32 %v2215_v38, %v1959_v40  ;;  %v1321_v43 = vmax.f32 %v1123_v29, -100.0  ;;  %v1449_v63 = vmul.f32 %v809_v22, %v424_v19  ;;  %v613_v44 = vmul.f32 0.6931472, %v3101_v45  ;;  %v4102_v19 = vld [vmem:[%s3668_s18 + $0x1f8] sm:$0xff] }
 0x125   : > { %v3103_v51 = vpop.eup %3102  ;;  %v1832_v52 = vadd.f32 %v1704_v46, %v1448_v35  ;;  %v1578_v53 = vsub.f32 1.0, %v425_v36  ;;  %v2090_v20 = vsub.f32 %v4072_v47, %v425_v36  ;;  %3108 = vlog2.f32 %v4086_v10 }
 0x126   : > { %v2472_v49 = vmul.f32 %v3692_v7, %v2343_v48  ;;  %v1705_v21 = vmul.f32 %v1577_v39, %v1321_v43  ;;  %v810_v32 = vmax.f32 %v613_v44, -100.0  ;;  %v1125_v17 = vmul.f32 0.6931472, %v3103_v51 }
 0x127   : > { %v3105_v55 = vpop.eup %3104  ;;  %v1960_v54 = vsub.f32 0.0, %v1832_v52  ;;  %v2091_v57 = vsub.f32 %v298_v6, %v426_v30  ;;  %3110 = vlog2.f32 %v940_v26  ;;  %v941_v58 = vsub.f32 1.0, %v300_v24  ;;  %v427_v6 = vld [vmem:[%s3676_s30 + $0x1e0] sm:$0xff] }
 0x128   : > { %2600 = vst [vmem:[%s3757_s24 + $0x1b8] sm:$0xff] %v2472_v49  ;;  %v1833_v56 = vadd.f32 %v1705_v21, %v1449_v63  ;;  %v1322_v25 = vmax.f32 %v1125_v17, -100.0  ;;  %v1450_v59 = vmul.f32 %v810_v32, %v425_v36  ;;  %v615_v47 = vmul.f32 0.6931472, %v3105_v55  ;;  %v303_v36 = vld [vmem:[%s3668_s18 + $0x200] sm:$0xff] }
 0x129   : > { %v3107_v61 = vpop.eup %3106  ;;  %v2344_v0 = vmul.f32 %v2216_v13, %v1960_v54  ;;  %v2218_v2 = vmul.f32 %v2090_v20, %v2090_v20  ;;  %v1579_v42 = vsub.f32 1.0, %v426_v30  ;;  %3112 = vlog2.f32 %v300_v24 }
 0x12a   : > { %v1961_v4 = vsub.f32 0.0, %v1833_v56  ;;  %v1706_v3 = vmul.f32 %v1578_v53, %v1322_v25  ;;  %v811_v37 = vmax.f32 %v615_v47, -100.0  ;;  %v1127_v62 = vmul.f32 0.6931472, %v3107_v61 }
 0x12b   : > { %v3109_v8 = vpop.eup %3108  ;;  %v2473_v9 = vmul.f32 %v3692_v7, %v2344_v0  ;;  %v2219_v38 = vmul.f32 %v2091_v57, %v2091_v57  ;;  %3114 = vlog2.f32 %v941_v58  ;;  %v942_v5 = vsub.f32 1.0, %v301_v31 }
 0x12c   : > { %v2345_v11 = vmul.f32 %v2217_v15, %v1961_v4  ;;  %v1834_v14 = vadd.f32 %v1706_v3, %v1450_v59  ;;  %v1323_v41 = vmax.f32 %v1127_v62, -100.0  ;;  %v1451_v60 = vmul.f32 %v811_v37, %v426_v30  ;;  %v4116_v30 = vld [vmem:[%s3668_s18 + $0x208] sm:$0xff] }
 0x12d   : > { %v3111_v12 = vpop.eup %3110  ;;  %2601 = vst [vmem:[%s3757_s24 + $0x1c0] sm:$0xff] %v2473_v9  ;;  %v617_v1 = vmul.f32 0.6931472, %v3109_v8  ;;  %v1580_v18 = vsub.f32 1.0, %v427_v6  ;;  %v2092_v23 = vsub.f32 %v4086_v10, %v427_v6  ;;  %3116 = vlog2.f32 %v301_v31 }
 0x12e   : > { %v2474_v50 = vmul.f32 %v3692_v7, %v2345_v11  ;;  %v1962_v27 = vsub.f32 0.0, %v1834_v14  ;;  %v1707_v13 = vmul.f32 %v1579_v42, %v1323_v41  ;;  %v1129_v28 = vmul.f32 0.6931472, %v3111_v12  ;;  %v431_v12 = vld [vmem:[%s3676_s30 + $0x200] sm:$0xff] }
 0x12f   : > { %v3113_v16 = vpop.eup %3112  ;;  %v812_v35 = vmax.f32 %v617_v1, -100.0  ;;  %v2093_v39 = vsub.f32 %v300_v24, %v428_v34  ;;  %3118 = vlog2.f32 %v942_v5  ;;  %v943_v33 = vsub.f32 1.0, %v4102_v19  ;;  %v429_v24 = vld [vmem:[%s3676_s30 + $0x1f0] sm:$0xff] }
 0x130   : > { %2602 = vst [vmem:[%s3757_s24 + $0x1c8] sm:$0xff] %v2474_v50  ;;  %v2346_v40 = vmul.f32 %v2218_v2, %v1962_v27  ;;  %v1835_v22 = vadd.f32 %v1707_v13, %v1451_v60  ;;  %v1324_v29 = vmax.f32 %v1129_v28, -100.0  ;;  %v619_v10 = vmul.f32 0.6931472, %v3113_v16 }
 0x131   : > { %v3115_v45 = vpop.eup %3114  ;;  %v1452_v46 = vmul.f32 %v812_v35, %v427_v6  ;;  %v2220_v15 = vmul.f32 %v2092_v23, %v2092_v23  ;;  %v1581_v26 = vsub.f32 1.0, %v428_v34  ;;  %3120 = vlog2.f32 %v4102_v19  ;;  %v305_v6 = vld [vmem:[%s3668_s18 + $0x210] sm:$0xff] }
 0x132   : > { %v2475_v48 = vmul.f32 %v3692_v7, %v2346_v40  ;;  %v1963_v43 = vsub.f32 0.0, %v1835_v22  ;;  %v1708_v63 = vmul.f32 %v1580_v18, %v1324_v29  ;;  %v813_v44 = vmax.f32 %v619_v10, -100.0 }
 0x133   : > { %v3117_v51 = vpop.eup %3116  ;;  %v1131_v52 = vmul.f32 0.6931472, %v3115_v45  ;;  %v2094_v53 = vsub.f32 %v301_v31, %v429_v24  ;;  %3122 = vlog2.f32 %v943_v33  ;;  %v944_v20 = vsub.f32 1.0, %v303_v36  ;;  %v430_v31 = vld [vmem:[%s3676_s30 + $0x1f8] sm:$0xff] }
 0x134   : > { %2603 = vst [vmem:[%s3757_s24 + $0x1d0] sm:$0xff] %v2475_v48  ;;  %v2347_v49 = vmul.f32 %v2219_v38, %v1963_v43  ;;  %v1836_v21 = vadd.f32 %v1708_v63, %v1452_v46  ;;  %v2221_v32 = vmul.f32 %v2093_v39, %v2093_v39  ;;  %v621_v17 = vmul.f32 0.6931472, %v3117_v51 }
 0x135   : > { %v3119_v55 = vpop.eup %3118  ;;  %v1325_v54 = vmax.f32 %v1131_v52, -100.0  ;;  %v1453_v57 = vmul.f32 %v813_v44, %v428_v34  ;;  %v1582_v58 = vsub.f32 1.0, %v429_v24  ;;  %3124 = vlog2.f32 %v303_v36  ;;  %v306_v34 = vld [vmem:[%s3668_s18 + $0x218] sm:$0xff] }
 0x136   : > { %v2476_v56 = vmul.f32 %v3692_v7, %v2347_v49  ;;  %v1964_v25 = vsub.f32 0.0, %v1836_v21  ;;  %v814_v59 = vmax.f32 %v621_v17, -100.0  ;;  %v1133_v47 = vmul.f32 0.6931472, %v3119_v55  ;;  %v433_v55 = vld [vmem:[%s3676_s30 + $0x210] sm:$0xff] }
 0x137   : > { %v3121_v61 = vpop.eup %3120  ;;  %v1709_v0 = vmul.f32 %v1581_v26, %v1325_v54  ;;  %v2222_v2 = vmul.f32 %v2094_v53, %v2094_v53  ;;  %3126 = vlog2.f32 %v944_v20  ;;  %v945_v42 = vsub.f32 1.0, %v4116_v30 }
 0x138   : > { %2604 = vst [vmem:[%s3757_s24 + $0x1d8] sm:$0xff] %v2476_v56  ;;  %v2348_v4 = vmul.f32 %v2220_v15, %v1964_v25  ;;  %v1326_v3 = vmax.f32 %v1133_v47, -100.0  ;;  %v1454_v37 = vmul.f32 %v814_v59, %v429_v24  ;;  %v623_v62 = vmul.f32 0.6931472, %v3121_v61  ;;  %v4132_v24 = vld [vmem:[%s3668_s18 + $0x220] sm:$0xff] }
 0x139   : > { %v3123_v8 = vpop.eup %3122  ;;  %v1837_v9 = vadd.f32 %v1709_v0, %v1453_v57  ;;  %v1583_v38 = vsub.f32 1.0, %v430_v31  ;;  %v2095_v5 = vsub.f32 %v4102_v19, %v430_v31  ;;  %3128 = vlog2.f32 %v4116_v30 }
 0x13a   : > { %v2477_v11 = vmul.f32 %v3692_v7, %v2348_v4  ;;  %v1710_v14 = vmul.f32 %v1582_v58, %v1326_v3  ;;  %v815_v41 = vmax.f32 %v623_v62, -100.0  ;;  %v1135_v60 = vmul.f32 0.6931472, %v3123_v8 }
 0x13b   : > { %v3125_v1 = vpop.eup %3124  ;;  %v1965_v18 = vsub.f32 0.0, %v1837_v9  ;;  %v2096_v23 = vsub.f32 %v303_v36, %v431_v12  ;;  %3130 = vlog2.f32 %v945_v42  ;;  %v946_v50 = vsub.f32 1.0, %v305_v6  ;;  %v432_v36 = vld [vmem:[%s3676_s30 + $0x208] sm:$0xff] }
 0x13c   : > { %2605 = vst [vmem:[%s3757_s24 + $0x1e0] sm:$0xff] %v2477_v11  ;;  %v1838_v27 = vadd.f32 %v1710_v14, %v1454_v37  ;;  %v1327_v13 = vmax.f32 %v1135_v60, -100.0  ;;  %v1455_v28 = vmul.f32 %v815_v41, %v430_v31  ;;  %v625_v19 = vmul.f32 0.6931472, %v3125_v1  ;;  %v308_v31 = vld [vmem:[%s3668_s18 + $0x228] sm:$0xff] }
 0x13d   : > { %v3127_v16 = vpop.eup %3126  ;;  %v2349_v35 = vmul.f32 %v2221_v32, %v1965_v18  ;;  %v2223_v39 = vmul.f32 %v2095_v5, %v2095_v5  ;;  %v1584_v33 = vsub.f32 1.0, %v431_v12  ;;  %3132 = vlog2.f32 %v305_v6 }
 0x13e   : > { %v1966_v40 = vsub.f32 0.0, %v1838_v27  ;;  %v1711_v22 = vmul.f32 %v1583_v38, %v1327_v13  ;;  %v816_v29 = vmax.f32 %v625_v19, -100.0  ;;  %v1137_v10 = vmul.f32 0.6931472, %v3127_v16 }
 0x13f   : > { %v3129_v45 = vpop.eup %3128  ;;  %v2478_v46 = vmul.f32 %v3692_v7, %v2349_v35  ;;  %v2224_v15 = vmul.f32 %v2096_v23, %v2096_v23  ;;  %3134 = vlog2.f32 %v946_v50  ;;  %v947_v26 = vsub.f32 1.0, %v306_v34 }
 0x140   : > { %v2350_v48 = vmul.f32 %v2222_v2, %v1966_v40  ;;  %v1839_v43 = vadd.f32 %v1711_v22, %v1455_v28  ;;  %v1328_v63 = vmax.f32 %v1137_v10, -100.0  ;;  %v1456_v44 = vmul.f32 %v816_v29, %v431_v12  ;;  %v4146_v12 = vld [vmem:[%s3668_s18 + $0x230] sm:$0xff] }
 0x141   : > { %v3131_v51 = vpop.eup %3130  ;;  %2606 = vst [vmem:[%s3757_s24 + $0x1e8] sm:$0xff] %v2478_v46  ;;  %v627_v52 = vmul.f32 0.6931472, %v3129_v45  ;;  %v1585_v53 = vsub.f32 1.0, %v432_v36  ;;  %v2097_v20 = vsub.f32 %v4116_v30, %v432_v36  ;;  %3136 = vlog2.f32 %v306_v34 }
 0x142   : > { %v2479_v49 = vmul.f32 %v3692_v7, %v2350_v48  ;;  %v1967_v21 = vsub.f32 0.0, %v1839_v43  ;;  %v1712_v32 = vmul.f32 %v1584_v33, %v1328_v63  ;;  %v1139_v17 = vmul.f32 0.6931472, %v3131_v51  ;;  %v436_v51 = vld [vmem:[%s3676_s30 + $0x228] sm:$0xff] }
 0x143   : > { %v3133_v54 = vpop.eup %3132  ;;  %v817_v57 = vmax.f32 %v627_v52, -100.0  ;;  %v2098_v58 = vsub.f32 %v305_v6, %v433_v55  ;;  %3138 = vlog2.f32 %v947_v26  ;;  %v948_v56 = vsub.f32 1.0, %v4132_v24  ;;  %v434_v6 = vld [vmem:[%s3676_s30 + $0x218] sm:$0xff] }
 0x144   : > { %2607 = vst [vmem:[%s3757_s24 + $0x1f0] sm:$0xff] %v2479_v49  ;;  %v2351_v25 = vmul.f32 %v2223_v39, %v1967_v21  ;;  %v1840_v59 = vadd.f32 %v1712_v32, %v1456_v44  ;;  %v1329_v47 = vmax.f32 %v1139_v17, -100.0  ;;  %v629_v30 = vmul.f32 0.6931472, %v3133_v54 }
 0x145   : > { %v3135_v61 = vpop.eup %3134  ;;  %v1457_v0 = vmul.f32 %v817_v57, %v432_v36  ;;  %v2225_v2 = vmul.f32 %v2097_v20, %v2097_v20  ;;  %v1586_v42 = vsub.f32 1.0, %v433_v55  ;;  %3140 = vlog2.f32 %v4132_v24  ;;  %v310_v36 = vld [vmem:[%s3668_s18 + $0x238] sm:$0xff] }
 0x146   : > { %v2480_v4 = vmul.f32 %v3692_v7, %v2351_v25  ;;  %v1968_v3 = vsub.f32 0.0, %v1840_v59  ;;  %v1713_v37 = vmul.f32 %v1585_v53, %v1329_v47  ;;  %v818_v62 = vmax.f32 %v629_v30, -100.0 }
 0x147   : > { %v3137_v8 = vpop.eup %3136  ;;  %v1141_v9 = vmul.f32 0.6931472, %v3135_v61  ;;  %v2099_v38 = vsub.f32 %v306_v34, %v434_v6  ;;  %3142 = vlog2.f32 %v948_v56  ;;  %v949_v5 = vsub.f32 1.0, %v308_v31  ;;  %v435_v34 = vld [vmem:[%s3676_s30 + $0x220] sm:$0xff] }
 0x148   : > { %2608 = vst [vmem:[%s3757_s24 + $0x1f8] sm:$0xff] %v2480_v4  ;;  %v2352_v11 = vmul.f32 %v2224_v15, %v1968_v3  ;;  %v1841_v14 = vadd.f32 %v1713_v37, %v1457_v0  ;;  %v2226_v41 = vmul.f32 %v2098_v58, %v2098_v58  ;;  %v631_v60 = vmul.f32 0.6931472, %v3137_v8 }
 0x149   : > { %v3139_v1 = vpop.eup %3138  ;;  %v1330_v18 = vmax.f32 %v1141_v9, -100.0  ;;  %v1458_v23 = vmul.f32 %v818_v62, %v433_v55  ;;  %v1587_v50 = vsub.f32 1.0, %v434_v6  ;;  %3144 = vlog2.f32 %v308_v31  ;;  %v311_v55 = vld [vmem:[%s3668_s18 + $0x240] sm:$0xff] }
 0x14a   : > { %v2481_v27 = vmul.f32 %v3692_v7, %v2352_v11  ;;  %v1969_v13 = vsub.f32 0.0, %v1841_v14  ;;  %v819_v28 = vmax.f32 %v631_v60, -100.0  ;;  %v1143_v19 = vmul.f32 0.6931472, %v3139_v1  ;;  %v438_v1 = vld [vmem:[%s3676_s30 + $0x238] sm:$0xff] }
 0x14b   : > { %v3141_v16 = vpop.eup %3140  ;;  %v1714_v35 = vmul.f32 %v1586_v42, %v1330_v18  ;;  %v2227_v39 = vmul.f32 %v2099_v38, %v2099_v38  ;;  %3146 = vlog2.f32 %v949_v5  ;;  %v950_v33 = vsub.f32 1.0, %v4146_v12 }
 0x14c   : > { %2609 = vst [vmem:[%s3757_s24 + $0x200] sm:$0xff] %v2481_v27  ;;  %v2353_v40 = vmul.f32 %v2225_v2, %v1969_v13  ;;  %v1331_v22 = vmax.f32 %v1143_v19, -100.0  ;;  %v1459_v29 = vmul.f32 %v819_v28, %v434_v6  ;;  %v633_v10 = vmul.f32 0.6931472, %v3141_v16  ;;  %v4162_v6 = vld [vmem:[%s3668_s18 + $0x248] sm:$0xff] }
 0x14d   : > { %v3143_v45 = vpop.eup %3142  ;;  %v1842_v46 = vadd.f32 %v1714_v35, %v1458_v23  ;;  %v1588_v15 = vsub.f32 1.0, %v435_v34  ;;  %v2100_v26 = vsub.f32 %v4132_v24, %v435_v34  ;;  %3148 = vlog2.f32 %v4146_v12 }
 0x14e   : > { %v2482_v48 = vmul.f32 %v3692_v7, %v2353_v40  ;;  %v1715_v43 = vmul.f32 %v1587_v50, %v1331_v22  ;;  %v820_v63 = vmax.f32 %v633_v10, -100.0  ;;  %v1145_v44 = vmul.f32 0.6931472, %v3143_v45 }
 0x14f   : > { %v3145_v52 = vpop.eup %3144  ;;  %v1970_v53 = vsub.f32 0.0, %v1842_v46  ;;  %v2101_v20 = vsub.f32 %v308_v31, %v436_v51  ;;  %3150 = vlog2.f32 %v950_v33  ;;  %v951_v49 = vsub.f32 1.0, %v310_v36  ;;  %v437_v31 = vld [vmem:[%s3676_s30 + $0x230] sm:$0xff] }
 0x150   : > { %2610 = vst [vmem:[%s3757_s24 + $0x208] sm:$0xff] %v2482_v48  ;;  %v1843_v21 = vadd.f32 %v1715_v43, %v1459_v29  ;;  %v1332_v32 = vmax.f32 %v1145_v44, -100.0  ;;  %v1460_v17 = vmul.f32 %v820_v63, %v435_v34  ;;  %v635_v24 = vmul.f32 0.6931472, %v3145_v52  ;;  %v313_v34 = vld [vmem:[%s3668_s18 + $0x250] sm:$0xff] }
 0x151   : > { %v3147_v54 = vpop.eup %3146  ;;  %v2354_v57 = vmul.f32 %v2226_v41, %v1970_v53  ;;  %v2228_v58 = vmul.f32 %v2100_v26, %v2100_v26  ;;  %v1589_v56 = vsub.f32 1.0, %v436_v51  ;;  %3152 = vlog2.f32 %v310_v36 }
 0x152   : > { %v1971_v25 = vsub.f32 0.0, %v1843_v21  ;;  %v1716_v59 = vmul.f32 %v1588_v15, %v1332_v32  ;;  %v821_v47 = vmax.f32 %v635_v24, -100.0  ;;  %v1147_v30 = vmul.f32 0.6931472, %v3147_v54 }
 0x153   : > { %v3149_v61 = vpop.eup %3148  ;;  %v2483_v0 = vmul.f32 %v3692_v7, %v2354_v57  ;;  %v2229_v2 = vmul.f32 %v2101_v20, %v2101_v20  ;;  %3154 = vlog2.f32 %v951_v49  ;;  %v952_v42 = vsub.f32 1.0, %v311_v55 }
 0x154   : > { %v2355_v4 = vmul.f32 %v2227_v39, %v1971_v25  ;;  %v1844_v3 = vadd.f32 %v1716_v59, %v1460_v17  ;;  %v1333_v37 = vmax.f32 %v1147_v30, -100.0  ;;  %v1461_v62 = vmul.f32 %v821_v47, %v436_v51  ;;  %v4176_v51 = vld [vmem:[%s3668_s18 + $0x258] sm:$0xff] }
 0x155   : > { %v3151_v8 = vpop.eup %3150  ;;  %2611 = vst [vmem:[%s3757_s24 + $0x210] sm:$0xff] %v2483_v0  ;;  %v637_v9 = vmul.f32 0.6931472, %v3149_v61  ;;  %v1590_v38 = vsub.f32 1.0, %v437_v31  ;;  %v2102_v5 = vsub.f32 %v4146_v12, %v437_v31  ;;  %3156 = vlog2.f32 %v311_v55 }
 0x156   : > { %v2484_v11 = vmul.f32 %v3692_v7, %v2355_v4  ;;  %v1972_v14 = vsub.f32 0.0, %v1844_v3  ;;  %v1717_v41 = vmul.f32 %v1589_v56, %v1333_v37  ;;  %v1149_v60 = vmul.f32 0.6931472, %v3151_v8  ;;  %v441_v8 = vld [vmem:[%s3676_s30 + $0x250] sm:$0xff] }
 0x157   : > { %v3153_v18 = vpop.eup %3152  ;;  %v822_v23 = vmax.f32 %v637_v9, -100.0  ;;  %v2103_v50 = vsub.f32 %v310_v36, %v438_v1  ;;  %3158 = vlog2.f32 %v952_v42  ;;  %v953_v27 = vsub.f32 1.0, %v4162_v6  ;;  %v439_v36 = vld [vmem:[%s3676_s30 + $0x240] sm:$0xff] }
 0x158   : > { %2612 = vst [vmem:[%s3757_s24 + $0x218] sm:$0xff] %v2484_v11  ;;  %v2356_v13 = vmul.f32 %v2228_v58, %v1972_v14  ;;  %v1845_v28 = vadd.f32 %v1717_v41, %v1461_v62  ;;  %v1334_v19 = vmax.f32 %v1149_v60, -100.0  ;;  %v639_v12 = vmul.f32 0.6931472, %v3153_v18 }
 0x159   : > { %v3155_v16 = vpop.eup %3154  ;;  %v1462_v35 = vmul.f32 %v822_v23, %v437_v31  ;;  %v2230_v39 = vmul.f32 %v2102_v5, %v2102_v5  ;;  %v1591_v33 = vsub.f32 1.0, %v438_v1  ;;  %3160 = vlog2.f32 %v4162_v6  ;;  %v315_v31 = vld [vmem:[%s3668_s18 + $0x260] sm:$0xff] }
 0x15a   : > { %v2485_v40 = vmul.f32 %v3692_v7, %v2356_v13  ;;  %v1973_v22 = vsub.f32 0.0, %v1845_v28  ;;  %v1718_v29 = vmul.f32 %v1590_v38, %v1334_v19  ;;  %v823_v10 = vmax.f32 %v639_v12, -100.0 }
 0x15b   : > { %v3157_v45 = vpop.eup %3156  ;;  %v1151_v46 = vmul.f32 0.6931472, %v3155_v16  ;;  %v2104_v15 = vsub.f32 %v311_v55, %v439_v36  ;;  %3162 = vlog2.f32 %v953_v27  ;;  %v954_v26 = vsub.f32 1.0, %v313_v34  ;;  %v440_v55 = vld [vmem:[%s3676_s30 + $0x248] sm:$0xff] }
 0x15c   : > { %2613 = vst [vmem:[%s3757_s24 + $0x220] sm:$0xff] %v2485_v40  ;;  %v2357_v48 = vmul.f32 %v2229_v2, %v1973_v22  ;;  %v1846_v43 = vadd.f32 %v1718_v29, %v1462_v35  ;;  %v2231_v63 = vmul.f32 %v2103_v50, %v2103_v50  ;;  %v641_v44 = vmul.f32 0.6931472, %v3157_v45 }
 0x15d   : > { %v3159_v52 = vpop.eup %3158  ;;  %v1335_v53 = vmax.f32 %v1151_v46, -100.0  ;;  %v1463_v20 = vmul.f32 %v823_v10, %v438_v1  ;;  %v1592_v49 = vsub.f32 1.0, %v439_v36  ;;  %3164 = vlog2.f32 %v313_v34  ;;  %v316_v1 = vld [vmem:[%s3668_s18 + $0x268] sm:$0xff] }
 0x15e   : > { %v2486_v21 = vmul.f32 %v3692_v7, %v2357_v48  ;;  %v1974_v32 = vsub.f32 0.0, %v1846_v43  ;;  %v824_v17 = vmax.f32 %v641_v44, -100.0  ;;  %v1153_v24 = vmul.f32 0.6931472, %v3159_v52  ;;  %v443_v52 = vld [vmem:[%s3676_s30 + $0x260] sm:$0xff] }
 0x15f   : > { %v3161_v54 = vpop.eup %3160  ;;  %v1719_v57 = vmul.f32 %v1591_v33, %v1335_v53  ;;  %v2232_v58 = vmul.f32 %v2104_v15, %v2104_v15  ;;  %3166 = vlog2.f32 %v954_v26  ;;  %v955_v56 = vsub.f32 1.0, %v4176_v51 }
 0x160   : > { %2614 = vst [vmem:[%s3757_s24 + $0x228] sm:$0xff] %v2486_v21  ;;  %v2358_v25 = vmul.f32 %v2230_v39, %v1974_v32  ;;  %v1336_v59 = vmax.f32 %v1153_v24, -100.0  ;;  %v1464_v47 = vmul.f32 %v824_v17, %v439_v36  ;;  %v643_v30 = vmul.f32 0.6931472, %v3161_v54  ;;  %v4192_v36 = vld [vmem:[%s3668_s18 + $0x270] sm:$0xff] }
 0x161   : > { %v3163_v61 = vpop.eup %3162  ;;  %v1847_v0 = vadd.f32 %v1719_v57, %v1463_v20  ;;  %v1593_v2 = vsub.f32 1.0, %v440_v55  ;;  %v2105_v42 = vsub.f32 %v4162_v6, %v440_v55  ;;  %3168 = vlog2.f32 %v4176_v51 }
 0x162   : > { %v2487_v4 = vmul.f32 %v3692_v7, %v2358_v25  ;;  %v1720_v3 = vmul.f32 %v1592_v49, %v1336_v59  ;;  %v825_v37 = vmax.f32 %v643_v30, -100.0  ;;  %v1155_v62 = vmul.f32 0.6931472, %v3163_v61 }
 0x163   : > { %v3165_v9 = vpop.eup %3164  ;;  %v1975_v38 = vsub.f32 0.0, %v1847_v0  ;;  %v2106_v5 = vsub.f32 %v313_v34, %v441_v8  ;;  %3170 = vlog2.f32 %v955_v56  ;;  %v956_v11 = vsub.f32 1.0, %v315_v31  ;;  %v442_v34 = vld [vmem:[%s3676_s30 + $0x258] sm:$0xff] }
 0x164   : > { %2615 = vst [vmem:[%s3757_s24 + $0x230] sm:$0xff] %v2487_v4  ;;  %v1848_v14 = vadd.f32 %v1720_v3, %v1464_v47  ;;  %v1337_v41 = vmax.f32 %v1155_v62, -100.0  ;;  %v1465_v60 = vmul.f32 %v825_v37, %v440_v55  ;;  %v645_v6 = vmul.f32 0.6931472, %v3165_v9  ;;  %v318_v55 = vld [vmem:[%s3668_s18 + $0x278] sm:$0xff] }
 0x165   : > { %v3167_v18 = vpop.eup %3166  ;;  %v2359_v23 = vmul.f32 %v2231_v63, %v1975_v38  ;;  %v2233_v50 = vmul.f32 %v2105_v42, %v2105_v42  ;;  %v1594_v27 = vsub.f32 1.0, %v441_v8  ;;  %3172 = vlog2.f32 %v315_v31 }
 0x166   : > { %v1976_v13 = vsub.f32 0.0, %v1848_v14  ;;  %v1721_v28 = vmul.f32 %v1593_v2, %v1337_v41  ;;  %v826_v19 = vmax.f32 %v645_v6, -100.0  ;;  %v1157_v12 = vmul.f32 0.6931472, %v3167_v18 }
 0x167   : > { %v3169_v16 = vpop.eup %3168  ;;  %v2488_v35 = vmul.f32 %v3692_v7, %v2359_v23  ;;  %v2234_v39 = vmul.f32 %v2106_v5, %v2106_v5  ;;  %3174 = vlog2.f32 %v956_v11  ;;  %v957_v33 = vsub.f32 1.0, %v316_v1 }
 0x168   : > { %v2360_v40 = vmul.f32 %v2232_v58, %v1976_v13  ;;  %v1849_v22 = vadd.f32 %v1721_v28, %v1465_v60  ;;  %v1338_v29 = vmax.f32 %v1157_v12, -100.0  ;;  %v1466_v10 = vmul.f32 %v826_v19, %v441_v8  ;;  %v4206_v8 = vld [vmem:[%s3668_s18 + $0x280] sm:$0xff] }
 0x169   : > { %v3171_v45 = vpop.eup %3170  ;;  %2616 = vst [vmem:[%s3757_s24 + $0x238] sm:$0xff] %v2488_v35  ;;  %v647_v46 = vmul.f32 0.6931472, %v3169_v16  ;;  %v1595_v15 = vsub.f32 1.0, %v442_v34  ;;  %v2107_v26 = vsub.f32 %v4176_v51, %v442_v34  ;;  %3176 = vlog2.f32 %v316_v1 }
 0x16a   : > { %v2489_v48 = vmul.f32 %v3692_v7, %v2360_v40  ;;  %v1977_v43 = vsub.f32 0.0, %v1849_v22  ;;  %v1722_v63 = vmul.f32 %v1594_v27, %v1338_v29  ;;  %v1159_v44 = vmul.f32 0.6931472, %v3171_v45  ;;  %v446_v45 = vld [vmem:[%s3676_s30 + $0x278] sm:$0xff] }
 0x16b   : > { %v3173_v53 = vpop.eup %3172  ;;  %v827_v20 = vmax.f32 %v647_v46, -100.0  ;;  %v2108_v49 = vsub.f32 %v315_v31, %v443_v52  ;;  %3178 = vlog2.f32 %v957_v33  ;;  %v958_v21 = vsub.f32 1.0, %v4192_v36  ;;  %v444_v31 = vld [vmem:[%s3676_s30 + $0x268] sm:$0xff] }
 0x16c   : > { %2617 = vst [vmem:[%s3757_s24 + $0x240] sm:$0xff] %v2489_v48  ;;  %v2361_v32 = vmul.f32 %v2233_v50, %v1977_v43  ;;  %v1850_v17 = vadd.f32 %v1722_v63, %v1466_v10  ;;  %v1339_v24 = vmax.f32 %v1159_v44, -100.0  ;;  %v649_v51 = vmul.f32 0.6931472, %v3173_v53 }
 0x16d   : > { %v3175_v54 = vpop.eup %3174  ;;  %v1467_v57 = vmul.f32 %v827_v20, %v442_v34  ;;  %v2235_v58 = vmul.f32 %v2107_v26, %v2107_v26  ;;  %v1596_v56 = vsub.f32 1.0, %v443_v52  ;;  %3180 = vlog2.f32 %v4192_v36  ;;  %v320_v34 = vld [vmem:[%s3668_s18 + $0x288] sm:$0xff] }
 0x16e   : > { %v2490_v25 = vmul.f32 %v3692_v7, %v2361_v32  ;;  %v1978_v59 = vsub.f32 0.0, %v1850_v17  ;;  %v1723_v47 = vmul.f32 %v1595_v15, %v1339_v24  ;;  %v828_v30 = vmax.f32 %v649_v51, -100.0 }
 0x16f   : > { %v3177_v61 = vpop.eup %3176  ;;  %v1161_v0 = vmul.f32 0.6931472, %v3175_v54  ;;  %v2109_v2 = vsub.f32 %v316_v1, %v444_v31  ;;  %3182 = vlog2.f32 %v958_v21  ;;  %v959_v42 = vsub.f32 1.0, %v318_v55  ;;  %v445_v1 = vld [vmem:[%s3676_s30 + $0x270] sm:$0xff] }
 0x170   : > { %2618 = vst [vmem:[%s3757_s24 + $0x248] sm:$0xff] %v2490_v25  ;;  %v2362_v4 = vmul.f32 %v2234_v39, %v1978_v59  ;;  %v1851_v3 = vadd.f32 %v1723_v47, %v1467_v57  ;;  %v2236_v37 = vmul.f32 %v2108_v49, %v2108_v49  ;;  %v651_v62 = vmul.f32 0.6931472, %v3177_v61 }
 0x171   : > { %v3179_v9 = vpop.eup %3178  ;;  %v1340_v38 = vmax.f32 %v1161_v0, -100.0  ;;  %v1468_v5 = vmul.f32 %v828_v30, %v443_v52  ;;  %v1597_v11 = vsub.f32 1.0, %v444_v31  ;;  %3184 = vlog2.f32 %v318_v55  ;;  %v321_v52 = vld [vmem:[%s3668_s18 + $0x290] sm:$0xff] }
 0x172   : > { %v2491_v14 = vmul.f32 %v3692_v7, %v2362_v4  ;;  %v1979_v41 = vsub.f32 0.0, %v1851_v3  ;;  %v829_v60 = vmax.f32 %v651_v62, -100.0  ;;  %v1163_v6 = vmul.f32 0.6931472, %v3179_v9  ;;  %v448_v9 = vld [vmem:[%s3676_s30 + $0x288] sm:$0xff] }
 0x173   : > { %v3181_v18 = vpop.eup %3180  ;;  %v1724_v23 = vmul.f32 %v1596_v56, %v1340_v38  ;;  %v2237_v50 = vmul.f32 %v2109_v2, %v2109_v2  ;;  %3186 = vlog2.f32 %v959_v42  ;;  %v960_v27 = vsub.f32 1.0, %v4206_v8 }
 0x174   : > { %2619 = vst [vmem:[%s3757_s24 + $0x250] sm:$0xff] %v2491_v14  ;;  %v2363_v13 = vmul.f32 %v2235_v58, %v1979_v41  ;;  %v1341_v28 = vmax.f32 %v1163_v6, -100.0  ;;  %v1469_v19 = vmul.f32 %v829_v60, %v444_v31  ;;  %v653_v12 = vmul.f32 0.6931472, %v3181_v18  ;;  %v4222_v31 = vld [vmem:[%s3668_s18 + $0x298] sm:$0xff] }
 0x175   : > { %v3183_v16 = vpop.eup %3182  ;;  %v1852_v35 = vadd.f32 %v1724_v23, %v1468_v5  ;;  %v1598_v39 = vsub.f32 1.0, %v445_v1  ;;  %v2110_v33 = vsub.f32 %v4192_v36, %v445_v1  ;;  %3188 = vlog2.f32 %v4206_v8 }
 0x176   : > { %v2492_v40 = vmul.f32 %v3692_v7, %v2363_v13  ;;  %v1725_v22 = vmul.f32 %v1597_v11, %v1341_v28  ;;  %v830_v29 = vmax.f32 %v653_v12, -100.0  ;;  %v1165_v10 = vmul.f32 0.6931472, %v3183_v16 }
 0x177   : > { %v3185_v46 = vpop.eup %3184  ;;  %v1980_v15 = vsub.f32 0.0, %v1852_v35  ;;  %v2111_v26 = vsub.f32 %v318_v55, %v446_v45  ;;  %3190 = vlog2.f32 %v960_v27  ;;  %v961_v48 = vsub.f32 1.0, %v320_v34  ;;  %v447_v55 = vld [vmem:[%s3676_s30 + $0x280] sm:$0xff] }
 0x178   : > { %2620 = vst [vmem:[%s3757_s24 + $0x258] sm:$0xff] %v2492_v40  ;;  %v1853_v43 = vadd.f32 %v1725_v22, %v1469_v19  ;;  %v1342_v63 = vmax.f32 %v1165_v10, -100.0  ;;  %v1470_v44 = vmul.f32 %v830_v29, %v445_v1  ;;  %v655_v36 = vmul.f32 0.6931472, %v3185_v46  ;;  %v323_v1 = vld [vmem:[%s3668_s18 + $0x2a0] sm:$0xff] }
 0x179   : > { %v3187_v53 = vpop.eup %3186  ;;  %v2364_v20 = vmul.f32 %v2236_v37, %v1980_v15  ;;  %v2238_v49 = vmul.f32 %v2110_v33, %v2110_v33  ;;  %v1599_v21 = vsub.f32 1.0, %v446_v45  ;;  %3192 = vlog2.f32 %v320_v34 }
 0x17a   : > { %v1981_v32 = vsub.f32 0.0, %v1853_v43  ;;  %v1726_v17 = vmul.f32 %v1598_v39, %v1342_v63  ;;  %v831_v24 = vmax.f32 %v655_v36, -100.0  ;;  %v1167_v51 = vmul.f32 0.6931472, %v3187_v53 }
 0x17b   : > { %v3189_v54 = vpop.eup %3188  ;;  %v2493_v57 = vmul.f32 %v3692_v7, %v2364_v20  ;;  %v2239_v58 = vmul.f32 %v2111_v26, %v2111_v26  ;;  %3194 = vlog2.f32 %v961_v48  ;;  %v962_v56 = vsub.f32 1.0, %v321_v52 }
 0x17c   : > { %v2365_v25 = vmul.f32 %v2237_v50, %v1981_v32  ;;  %v1854_v59 = vadd.f32 %v1726_v17, %v1470_v44  ;;  %v1343_v47 = vmax.f32 %v1167_v51, -100.0  ;;  %v1471_v30 = vmul.f32 %v831_v24, %v446_v45  ;;  %v4236_v45 = vld [vmem:[%s3668_s18 + $0x2a8] sm:$0xff] }
 0x17d   : > { %v3191_v61 = vpop.eup %3190  ;;  %2621 = vst [vmem:[%s3757_s24 + $0x260] sm:$0xff] %v2493_v57  ;;  %v657_v0 = vmul.f32 0.6931472, %v3189_v54  ;;  %v1600_v2 = vsub.f32 1.0, %v447_v55  ;;  %v2112_v42 = vsub.f32 %v4206_v8, %v447_v55  ;;  %3196 = vlog2.f32 %v321_v52 }
 0x17e   : > { %v2494_v4 = vmul.f32 %v3692_v7, %v2365_v25  ;;  %v1982_v3 = vsub.f32 0.0, %v1854_v59  ;;  %v1727_v37 = vmul.f32 %v1599_v21, %v1343_v47  ;;  %v1169_v62 = vmul.f32 0.6931472, %v3191_v61  ;;  %v451_v61 = vld [vmem:[%s3676_s30 + $0x2a0] sm:$0xff] }
 0x17f   : > { %v3193_v38 = vpop.eup %3192  ;;  %v832_v5 = vmax.f32 %v657_v0, -100.0  ;;  %v2113_v11 = vsub.f32 %v320_v34, %v448_v9  ;;  %3198 = vlog2.f32 %v962_v56  ;;  %v963_v14 = vsub.f32 1.0, %v4222_v31  ;;  %v449_v34 = vld [vmem:[%s3676_s30 + $0x290] sm:$0xff] }
 0x180   : > { %2622 = vst [vmem:[%s3757_s24 + $0x268] sm:$0xff] %v2494_v4  ;;  %v2366_v41 = vmul.f32 %v2238_v49, %v1982_v3  ;;  %v1855_v60 = vadd.f32 %v1727_v37, %v1471_v30  ;;  %v1344_v6 = vmax.f32 %v1169_v62, -100.0  ;;  %v659_v8 = vmul.f32 0.6931472, %v3193_v38 }
 0x181   : > { %v3195_v18 = vpop.eup %3194  ;;  %v1472_v23 = vmul.f32 %v832_v5, %v447_v55  ;;  %v2240_v50 = vmul.f32 %v2112_v42, %v2112_v42  ;;  %v1601_v27 = vsub.f32 1.0, %v448_v9  ;;  %3200 = vlog2.f32 %v4222_v31  ;;  %v325_v55 = vld [vmem:[%s3668_s18 + $0x2b0] sm:$0xff] }
 0x182   : > { %v2495_v13 = vmul.f32 %v3692_v7, %v2366_v41  ;;  %v1983_v28 = vsub.f32 0.0, %v1855_v60  ;;  %v1728_v19 = vmul.f32 %v1600_v2, %v1344_v6  ;;  %v833_v12 = vmax.f32 %v659_v8, -100.0 }
 0x183   : > { %v3197_v16 = vpop.eup %3196  ;;  %v1171_v35 = vmul.f32 0.6931472, %v3195_v18  ;;  %v2114_v39 = vsub.f32 %v321_v52, %v449_v34  ;;  %3202 = vlog2.f32 %v963_v14  ;;  %v964_v33 = vsub.f32 1.0, %v323_v1  ;;  %v450_v52 = vld [vmem:[%s3676_s30 + $0x298] sm:$0xff] }
 0x184   : > { %2623 = vst [vmem:[%s3757_s24 + $0x270] sm:$0xff] %v2495_v13  ;;  %v2367_v40 = vmul.f32 %v2239_v58, %v1983_v28  ;;  %v1856_v22 = vadd.f32 %v1728_v19, %v1472_v23  ;;  %v2241_v29 = vmul.f32 %v2113_v11, %v2113_v11  ;;  %v661_v10 = vmul.f32 0.6931472, %v3197_v16 }
 0x185   : > { %v3199_v46 = vpop.eup %3198  ;;  %v1345_v15 = vmax.f32 %v1171_v35, -100.0  ;;  %v1473_v26 = vmul.f32 %v833_v12, %v448_v9  ;;  %v1602_v48 = vsub.f32 1.0, %v449_v34  ;;  %3204 = vlog2.f32 %v323_v1  ;;  %v326_v9 = vld [vmem:[%s3668_s18 + $0x2b8] sm:$0xff] }
 0x186   : > { %v2496_v43 = vmul.f32 %v3692_v7, %v2367_v40  ;;  %v1984_v63 = vsub.f32 0.0, %v1856_v22  ;;  %v834_v44 = vmax.f32 %v661_v10, -100.0  ;;  %v1173_v36 = vmul.f32 0.6931472, %v3199_v46  ;;  %v453_v46 = vld [vmem:[%s3676_s30 + $0x2b0] sm:$0xff] }
 0x187   : > { %v3201_v53 = vpop.eup %3200  ;;  %v1729_v20 = vmul.f32 %v1601_v27, %v1345_v15  ;;  %v2242_v49 = vmul.f32 %v2114_v39, %v2114_v39  ;;  %3206 = vlog2.f32 %v964_v33  ;;  %v965_v21 = vsub.f32 1.0, %v4236_v45 }
 0x188   : > { %2624 = vst [vmem:[%s3757_s24 + $0x278] sm:$0xff] %v2496_v43  ;;  %v2368_v32 = vmul.f32 %v2240_v50, %v1984_v63  ;;  %v1346_v17 = vmax.f32 %v1173_v36, -100.0  ;;  %v1474_v24 = vmul.f32 %v834_v44, %v449_v34  ;;  %v663_v51 = vmul.f32 0.6931472, %v3201_v53  ;;  %v4252_v34 = vld [vmem:[%s3668_s18 + $0x2c0] sm:$0xff] }
 0x189   : > { %v3203_v54 = vpop.eup %3202  ;;  %v1857_v57 = vadd.f32 %v1729_v20, %v1473_v26  ;;  %v1603_v58 = vsub.f32 1.0, %v450_v52  ;;  %v2115_v56 = vsub.f32 %v4222_v31, %v450_v52  ;;  %3208 = vlog2.f32 %v4236_v45 }
 0x18a   : > { %v2497_v25 = vmul.f32 %v3692_v7, %v2368_v32  ;;  %v1730_v59 = vmul.f32 %v1602_v48, %v1346_v17  ;;  %v835_v47 = vmax.f32 %v663_v51, -100.0  ;;  %v1175_v30 = vmul.f32 0.6931472, %v3203_v54 }
 0x18b   : > { %v3205_v0 = vpop.eup %3204  ;;  %v1985_v2 = vsub.f32 0.0, %v1857_v57  ;;  %v2116_v42 = vsub.f32 %v323_v1, %v451_v61  ;;  %3210 = vlog2.f32 %v965_v21  ;;  %v966_v4 = vsub.f32 1.0, %v325_v55  ;;  %v452_v1 = vld [vmem:[%s3676_s30 + $0x2a8] sm:$0xff] }
 0x18c   : > { %2625 = vst [vmem:[%s3757_s24 + $0x280] sm:$0xff] %v2497_v25  ;;  %v1858_v3 = vadd.f32 %v1730_v59, %v1474_v24  ;;  %v1347_v37 = vmax.f32 %v1175_v30, -100.0  ;;  %v1475_v62 = vmul.f32 %v835_v47, %v450_v52  ;;  %v665_v31 = vmul.f32 0.6931472, %v3205_v0  ;;  %v328_v52 = vld [vmem:[%s3668_s18 + $0x2c8] sm:$0xff] }
 0x18d   : > { %v3207_v38 = vpop.eup %3206  ;;  %v2369_v5 = vmul.f32 %v2241_v29, %v1985_v2  ;;  %v2243_v11 = vmul.f32 %v2115_v56, %v2115_v56  ;;  %v1604_v14 = vsub.f32 1.0, %v451_v61  ;;  %3212 = vlog2.f32 %v325_v55 }
 0x18e   : > { %v1986_v41 = vsub.f32 0.0, %v1858_v3  ;;  %v1731_v60 = vmul.f32 %v1603_v58, %v1347_v37  ;;  %v836_v6 = vmax.f32 %v665_v31, -100.0  ;;  %v1177_v8 = vmul.f32 0.6931472, %v3207_v38 }
 0x18f   : > { %v3209_v18 = vpop.eup %3208  ;;  %v2498_v23 = vmul.f32 %v3692_v7, %v2369_v5  ;;  %v2244_v50 = vmul.f32 %v2116_v42, %v2116_v42  ;;  %3214 = vlog2.f32 %v966_v4  ;;  %v967_v27 = vsub.f32 1.0, %v326_v9 }
 0x190   : > { %v2370_v13 = vmul.f32 %v2242_v49, %v1986_v41  ;;  %v1859_v28 = vadd.f32 %v1731_v60, %v1475_v62  ;;  %v1348_v19 = vmax.f32 %v1177_v8, -100.0  ;;  %v1476_v12 = vmul.f32 %v836_v6, %v451_v61  ;;  %v4266_v61 = vld [vmem:[%s3668_s18 + $0x2d0] sm:$0xff] }
 0x191   : > { %v3211_v16 = vpop.eup %3210  ;;  %2626 = vst [vmem:[%s3757_s24 + $0x288] sm:$0xff] %v2498_v23  ;;  %v667_v35 = vmul.f32 0.6931472, %v3209_v18  ;;  %v1605_v39 = vsub.f32 1.0, %v452_v1  ;;  %v2117_v33 = vsub.f32 %v4236_v45, %v452_v1  ;;  %3216 = vlog2.f32 %v326_v9 }
 0x192   : > { %v2499_v40 = vmul.f32 %v3692_v7, %v2370_v13  ;;  %v1987_v22 = vsub.f32 0.0, %v1859_v28  ;;  %v1732_v29 = vmul.f32 %v1604_v14, %v1348_v19  ;;  %v1179_v10 = vmul.f32 0.6931472, %v3211_v16  ;;  %v456_v16 = vld [vmem:[%s3676_s30 + $0x2c8] sm:$0xff] }
 0x193   : > { %v3213_v15 = vpop.eup %3212  ;;  %v837_v26 = vmax.f32 %v667_v35, -100.0  ;;  %v2118_v48 = vsub.f32 %v325_v55, %v453_v46  ;;  %3218 = vlog2.f32 %v967_v27  ;;  %v968_v43 = vsub.f32 1.0, %v4252_v34  ;;  %v454_v55 = vld [vmem:[%s3676_s30 + $0x2b8] sm:$0xff] }
 0x194   : > { %2627 = vst [vmem:[%s3757_s24 + $0x290] sm:$0xff] %v2499_v40  ;;  %v2371_v63 = vmul.f32 %v2243_v11, %v1987_v22  ;;  %v1860_v44 = vadd.f32 %v1732_v29, %v1476_v12  ;;  %v1349_v36 = vmax.f32 %v1179_v10, -100.0  ;;  %v669_v45 = vmul.f32 0.6931472, %v3213_v15 }
 0x195   : > { %v3215_v53 = vpop.eup %3214  ;;  %v1477_v20 = vmul.f32 %v837_v26, %v452_v1  ;;  %v2245_v49 = vmul.f32 %v2117_v33, %v2117_v33  ;;  %v1606_v21 = vsub.f32 1.0, %v453_v46  ;;  %3220 = vlog2.f32 %v4252_v34  ;;  %v330_v1 = vld [vmem:[%s3668_s18 + $0x2d8] sm:$0xff] }
 0x196   : > { %v2500_v32 = vmul.f32 %v3692_v7, %v2371_v63  ;;  %v1988_v17 = vsub.f32 0.0, %v1860_v44  ;;  %v1733_v24 = vmul.f32 %v1605_v39, %v1349_v36  ;;  %v838_v51 = vmax.f32 %v669_v45, -100.0 }
 0x197   : > { %v3217_v54 = vpop.eup %3216  ;;  %v1181_v57 = vmul.f32 0.6931472, %v3215_v53  ;;  %v2119_v58 = vsub.f32 %v326_v9, %v454_v55  ;;  %3222 = vlog2.f32 %v968_v43  ;;  %v969_v56 = vsub.f32 1.0, %v328_v52  ;;  %v455_v9 = vld [vmem:[%s3676_s30 + $0x2c0] sm:$0xff] }
 0x198   : > { %2628 = vst [vmem:[%s3757_s24 + $0x298] sm:$0xff] %v2500_v32  ;;  %v2372_v25 = vmul.f32 %v2244_v50, %v1988_v17  ;;  %v1861_v59 = vadd.f32 %v1733_v24, %v1477_v20  ;;  %v2246_v47 = vmul.f32 %v2118_v48, %v2118_v48  ;;  %v671_v30 = vmul.f32 0.6931472, %v3217_v54 }
 0x199   : > { %v3219_v0 = vpop.eup %3218  ;;  %v1350_v2 = vmax.f32 %v1181_v57, -100.0  ;;  %v1478_v42 = vmul.f32 %v838_v51, %v453_v46  ;;  %v1607_v4 = vsub.f32 1.0, %v454_v55  ;;  %3224 = vlog2.f32 %v328_v52  ;;  %v331_v46 = vld [vmem:[%s3668_s18 + $0x2e0] sm:$0xff] }
 0x19a   : > { %v2501_v3 = vmul.f32 %v3692_v7, %v2372_v25  ;;  %v1989_v37 = vsub.f32 0.0, %v1861_v59  ;;  %v839_v62 = vmax.f32 %v671_v30, -100.0  ;;  %v1183_v31 = vmul.f32 0.6931472, %v3219_v0  ;;  %v458_v0 = vld [vmem:[%s3676_s30 + $0x2d8] sm:$0xff] }
 0x19b   : > { %v3221_v38 = vpop.eup %3220  ;;  %v1734_v5 = vmul.f32 %v1606_v21, %v1350_v2  ;;  %v2247_v11 = vmul.f32 %v2119_v58, %v2119_v58  ;;  %3226 = vlog2.f32 %v969_v56  ;;  %v970_v14 = vsub.f32 1.0, %v4266_v61 }
 0x19c   : > { %2629 = vst [vmem:[%s3757_s24 + $0x2a0] sm:$0xff] %v2501_v3  ;;  %v2373_v41 = vmul.f32 %v2245_v49, %v1989_v37  ;;  %v1351_v60 = vmax.f32 %v1183_v31, -100.0  ;;  %v1479_v6 = vmul.f32 %v839_v62, %v454_v55  ;;  %v673_v8 = vmul.f32 0.6931472, %v3221_v38  ;;  %v4282_v55 = vld [vmem:[%s3668_s18 + $0x2e8] sm:$0xff] }
 0x19d   : > { %v3223_v18 = vpop.eup %3222  ;;  %v1862_v23 = vadd.f32 %v1734_v5, %v1478_v42  ;;  %v1608_v50 = vsub.f32 1.0, %v455_v9  ;;  %v2120_v27 = vsub.f32 %v4252_v34, %v455_v9  ;;  %3228 = vlog2.f32 %v4266_v61 }
 0x19e   : > { %v2502_v13 = vmul.f32 %v3692_v7, %v2373_v41  ;;  %v1735_v28 = vmul.f32 %v1607_v4, %v1351_v60  ;;  %v840_v19 = vmax.f32 %v673_v8, -100.0  ;;  %v1185_v12 = vmul.f32 0.6931472, %v3223_v18 }
 0x19f   : > { %v3225_v35 = vpop.eup %3224  ;;  %v1990_v39 = vsub.f32 0.0, %v1862_v23  ;;  %v2121_v33 = vsub.f32 %v328_v52, %v456_v16  ;;  %3230 = vlog2.f32 %v970_v14  ;;  %v971_v40 = vsub.f32 1.0, %v330_v1  ;;  %v457_v52 = vld [vmem:[%s3676_s30 + $0x2d0] sm:$0xff] }
 0x1a0   : > { %2630 = vst [vmem:[%s3757_s24 + $0x2a8] sm:$0xff] %v2502_v13  ;;  %v1863_v22 = vadd.f32 %v1735_v28, %v1479_v6  ;;  %v1352_v29 = vmax.f32 %v1185_v12, -100.0  ;;  %v1480_v10 = vmul.f32 %v840_v19, %v455_v9  ;;  %v675_v34 = vmul.f32 0.6931472, %v3225_v35  ;;  %v333_v9 = vld [vmem:[%s3668_s18 + $0x2f0] sm:$0xff] }
 0x1a1   : > { %v3227_v15 = vpop.eup %3226  ;;  %v2374_v26 = vmul.f32 %v2246_v47, %v1990_v39  ;;  %v2248_v48 = vmul.f32 %v2120_v27, %v2120_v27  ;;  %v1609_v43 = vsub.f32 1.0, %v456_v16  ;;  %3232 = vlog2.f32 %v330_v1 }
 0x1a2   : > { %v1991_v63 = vsub.f32 0.0, %v1863_v22  ;;  %v1736_v44 = vmul.f32 %v1608_v50, %v1352_v29  ;;  %v841_v36 = vmax.f32 %v675_v34, -100.0  ;;  %v1187_v45 = vmul.f32 0.6931472, %v3227_v15 }
 0x1a3   : > { %v3229_v53 = vpop.eup %3228  ;;  %v2503_v20 = vmul.f32 %v3692_v7, %v2374_v26  ;;  %v2249_v49 = vmul.f32 %v2121_v33, %v2121_v33  ;;  %3234 = vlog2.f32 %v971_v40  ;;  %v972_v21 = vsub.f32 1.0, %v331_v46 }
 0x1a4   : > { %v2375_v32 = vmul.f32 %v2247_v11, %v1991_v63  ;;  %v1864_v17 = vadd.f32 %v1736_v44, %v1480_v10  ;;  %v1353_v24 = vmax.f32 %v1187_v45, -100.0  ;;  %v1481_v51 = vmul.f32 %v841_v36, %v456_v16  ;;  %v4296_v16 = vld [vmem:[%s3668_s18 + $0x2f8] sm:$0xff] }
 0x1a5   : > { %v3231_v54 = vpop.eup %3230  ;;  %2631 = vst [vmem:[%s3757_s24 + $0x2b0] sm:$0xff] %v2503_v20  ;;  %v677_v57 = vmul.f32 0.6931472, %v3229_v53  ;;  %v1610_v58 = vsub.f32 1.0, %v457_v52  ;;  %v2122_v56 = vsub.f32 %v4266_v61, %v457_v52  ;;  %3236 = vlog2.f32 %v331_v46 }
 0x1a6   : > { %v2504_v25 = vmul.f32 %v3692_v7, %v2375_v32  ;;  %v1992_v59 = vsub.f32 0.0, %v1864_v17  ;;  %v1737_v47 = vmul.f32 %v1609_v43, %v1353_v24  ;;  %v1189_v30 = vmul.f32 0.6931472, %v3231_v54  ;;  %v461_v54 = vld [vmem:[%s3676_s30 + $0x2f0] sm:$0xff] }
 0x1a7   : > { %v3233_v2 = vpop.eup %3232  ;;  %v842_v42 = vmax.f32 %v677_v57, -100.0  ;;  %v2123_v4 = vsub.f32 %v330_v1, %v458_v0  ;;  %3238 = vlog2.f32 %v972_v21  ;;  %v973_v3 = vsub.f32 1.0, %v4282_v55  ;;  %v459_v1 = vld [vmem:[%s3676_s30 + $0x2e0] sm:$0xff] }
 0x1a8   : > { %2632 = vst [vmem:[%s3757_s24 + $0x2b8] sm:$0xff] %v2504_v25  ;;  %v2376_v37 = vmul.f32 %v2248_v48, %v1992_v59  ;;  %v1865_v62 = vadd.f32 %v1737_v47, %v1481_v51  ;;  %v1354_v31 = vmax.f32 %v1189_v30, -100.0  ;;  %v679_v61 = vmul.f32 0.6931472, %v3233_v2 }
 0x1a9   : > { %v3235_v38 = vpop.eup %3234  ;;  %v1482_v5 = vmul.f32 %v842_v42, %v457_v52  ;;  %v2250_v11 = vmul.f32 %v2122_v56, %v2122_v56  ;;  %v1611_v14 = vsub.f32 1.0, %v458_v0  ;;  %3240 = vlog2.f32 %v4282_v55  ;;  %v335_v52 = vld [vmem:[%s3668_s18 + $0x300] sm:$0xff] }
 0x1aa   : > { %v2505_v41 = vmul.f32 %v3692_v7, %v2376_v37  ;;  %v1993_v60 = vsub.f32 0.0, %v1865_v62  ;;  %v1738_v6 = vmul.f32 %v1610_v58, %v1354_v31  ;;  %v843_v8 = vmax.f32 %v679_v61, -100.0 }
 0x1ab   : > { %v3237_v18 = vpop.eup %3236  ;;  %v1191_v23 = vmul.f32 0.6931472, %v3235_v38  ;;  %v2124_v50 = vsub.f32 %v331_v46, %v459_v1  ;;  %3242 = vlog2.f32 %v973_v3  ;;  %v974_v27 = vsub.f32 1.0, %v333_v9  ;;  %v460_v46 = vld [vmem:[%s3676_s30 + $0x2e8] sm:$0xff] }
 0x1ac   : > { %2633 = vst [vmem:[%s3757_s24 + $0x2c0] sm:$0xff] %v2505_v41  ;;  %v2377_v13 = vmul.f32 %v2249_v49, %v1993_v60  ;;  %v1866_v28 = vadd.f32 %v1738_v6, %v1482_v5  ;;  %v2251_v19 = vmul.f32 %v2123_v4, %v2123_v4  ;;  %v681_v12 = vmul.f32 0.6931472, %v3237_v18 }
 0x1ad   : > { %v3239_v35 = vpop.eup %3238  ;;  %v1355_v39 = vmax.f32 %v1191_v23, -100.0  ;;  %v1483_v33 = vmul.f32 %v843_v8, %v458_v0  ;;  %v1612_v40 = vsub.f32 1.0, %v459_v1  ;;  %3244 = vlog2.f32 %v333_v9  ;;  %v336_v0 = vld [vmem:[%s3668_s18 + $0x308] sm:$0xff] }
 0x1ae   : > { %v2506_v22 = vmul.f32 %v3692_v7, %v2377_v13  ;;  %v1994_v29 = vsub.f32 0.0, %v1866_v28  ;;  %v844_v10 = vmax.f32 %v681_v12, -100.0  ;;  %v1193_v34 = vmul.f32 0.6931472, %v3239_v35  ;;  %v463_v35 = vld [vmem:[%s3676_s30 + $0x300] sm:$0xff] }
 0x1af   : > { %v3241_v15 = vpop.eup %3240  ;;  %v1739_v26 = vmul.f32 %v1611_v14, %v1355_v39  ;;  %v2252_v48 = vmul.f32 %v2124_v50, %v2124_v50  ;;  %3246 = vlog2.f32 %v974_v27  ;;  %v975_v43 = vsub.f32 1.0, %v4296_v16 }
 0x1b0   : > { %2634 = vst [vmem:[%s3757_s24 + $0x2c8] sm:$0xff] %v2506_v22  ;;  %v2378_v63 = vmul.f32 %v2250_v11, %v1994_v29  ;;  %v1356_v44 = vmax.f32 %v1193_v34, -100.0  ;;  %v1484_v36 = vmul.f32 %v844_v10, %v459_v1  ;;  %v683_v45 = vmul.f32 0.6931472, %v3241_v15  ;;  %v4312_v1 = vld [vmem:[%s3668_s18 + $0x310] sm:$0xff] }
 0x1b1   : > { %v3243_v53 = vpop.eup %3242  ;;  %v1867_v20 = vadd.f32 %v1739_v26, %v1483_v33  ;;  %v1613_v49 = vsub.f32 1.0, %v460_v46  ;;  %v2125_v21 = vsub.f32 %v4282_v55, %v460_v46  ;;  %3248 = vlog2.f32 %v4296_v16 }
 0x1b2   : > { %v2507_v32 = vmul.f32 %v3692_v7, %v2378_v63  ;;  %v1740_v17 = vmul.f32 %v1612_v40, %v1356_v44  ;;  %v845_v24 = vmax.f32 %v683_v45, -100.0  ;;  %v1195_v51 = vmul.f32 0.6931472, %v3243_v53 }
 0x1b3   : > { %v3245_v57 = vpop.eup %3244  ;;  %v1995_v58 = vsub.f32 0.0, %v1867_v20  ;;  %v2126_v56 = vsub.f32 %v333_v9, %v461_v54  ;;  %3250 = vlog2.f32 %v975_v43  ;;  %v976_v25 = vsub.f32 1.0, %v335_v52  ;;  %v462_v9 = vld [vmem:[%s3676_s30 + $0x2f8] sm:$0xff] }
 0x1b4   : > { %2635 = vst [vmem:[%s3757_s24 + $0x2d0] sm:$0xff] %v2507_v32  ;;  %v1868_v59 = vadd.f32 %v1740_v17, %v1484_v36  ;;  %v1357_v47 = vmax.f32 %v1195_v51, -100.0  ;;  %v1485_v30 = vmul.f32 %v845_v24, %v460_v46  ;;  %v685_v55 = vmul.f32 0.6931472, %v3245_v57  ;;  %v338_v46 = vld [vmem:[%s3668_s18 + $0x318] sm:$0xff] }
 0x1b5   : > { %v3247_v2 = vpop.eup %3246  ;;  %v2379_v42 = vmul.f32 %v2251_v19, %v1995_v58  ;;  %v2253_v4 = vmul.f32 %v2125_v21, %v2125_v21  ;;  %v1614_v3 = vsub.f32 1.0, %v461_v54  ;;  %3252 = vlog2.f32 %v335_v52 }
 0x1b6   : > { %v1996_v37 = vsub.f32 0.0, %v1868_v59  ;;  %v1741_v62 = vmul.f32 %v1613_v49, %v1357_v47  ;;  %v846_v31 = vmax.f32 %v685_v55, -100.0  ;;  %v1197_v61 = vmul.f32 0.6931472, %v3247_v2 }
 0x1b7   : > { %v3249_v38 = vpop.eup %3248  ;;  %v2508_v5 = vmul.f32 %v3692_v7, %v2379_v42  ;;  %v2254_v11 = vmul.f32 %v2126_v56, %v2126_v56  ;;  %3254 = vlog2.f32 %v976_v25  ;;  %v977_v14 = vsub.f32 1.0, %v336_v0 }
 0x1b8   : > { %v2380_v41 = vmul.f32 %v2252_v48, %v1996_v37  ;;  %v1869_v60 = vadd.f32 %v1741_v62, %v1485_v30  ;;  %v1358_v6 = vmax.f32 %v1197_v61, -100.0  ;;  %v1486_v8 = vmul.f32 %v846_v31, %v461_v54  ;;  %v4326_v54 = vld [vmem:[%s3668_s18 + $0x320] sm:$0xff] }
 0x1b9   : > { %v3251_v18 = vpop.eup %3250  ;;  %2636 = vst [vmem:[%s3757_s24 + $0x2d8] sm:$0xff] %v2508_v5  ;;  %v687_v23 = vmul.f32 0.6931472, %v3249_v38  ;;  %v1615_v50 = vsub.f32 1.0, %v462_v9  ;;  %v2127_v27 = vsub.f32 %v4296_v16, %v462_v9  ;;  %3256 = vlog2.f32 %v336_v0 }
 0x1ba   : > { %v2509_v13 = vmul.f32 %v3692_v7, %v2380_v41  ;;  %v1997_v28 = vsub.f32 0.0, %v1869_v60  ;;  %v1742_v19 = vmul.f32 %v1614_v3, %v1358_v6  ;;  %v1199_v12 = vmul.f32 0.6931472, %v3251_v18  ;;  %v466_v18 = vld [vmem:[%s3676_s30 + $0x318] sm:$0xff] }
 0x1bb   : > { %v3253_v39 = vpop.eup %3252  ;;  %v847_v33 = vmax.f32 %v687_v23, -100.0  ;;  %v2128_v40 = vsub.f32 %v335_v52, %v463_v35  ;;  %3258 = vlog2.f32 %v977_v14  ;;  %v978_v22 = vsub.f32 1.0, %v4312_v1  ;;  %v464_v52 = vld [vmem:[%s3676_s30 + $0x308] sm:$0xff] }
 0x1bc   : > { %2637 = vst [vmem:[%s3757_s24 + $0x2e0] sm:$0xff] %v2509_v13  ;;  %v2381_v29 = vmul.f32 %v2253_v4, %v1997_v28  ;;  %v1870_v10 = vadd.f32 %v1742_v19, %v1486_v8  ;;  %v1359_v34 = vmax.f32 %v1199_v12, -100.0  ;;  %v689_v16 = vmul.f32 0.6931472, %v3253_v39 }
 0x1bd   : > { %v3255_v15 = vpop.eup %3254  ;;  %v1487_v26 = vmul.f32 %v847_v33, %v462_v9  ;;  %v2255_v48 = vmul.f32 %v2127_v27, %v2127_v27  ;;  %v1616_v43 = vsub.f32 1.0, %v463_v35  ;;  %3260 = vlog2.f32 %v4312_v1  ;;  %v340_v9 = vld [vmem:[%s3668_s18 + $0x328] sm:$0xff] }
 0x1be   : > { %v2510_v63 = vmul.f32 %v3692_v7, %v2381_v29  ;;  %v1998_v44 = vsub.f32 0.0, %v1870_v10  ;;  %v1743_v36 = vmul.f32 %v1615_v50, %v1359_v34  ;;  %v848_v45 = vmax.f32 %v689_v16, -100.0 }
 0x1bf   : > { %v3257_v53 = vpop.eup %3256  ;;  %v1201_v20 = vmul.f32 0.6931472, %v3255_v15  ;;  %v2129_v49 = vsub.f32 %v336_v0, %v464_v52  ;;  %3262 = vlog2.f32 %v978_v22  ;;  %v979_v21 = vsub.f32 1.0, %v338_v46  ;;  %v465_v0 = vld [vmem:[%s3676_s30 + $0x310] sm:$0xff] }
 0x1c0   : > { %2638 = vst [vmem:[%s3757_s24 + $0x2e8] sm:$0xff] %v2510_v63  ;;  %v2382_v32 = vmul.f32 %v2254_v11, %v1998_v44  ;;  %v1871_v17 = vadd.f32 %v1743_v36, %v1487_v26  ;;  %v2256_v24 = vmul.f32 %v2128_v40, %v2128_v40  ;;  %v691_v51 = vmul.f32 0.6931472, %v3257_v53 }
 0x1c1   : > { %v3259_v57 = vpop.eup %3258  ;;  %v1360_v58 = vmax.f32 %v1201_v20, -100.0  ;;  %v1488_v56 = vmul.f32 %v848_v45, %v463_v35  ;;  %v1617_v25 = vsub.f32 1.0, %v464_v52  ;;  %3264 = vlog2.f32 %v338_v46  ;;  %v341_v35 = vld [vmem:[%s3668_s18 + $0x330] sm:$0xff] }
 0x1c2   : > { %v2511_v59 = vmul.f32 %v3692_v7, %v2382_v32  ;;  %v1999_v47 = vsub.f32 0.0, %v1871_v17  ;;  %v849_v30 = vmax.f32 %v691_v51, -100.0  ;;  %v1203_v55 = vmul.f32 0.6931472, %v3259_v57  ;;  %v468_v57 = vld [vmem:[%s3676_s30 + $0x328] sm:$0xff] }
 0x1c3   : > { %v3261_v2 = vpop.eup %3260  ;;  %v1744_v42 = vmul.f32 %v1616_v43, %v1360_v58  ;;  %v2257_v4 = vmul.f32 %v2129_v49, %v2129_v49  ;;  %3266 = vlog2.f32 %v979_v21  ;;  %v980_v3 = vsub.f32 1.0, %v4326_v54 }
 0x1c4   : > { %2639 = vst [vmem:[%s3757_s24 + $0x2f0] sm:$0xff] %v2511_v59  ;;  %v2383_v37 = vmul.f32 %v2255_v48, %v1999_v47  ;;  %v1361_v62 = vmax.f32 %v1203_v55, -100.0  ;;  %v1489_v31 = vmul.f32 %v849_v30, %v464_v52  ;;  %v693_v61 = vmul.f32 0.6931472, %v3261_v2  ;;  %v4342_v52 = vld [vmem:[%s3668_s18 + $0x338] sm:$0xff] }
 0x1c5   : > { %v3263_v38 = vpop.eup %3262  ;;  %v1872_v5 = vadd.f32 %v1744_v42, %v1488_v56  ;;  %v1618_v11 = vsub.f32 1.0, %v465_v0  ;;  %v2130_v14 = vsub.f32 %v4312_v1, %v465_v0  ;;  %3268 = vlog2.f32 %v4326_v54 }
 0x1c6   : > { %v2512_v41 = vmul.f32 %v3692_v7, %v2383_v37  ;;  %v1745_v60 = vmul.f32 %v1617_v25, %v1361_v62  ;;  %v850_v6 = vmax.f32 %v693_v61, -100.0  ;;  %v1205_v8 = vmul.f32 0.6931472, %v3263_v38 }
 0x1c7   : > { %v3265_v23 = vpop.eup %3264  ;;  %v2000_v50 = vsub.f32 0.0, %v1872_v5  ;;  %v2131_v27 = vsub.f32 %v338_v46, %v466_v18  ;;  %3270 = vlog2.f32 %v980_v3  ;;  %v981_v13 = vsub.f32 1.0, %v340_v9  ;;  %v467_v46 = vld [vmem:[%s3676_s30 + $0x320] sm:$0xff] }
 0x1c8   : > { %2640 = vst [vmem:[%s3757_s24 + $0x2f8] sm:$0xff] %v2512_v41  ;;  %v1873_v28 = vadd.f32 %v1745_v60, %v1489_v31  ;;  %v1362_v19 = vmax.f32 %v1205_v8, -100.0  ;;  %v1490_v12 = vmul.f32 %v850_v6, %v465_v0  ;;  %v695_v1 = vmul.f32 0.6931472, %v3265_v23  ;;  %v343_v0 = vld [vmem:[%s3668_s18 + $0x340] sm:$0xff] }
 0x1c9   : > { %v3267_v39 = vpop.eup %3266  ;;  %v2384_v33 = vmul.f32 %v2256_v24, %v2000_v50  ;;  %v2258_v40 = vmul.f32 %v2130_v14, %v2130_v14  ;;  %v1619_v22 = vsub.f32 1.0, %v466_v18  ;;  %3272 = vlog2.f32 %v340_v9 }
 0x1ca   : > { %v2001_v29 = vsub.f32 0.0, %v1873_v28  ;;  %v1746_v10 = vmul.f32 %v1618_v11, %v1362_v19  ;;  %v851_v34 = vmax.f32 %v695_v1, -100.0  ;;  %v1207_v16 = vmul.f32 0.6931472, %v3267_v39 }
 0x1cb   : > { %v3269_v15 = vpop.eup %3268  ;;  %v2513_v26 = vmul.f32 %v3692_v7, %v2384_v33  ;;  %v2259_v48 = vmul.f32 %v2131_v27, %v2131_v27  ;;  %3274 = vlog2.f32 %v981_v13  ;;  %v982_v43 = vsub.f32 1.0, %v341_v35 }
 0x1cc   : > { %v2385_v63 = vmul.f32 %v2257_v4, %v2001_v29  ;;  %v1874_v44 = vadd.f32 %v1746_v10, %v1490_v12  ;;  %v1363_v36 = vmax.f32 %v1207_v16, -100.0  ;;  %v1491_v45 = vmul.f32 %v851_v34, %v466_v18  ;;  %v4356_v18 = vld [vmem:[%s3668_s18 + $0x348] sm:$0xff] }
 0x1cd   : > { %v3271_v53 = vpop.eup %3270  ;;  %2641 = vst [vmem:[%s3757_s24 + $0x300] sm:$0xff] %v2513_v26  ;;  %v697_v20 = vmul.f32 0.6931472, %v3269_v15  ;;  %v1620_v49 = vsub.f32 1.0, %v467_v46  ;;  %v2132_v21 = vsub.f32 %v4326_v54, %v467_v46  ;;  %3276 = vlog2.f32 %v341_v35 }
 0x1ce   : > { %v2514_v32 = vmul.f32 %v3692_v7, %v2385_v63  ;;  %v2002_v17 = vsub.f32 0.0, %v1874_v44  ;;  %v1747_v24 = vmul.f32 %v1619_v22, %v1363_v36  ;;  %v1209_v51 = vmul.f32 0.6931472, %v3271_v53  ;;  %v471_v53 = vld [vmem:[%s3676_s30 + $0x340] sm:$0xff] }
 0x1cf   : > { %v3273_v58 = vpop.eup %3272  ;;  %v852_v56 = vmax.f32 %v697_v20, -100.0  ;;  %v2133_v25 = vsub.f32 %v340_v9, %v468_v57  ;;  %3278 = vlog2.f32 %v982_v43  ;;  %v983_v59 = vsub.f32 1.0, %v4342_v52  ;;  %v469_v9 = vld [vmem:[%s3676_s30 + $0x330] sm:$0xff] }
 0x1d0   : > { %2642 = vst [vmem:[%s3757_s24 + $0x308] sm:$0xff] %v2514_v32  ;;  %v2386_v47 = vmul.f32 %v2258_v40, %v2002_v17  ;;  %v1875_v30 = vadd.f32 %v1747_v24, %v1491_v45  ;;  %v1364_v55 = vmax.f32 %v1209_v51, -100.0  ;;  %v699_v54 = vmul.f32 0.6931472, %v3273_v58 }
 0x1d1   : > { %v3275_v2 = vpop.eup %3274  ;;  %v1492_v42 = vmul.f32 %v852_v56, %v467_v46  ;;  %v2260_v4 = vmul.f32 %v2132_v21, %v2132_v21  ;;  %v1621_v3 = vsub.f32 1.0, %v468_v57  ;;  %3280 = vlog2.f32 %v4342_v52  ;;  %v345_v46 = vld [vmem:[%s3668_s18 + $0x350] sm:$0xff] }
 0x1d2   : > { %v2515_v37 = vmul.f32 %v3692_v7, %v2386_v47  ;;  %v2003_v62 = vsub.f32 0.0, %v1875_v30  ;;  %v1748_v31 = vmul.f32 %v1620_v49, %v1364_v55  ;;  %v853_v61 = vmax.f32 %v699_v54, -100.0 }
 0x1d3   : > { %v3277_v38 = vpop.eup %3276  ;;  %v1211_v5 = vmul.f32 0.6931472, %v3275_v2  ;;  %v2134_v11 = vsub.f32 %v341_v35, %v469_v9  ;;  %3282 = vlog2.f32 %v983_v59  ;;  %v984_v14 = vsub.f32 1.0, %v343_v0  ;;  %v470_v35 = vld [vmem:[%s3676_s30 + $0x338] sm:$0xff] }
 0x1d4   : > { %2643 = vst [vmem:[%s3757_s24 + $0x310] sm:$0xff] %v2515_v37  ;;  %v2387_v41 = vmul.f32 %v2259_v48, %v2003_v62  ;;  %v1876_v60 = vadd.f32 %v1748_v31, %v1492_v42  ;;  %v2261_v6 = vmul.f32 %v2133_v25, %v2133_v25  ;;  %v701_v8 = vmul.f32 0.6931472, %v3277_v38 }
 0x1d5   : > { %v3279_v23 = vpop.eup %3278  ;;  %v1365_v50 = vmax.f32 %v1211_v5, -100.0  ;;  %v1493_v27 = vmul.f32 %v853_v61, %v468_v57  ;;  %v1622_v13 = vsub.f32 1.0, %v469_v9  ;;  %3284 = vlog2.f32 %v343_v0  ;;  %v346_v57 = vld [vmem:[%s3668_s18 + $0x358] sm:$0xff] }
 0x1d6   : > { %v2516_v28 = vmul.f32 %v3692_v7, %v2387_v41  ;;  %v2004_v19 = vsub.f32 0.0, %v1876_v60  ;;  %v854_v12 = vmax.f32 %v701_v8, -100.0  ;;  %v1213_v1 = vmul.f32 0.6931472, %v3279_v23  ;;  %v473_v23 = vld [vmem:[%s3676_s30 + $0x350] sm:$0xff] }
 0x1d7   : > { %v3281_v39 = vpop.eup %3280  ;;  %v1749_v33 = vmul.f32 %v1621_v3, %v1365_v50  ;;  %v2262_v40 = vmul.f32 %v2134_v11, %v2134_v11  ;;  %3286 = vlog2.f32 %v984_v14  ;;  %v985_v22 = vsub.f32 1.0, %v4356_v18 }
 0x1d8   : > { %2644 = vst [vmem:[%s3757_s24 + $0x318] sm:$0xff] %v2516_v28  ;;  %v2388_v29 = vmul.f32 %v2260_v4, %v2004_v19  ;;  %v1366_v10 = vmax.f32 %v1213_v1, -100.0  ;;  %v1494_v34 = vmul.f32 %v854_v12, %v469_v9  ;;  %v703_v16 = vmul.f32 0.6931472, %v3281_v39  ;;  %v4372_v9 = vld [vmem:[%s3668_s18 + $0x360] sm:$0xff] }
 0x1d9   : > { %v3283_v15 = vpop.eup %3282  ;;  %v1877_v26 = vadd.f32 %v1749_v33, %v1493_v27  ;;  %v1623_v48 = vsub.f32 1.0, %v470_v35  ;;  %v2135_v43 = vsub.f32 %v4342_v52, %v470_v35  ;;  %3288 = vlog2.f32 %v4356_v18 }
 0x1da   : > { %v2517_v63 = vmul.f32 %v3692_v7, %v2388_v29  ;;  %v1750_v44 = vmul.f32 %v1622_v13, %v1366_v10  ;;  %v855_v36 = vmax.f32 %v703_v16, -100.0  ;;  %v1215_v45 = vmul.f32 0.6931472, %v3283_v15 }
 0x1db   : > { %v3285_v20 = vpop.eup %3284  ;;  %v2005_v49 = vsub.f32 0.0, %v1877_v26  ;;  %v2136_v21 = vsub.f32 %v343_v0, %v471_v53  ;;  %3290 = vlog2.f32 %v985_v22  ;;  %v986_v32 = vsub.f32 1.0, %v345_v46  ;;  %v472_v0 = vld [vmem:[%s3676_s30 + $0x348] sm:$0xff] }
 0x1dc   : > { %2645 = vst [vmem:[%s3757_s24 + $0x320] sm:$0xff] %v2517_v63  ;;  %v1878_v17 = vadd.f32 %v1750_v44, %v1494_v34  ;;  %v1367_v24 = vmax.f32 %v1215_v45, -100.0  ;;  %v1495_v51 = vmul.f32 %v855_v36, %v470_v35  ;;  %v705_v52 = vmul.f32 0.6931472, %v3285_v20  ;;  %v348_v35 = vld [vmem:[%s3668_s18 + $0x368] sm:$0xff] }
 0x1dd   : > { %v3287_v58 = vpop.eup %3286  ;;  %v2389_v56 = vmul.f32 %v2261_v6, %v2005_v49  ;;  %v2263_v25 = vmul.f32 %v2135_v43, %v2135_v43  ;;  %v1624_v59 = vsub.f32 1.0, %v471_v53  ;;  %3292 = vlog2.f32 %v345_v46 }
 0x1de   : > { %v2006_v47 = vsub.f32 0.0, %v1878_v17  ;;  %v1751_v30 = vmul.f32 %v1623_v48, %v1367_v24  ;;  %v856_v55 = vmax.f32 %v705_v52, -100.0  ;;  %v1217_v54 = vmul.f32 0.6931472, %v3287_v58 }
 0x1df   : > { %v3289_v2 = vpop.eup %3288  ;;  %v2518_v42 = vmul.f32 %v3692_v7, %v2389_v56  ;;  %v2264_v4 = vmul.f32 %v2136_v21, %v2136_v21  ;;  %3294 = vlog2.f32 %v986_v32  ;;  %v987_v3 = vsub.f32 1.0, %v346_v57 }
 0x1e0   : > { %v2390_v37 = vmul.f32 %v2262_v40, %v2006_v47  ;;  %v1879_v62 = vadd.f32 %v1751_v30, %v1495_v51  ;;  %v1368_v31 = vmax.f32 %v1217_v54, -100.0  ;;  %v1496_v61 = vmul.f32 %v856_v55, %v471_v53  ;;  %v4386_v53 = vld [vmem:[%s3668_s18 + $0x370] sm:$0xff] }
 0x1e1   : > { %v3291_v38 = vpop.eup %3290  ;;  %2646 = vst [vmem:[%s3757_s24 + $0x328] sm:$0xff] %v2518_v42  ;;  %v707_v5 = vmul.f32 0.6931472, %v3289_v2  ;;  %v1625_v11 = vsub.f32 1.0, %v472_v0  ;;  %v2137_v14 = vsub.f32 %v4356_v18, %v472_v0  ;;  %3296 = vlog2.f32 %v346_v57 }
 0x1e2   : > { %v2519_v41 = vmul.f32 %v3692_v7, %v2390_v37  ;;  %v2007_v60 = vsub.f32 0.0, %v1879_v62  ;;  %v1752_v6 = vmul.f32 %v1624_v59, %v1368_v31  ;;  %v1219_v8 = vmul.f32 0.6931472, %v3291_v38  ;;  %v476_v38 = vld [vmem:[%s3676_s30 + $0x368] sm:$0xff] }
 0x1e3   : > { %v3293_v50 = vpop.eup %3292  ;;  %v857_v27 = vmax.f32 %v707_v5, -100.0  ;;  %v2138_v13 = vsub.f32 %v345_v46, %v473_v23  ;;  %3298 = vlog2.f32 %v987_v3  ;;  %v988_v28 = vsub.f32 1.0, %v4372_v9  ;;  %v474_v46 = vld [vmem:[%s3676_s30 + $0x358] sm:$0xff] }
 0x1e4   : > { %2647 = vst [vmem:[%s3757_s24 + $0x330] sm:$0xff] %v2519_v41  ;;  %v2391_v19 = vmul.f32 %v2263_v25, %v2007_v60  ;;  %v1880_v12 = vadd.f32 %v1752_v6, %v1496_v61  ;;  %v1369_v1 = vmax.f32 %v1219_v8, -100.0  ;;  %v709_v18 = vmul.f32 0.6931472, %v3293_v50 }
 0x1e5   : > { %v3295_v39 = vpop.eup %3294  ;;  %v1497_v33 = vmul.f32 %v857_v27, %v472_v0  ;;  %v2265_v40 = vmul.f32 %v2137_v14, %v2137_v14  ;;  %v1626_v22 = vsub.f32 1.0, %v473_v23  ;;  %3300 = vlog2.f32 %v4372_v9  ;;  %v350_v0 = vld [vmem:[%s3668_s18 + $0x378] sm:$0xff] }
 0x1e6   : > { %v2520_v29 = vmul.f32 %v3692_v7, %v2391_v19  ;;  %v2008_v10 = vsub.f32 0.0, %v1880_v12  ;;  %v1753_v34 = vmul.f32 %v1625_v11, %v1369_v1  ;;  %v858_v16 = vmax.f32 %v709_v18, -100.0 }
 0x1e7   : > { %v3297_v15 = vpop.eup %3296  ;;  %v1221_v26 = vmul.f32 0.6931472, %v3295_v39  ;;  %v2139_v48 = vsub.f32 %v346_v57, %v474_v46  ;;  %3302 = vlog2.f32 %v988_v28  ;;  %v989_v43 = vsub.f32 1.0, %v348_v35  ;;  %v475_v57 = vld [vmem:[%s3676_s30 + $0x360] sm:$0xff] }
 0x1e8   : > { %2648 = vst [vmem:[%s3757_s24 + $0x338] sm:$0xff] %v2520_v29  ;;  %v2392_v63 = vmul.f32 %v2264_v4, %v2008_v10  ;;  %v1881_v44 = vadd.f32 %v1753_v34, %v1497_v33  ;;  %v2266_v36 = vmul.f32 %v2138_v13, %v2138_v13  ;;  %v711_v45 = vmul.f32 0.6931472, %v3297_v15 }
 0x1e9   : > { %v3299_v20 = vpop.eup %3298  ;;  %v1370_v49 = vmax.f32 %v1221_v26, -100.0  ;;  %v1498_v21 = vmul.f32 %v858_v16, %v473_v23  ;;  %v1627_v32 = vsub.f32 1.0, %v474_v46  ;;  %3304 = vlog2.f32 %v348_v35  ;;  %v351_v23 = vld [vmem:[%s3668_s18 + $0x380] sm:$0xff] }
 0x1ea   : > { %v2521_v17 = vmul.f32 %v3692_v7, %v2392_v63  ;;  %v2009_v24 = vsub.f32 0.0, %v1881_v44  ;;  %v859_v51 = vmax.f32 %v711_v45, -100.0  ;;  %v1223_v52 = vmul.f32 0.6931472, %v3299_v20  ;;  %v478_v20 = vld [vmem:[%s3676_s30 + $0x378] sm:$0xff] }
 0x1eb   : > { %v3301_v58 = vpop.eup %3300  ;;  %v1754_v56 = vmul.f32 %v1626_v22, %v1370_v49  ;;  %v2267_v25 = vmul.f32 %v2139_v48, %v2139_v48  ;;  %3306 = vlog2.f32 %v989_v43  ;;  %v990_v59 = vsub.f32 1.0, %v4386_v53 }
 0x1ec   : > { %2649 = vst [vmem:[%s3757_s24 + $0x340] sm:$0xff] %v2521_v17  ;;  %v2393_v47 = vmul.f32 %v2265_v40, %v2009_v24  ;;  %v1371_v30 = vmax.f32 %v1223_v52, -100.0  ;;  %v1499_v55 = vmul.f32 %v859_v51, %v474_v46  ;;  %v713_v54 = vmul.f32 0.6931472, %v3301_v58  ;;  %v4402_v46 = vld [vmem:[%s3668_s18 + $0x388] sm:$0xff] }
 0x1ed   : > { %v3303_v2 = vpop.eup %3302  ;;  %v1882_v42 = vadd.f32 %v1754_v56, %v1498_v21  ;;  %v1628_v4 = vsub.f32 1.0, %v475_v57  ;;  %v2140_v3 = vsub.f32 %v4372_v9, %v475_v57  ;;  %3308 = vlog2.f32 %v4386_v53 }
 0x1ee   : > { %v2522_v37 = vmul.f32 %v3692_v7, %v2393_v47  ;;  %v1755_v62 = vmul.f32 %v1627_v32, %v1371_v30  ;;  %v860_v31 = vmax.f32 %v713_v54, -100.0  ;;  %v1225_v61 = vmul.f32 0.6931472, %v3303_v2 }
 0x1ef   : > { %v3305_v5 = vpop.eup %3304  ;;  %v2010_v11 = vsub.f32 0.0, %v1882_v42  ;;  %v2141_v14 = vsub.f32 %v348_v35, %v476_v38  ;;  %3310 = vlog2.f32 %v990_v59  ;;  %v991_v41 = vsub.f32 1.0, %v350_v0  ;;  %v477_v35 = vld [vmem:[%s3676_s30 + $0x370] sm:$0xff] }
 0x1f0   : > { %2650 = vst [vmem:[%s3757_s24 + $0x348] sm:$0xff] %v2522_v37  ;;  %v1883_v60 = vadd.f32 %v1755_v62, %v1499_v55  ;;  %v1372_v6 = vmax.f32 %v1225_v61, -100.0  ;;  %v1500_v8 = vmul.f32 %v860_v31, %v475_v57  ;;  %v715_v9 = vmul.f32 0.6931472, %v3305_v5  ;;  %v353_v57 = vld [vmem:[%s3668_s18 + $0x390] sm:$0xff] }
 0x1f1   : > { %v3307_v50 = vpop.eup %3306  ;;  %v2394_v27 = vmul.f32 %v2266_v36, %v2010_v11  ;;  %v2268_v13 = vmul.f32 %v2140_v3, %v2140_v3  ;;  %v1629_v28 = vsub.f32 1.0, %v476_v38  ;;  %3312 = vlog2.f32 %v350_v0 }
 0x1f2   : > { %v2011_v19 = vsub.f32 0.0, %v1883_v60  ;;  %v1756_v12 = vmul.f32 %v1628_v4, %v1372_v6  ;;  %v861_v1 = vmax.f32 %v715_v9, -100.0  ;;  %v1227_v18 = vmul.f32 0.6931472, %v3307_v50 }
 0x1f3   : > { %v3309_v39 = vpop.eup %3308  ;;  %v2523_v33 = vmul.f32 %v3692_v7, %v2394_v27  ;;  %v2269_v40 = vmul.f32 %v2141_v14, %v2141_v14  ;;  %3314 = vlog2.f32 %v991_v41  ;;  %v992_v22 = vsub.f32 1.0, %v351_v23 }
 0x1f4   : > { %v2395_v29 = vmul.f32 %v2267_v25, %v2011_v19  ;;  %v1884_v10 = vadd.f32 %v1756_v12, %v1500_v8  ;;  %v1373_v34 = vmax.f32 %v1227_v18, -100.0  ;;  %v1501_v16 = vmul.f32 %v861_v1, %v476_v38  ;;  %v4416_v38 = vld [vmem:[%s3668_s18 + $0x398] sm:$0xff] }
 0x1f5   : > { %v3311_v15 = vpop.eup %3310  ;;  %2651 = vst [vmem:[%s3757_s24 + $0x350] sm:$0xff] %v2523_v33  ;;  %v717_v26 = vmul.f32 0.6931472, %v3309_v39  ;;  %v1630_v48 = vsub.f32 1.0, %v477_v35  ;;  %v2142_v43 = vsub.f32 %v4386_v53, %v477_v35  ;;  %3316 = vlog2.f32 %v351_v23 }
 0x1f6   : > { %v2524_v63 = vmul.f32 %v3692_v7, %v2395_v29  ;;  %v2012_v44 = vsub.f32 0.0, %v1884_v10  ;;  %v1757_v36 = vmul.f32 %v1629_v28, %v1373_v34  ;;  %v1229_v45 = vmul.f32 0.6931472, %v3311_v15  ;;  %v481_v15 = vld [vmem:[%s3676_s30 + $0x390] sm:$0xff] }
 0x1f7   : > { %v3313_v49 = vpop.eup %3312  ;;  %v862_v21 = vmax.f32 %v717_v26, -100.0  ;;  %v2143_v32 = vsub.f32 %v350_v0, %v478_v20  ;;  %3318 = vlog2.f32 %v992_v22  ;;  %v993_v17 = vsub.f32 1.0, %v4402_v46  ;;  %v479_v0 = vld [vmem:[%s3676_s30 + $0x380] sm:$0xff] }
 0x1f8   : > { %2652 = vst [vmem:[%s3757_s24 + $0x358] sm:$0xff] %v2524_v63  ;;  %v2396_v24 = vmul.f32 %v2268_v13, %v2012_v44  ;;  %v1885_v51 = vadd.f32 %v1757_v36, %v1501_v16  ;;  %v1374_v52 = vmax.f32 %v1229_v45, -100.0  ;;  %v719_v53 = vmul.f32 0.6931472, %v3313_v49 }
 0x1f9   : > { %v3315_v58 = vpop.eup %3314  ;;  %v1502_v56 = vmul.f32 %v862_v21, %v477_v35  ;;  %v2270_v25 = vmul.f32 %v2142_v43, %v2142_v43  ;;  %v1631_v59 = vsub.f32 1.0, %v478_v20  ;;  %3320 = vlog2.f32 %v4402_v46  ;;  %v355_v35 = vld [vmem:[%s3668_s18 + $0x3a0] sm:$0xff] }
 0x1fa   : > { %v2525_v47 = vmul.f32 %v3692_v7, %v2396_v24  ;;  %v2013_v30 = vsub.f32 0.0, %v1885_v51  ;;  %v1758_v55 = vmul.f32 %v1630_v48, %v1374_v52  ;;  %v863_v54 = vmax.f32 %v719_v53, -100.0 }
 0x1fb   : > { %v3317_v2 = vpop.eup %3316  ;;  %v1231_v42 = vmul.f32 0.6931472, %v3315_v58  ;;  %v2144_v4 = vsub.f32 %v351_v23, %v479_v0  ;;  %3322 = vlog2.f32 %v993_v17  ;;  %v994_v3 = vsub.f32 1.0, %v353_v57  ;;  %v480_v23 = vld [vmem:[%s3676_s30 + $0x388] sm:$0xff] }
 0x1fc   : > { %2653 = vst [vmem:[%s3757_s24 + $0x360] sm:$0xff] %v2525_v47  ;;  %v2397_v37 = vmul.f32 %v2269_v40, %v2013_v30  ;;  %v1886_v62 = vadd.f32 %v1758_v55, %v1502_v56  ;;  %v2271_v31 = vmul.f32 %v2143_v32, %v2143_v32  ;;  %v721_v61 = vmul.f32 0.6931472, %v3317_v2 }
 0x1fd   : > { %v3319_v5 = vpop.eup %3318  ;;  %v1375_v11 = vmax.f32 %v1231_v42, -100.0  ;;  %v1503_v14 = vmul.f32 %v863_v54, %v478_v20  ;;  %v1632_v41 = vsub.f32 1.0, %v479_v0  ;;  %3324 = vlog2.f32 %v353_v57  ;;  %v356_v20 = vld [vmem:[%s3668_s18 + $0x3a8] sm:$0xff] }
 0x1fe   : > { %v2526_v60 = vmul.f32 %v3692_v7, %v2397_v37  ;;  %v2014_v6 = vsub.f32 0.0, %v1886_v62  ;;  %v864_v8 = vmax.f32 %v721_v61, -100.0  ;;  %v1233_v9 = vmul.f32 0.6931472, %v3319_v5  ;;  %v483_v5 = vld [vmem:[%s3676_s30 + $0x3a0] sm:$0xff] }
 0x1ff   : > { %v3321_v50 = vpop.eup %3320  ;;  %v1759_v27 = vmul.f32 %v1631_v59, %v1375_v11  ;;  %v2272_v13 = vmul.f32 %v2144_v4, %v2144_v4  ;;  %3326 = vlog2.f32 %v994_v3  ;;  %v995_v28 = vsub.f32 1.0, %v4416_v38 }
 0x200   : > { %2654 = vst [vmem:[%s3757_s24 + $0x368] sm:$0xff] %v2526_v60  ;;  %v2398_v19 = vmul.f32 %v2270_v25, %v2014_v6  ;;  %v1376_v12 = vmax.f32 %v1233_v9, -100.0  ;;  %v1504_v1 = vmul.f32 %v864_v8, %v479_v0  ;;  %v723_v18 = vmul.f32 0.6931472, %v3321_v50  ;;  %v4432_v0 = vld [vmem:[%s3668_s18 + $0x3b0] sm:$0xff] }
 0x201   : > { %v3323_v39 = vpop.eup %3322  ;;  %v1887_v33 = vadd.f32 %v1759_v27, %v1503_v14  ;;  %v1633_v40 = vsub.f32 1.0, %v480_v23  ;;  %v2145_v22 = vsub.f32 %v4402_v46, %v480_v23  ;;  %3328 = vlog2.f32 %v4416_v38 }
 0x202   : > { %v2527_v29 = vmul.f32 %v3692_v7, %v2398_v19  ;;  %v1760_v10 = vmul.f32 %v1632_v41, %v1376_v12  ;;  %v865_v34 = vmax.f32 %v723_v18, -100.0  ;;  %v1235_v16 = vmul.f32 0.6931472, %v3323_v39 }
 0x203   : > { %v3325_v26 = vpop.eup %3324  ;;  %v2015_v48 = vsub.f32 0.0, %v1887_v33  ;;  %v2146_v43 = vsub.f32 %v353_v57, %v481_v15  ;;  %3330 = vlog2.f32 %v995_v28  ;;  %v996_v63 = vsub.f32 1.0, %v355_v35  ;;  %v482_v57 = vld [vmem:[%s3676_s30 + $0x398] sm:$0xff] }
 0x204   : > { %2655 = vst [vmem:[%s3757_s24 + $0x370] sm:$0xff] %v2527_v29  ;;  %v1888_v44 = vadd.f32 %v1760_v10, %v1504_v1  ;;  %v1377_v36 = vmax.f32 %v1235_v16, -100.0  ;;  %v1505_v45 = vmul.f32 %v865_v34, %v480_v23  ;;  %v725_v46 = vmul.f32 0.6931472, %v3325_v26  ;;  %v358_v23 = vld [vmem:[%s3668_s18 + $0x3b8] sm:$0xff] }
 0x205   : > { %v3327_v49 = vpop.eup %3326  ;;  %v2399_v21 = vmul.f32 %v2271_v31, %v2015_v48  ;;  %v2273_v32 = vmul.f32 %v2145_v22, %v2145_v22  ;;  %v1634_v17 = vsub.f32 1.0, %v481_v15  ;;  %3332 = vlog2.f32 %v355_v35 }
 0x206   : > { %v2016_v24 = vsub.f32 0.0, %v1888_v44  ;;  %v1761_v51 = vmul.f32 %v1633_v40, %v1377_v36  ;;  %v866_v52 = vmax.f32 %v725_v46, -100.0  ;;  %v1237_v53 = vmul.f32 0.6931472, %v3327_v49 }
 0x207   : > { %v3329_v58 = vpop.eup %3328  ;;  %v2528_v56 = vmul.f32 %v3692_v7, %v2399_v21  ;;  %v2274_v25 = vmul.f32 %v2146_v43, %v2146_v43  ;;  %3334 = vlog2.f32 %v996_v63  ;;  %v997_v59 = vsub.f32 1.0, %v356_v20 }
 0x208   : > { %v2400_v47 = vmul.f32 %v2272_v13, %v2016_v24  ;;  %v1889_v30 = vadd.f32 %v1761_v51, %v1505_v45  ;;  %v1378_v55 = vmax.f32 %v1237_v53, -100.0  ;;  %v1506_v54 = vmul.f32 %v866_v52, %v481_v15  ;;  %v4446_v15 = vld [vmem:[%s3668_s18 + $0x3c0] sm:$0xff] }
 0x209   : > { %v3331_v2 = vpop.eup %3330  ;;  %2656 = vst [vmem:[%s3757_s24 + $0x378] sm:$0xff] %v2528_v56  ;;  %v727_v42 = vmul.f32 0.6931472, %v3329_v58  ;;  %v1635_v4 = vsub.f32 1.0, %v482_v57  ;;  %v2147_v3 = vsub.f32 %v4416_v38, %v482_v57  ;;  %3336 = vlog2.f32 %v356_v20 }
 0x20a   : > { %v2529_v37 = vmul.f32 %v3692_v7, %v2400_v47  ;;  %v2017_v62 = vsub.f32 0.0, %v1889_v30  ;;  %v1762_v31 = vmul.f32 %v1634_v17, %v1378_v55  ;;  %v1239_v61 = vmul.f32 0.6931472, %v3331_v2  ;;  %v486_v2 = vld [vmem:[%s3676_s30 + $0x3b8] sm:$0xff] }
 0x20b   : > { %v3333_v11 = vpop.eup %3332  ;;  %v867_v14 = vmax.f32 %v727_v42, -100.0  ;;  %v2148_v41 = vsub.f32 %v355_v35, %v483_v5  ;;  %3338 = vlog2.f32 %v997_v59  ;;  %v998_v60 = vsub.f32 1.0, %v4432_v0  ;;  %v484_v35 = vld [vmem:[%s3676_s30 + $0x3a8] sm:$0xff] }
 0x20c   : > { %2657 = vst [vmem:[%s3757_s24 + $0x380] sm:$0xff] %v2529_v37  ;;  %v2401_v6 = vmul.f32 %v2273_v32, %v2017_v62  ;;  %v1890_v8 = vadd.f32 %v1762_v31, %v1506_v54  ;;  %v1379_v9 = vmax.f32 %v1239_v61, -100.0  ;;  %v729_v38 = vmul.f32 0.6931472, %v3333_v11 }
 0x20d   : > { %v3335_v50 = vpop.eup %3334  ;;  %v1507_v27 = vmul.f32 %v867_v14, %v482_v57  ;;  %v2275_v13 = vmul.f32 %v2147_v3, %v2147_v3  ;;  %v1636_v28 = vsub.f32 1.0, %v483_v5  ;;  %3340 = vlog2.f32 %v4432_v0  ;;  %v360_v57 = vld [vmem:[%s3668_s18 + $0x3c8] sm:$0xff] }
 0x20e   : > { %v2530_v19 = vmul.f32 %v3692_v7, %v2401_v6  ;;  %v2018_v12 = vsub.f32 0.0, %v1890_v8  ;;  %v1763_v1 = vmul.f32 %v1635_v4, %v1379_v9  ;;  %v868_v18 = vmax.f32 %v729_v38, -100.0 }
 0x20f   : > { %v3337_v39 = vpop.eup %3336  ;;  %v1241_v33 = vmul.f32 0.6931472, %v3335_v50  ;;  %v2149_v40 = vsub.f32 %v356_v20, %v484_v35  ;;  %3342 = vlog2.f32 %v998_v60  ;;  %v999_v22 = vsub.f32 1.0, %v358_v23  ;;  %v485_v20 = vld [vmem:[%s3676_s30 + $0x3b0] sm:$0xff] }
 0x210   : > { %2658 = vst [vmem:[%s3757_s24 + $0x388] sm:$0xff] %v2530_v19  ;;  %v2402_v29 = vmul.f32 %v2274_v25, %v2018_v12  ;;  %v1891_v10 = vadd.f32 %v1763_v1, %v1507_v27  ;;  %v2276_v34 = vmul.f32 %v2148_v41, %v2148_v41  ;;  %v731_v16 = vmul.f32 0.6931472, %v3337_v39 }
 0x211   : > { %v3339_v26 = vpop.eup %3338  ;;  %v1380_v48 = vmax.f32 %v1241_v33, -100.0  ;;  %v1508_v43 = vmul.f32 %v868_v18, %v483_v5  ;;  %v1637_v63 = vsub.f32 1.0, %v484_v35  ;;  %3344 = vlog2.f32 %v358_v23  ;;  %v4459_v5 = vld [vmem:[%s3668_s18 + $0x3d0] sm:$0xff] }
 0x212   : > { %v2531_v44 = vmul.f32 %v3692_v7, %v2402_v29  ;;  %v2019_v36 = vsub.f32 0.0, %v1891_v10  ;;  %v869_v45 = vmax.f32 %v731_v16, -100.0  ;;  %v1243_v46 = vmul.f32 0.6931472, %v3339_v26  ;;  %v488_v26 = vld [vmem:[%s3676_s30 + $0x3c8] sm:$0xff] }
 0x213   : > { %v3341_v49 = vpop.eup %3340  ;;  %v1764_v21 = vmul.f32 %v1636_v28, %v1380_v48  ;;  %v2277_v32 = vmul.f32 %v2149_v40, %v2149_v40  ;;  %3346 = vlog2.f32 %v999_v22  ;;  %v1000_v17 = vsub.f32 1.0, %v4446_v15 }
 0x214   : > { %2659 = vst [vmem:[%s3757_s24 + $0x390] sm:$0xff] %v2531_v44  ;;  %v2403_v24 = vmul.f32 %v2275_v13, %v2019_v36  ;;  %v1381_v51 = vmax.f32 %v1243_v46, -100.0  ;;  %v1509_v52 = vmul.f32 %v869_v45, %v484_v35  ;;  %v733_v53 = vmul.f32 0.6931472, %v3341_v49  ;;  %v4465_v35 = vld [vmem:[%s3668_s18 + $0x3d8] sm:$0xff] }
 0x215   : > { %v3343_v58 = vpop.eup %3342  ;;  %v1892_v56 = vadd.f32 %v1764_v21, %v1508_v43  ;;  %v1638_v25 = vsub.f32 1.0, %v485_v20  ;;  %v2150_v59 = vsub.f32 %v4432_v0, %v485_v20  ;;  %3348 = vlog2.f32 %v4446_v15 }
 0x216   : > { %v2532_v47 = vmul.f32 %v3692_v7, %v2403_v24  ;;  %v1765_v30 = vmul.f32 %v1637_v63, %v1381_v51  ;;  %v870_v55 = vmax.f32 %v733_v53, -100.0  ;;  %v1245_v54 = vmul.f32 0.6931472, %v3343_v58  ;;  %v489_v53 = vld [vmem:[%s3676_s30 + $0x3d0] sm:$0xff] }
 0x217   : > { %v3345_v42 = vpop.eup %3344  ;;  %v2020_v4 = vsub.f32 0.0, %v1892_v56  ;;  %v2151_v3 = vsub.f32 %v358_v23, %v486_v2  ;;  %3350 = vlog2.f32 %v1000_v17  ;;  %v1001_v37 = vsub.f32 1.0, %v360_v57  ;;  %v487_v23 = vld [vmem:[%s3676_s30 + $0x3c0] sm:$0xff] }
 0x218   : > { %2660 = vst [vmem:[%s3757_s24 + $0x398] sm:$0xff] %v2532_v47  ;;  %v1893_v62 = vadd.f32 %v1765_v30, %v1509_v52  ;;  %v1382_v31 = vmax.f32 %v1245_v54, -100.0  ;;  %v1510_v61 = vmul.f32 %v870_v55, %v485_v20  ;;  %v735_v0 = vmul.f32 0.6931472, %v3345_v42  ;;  %v4475_v20 = vld [vmem:[%s3668_s18 + $0x3e0] sm:$0xff]  ;;  %v4483_v54 = vld [vmem:[%s3668_s18 + $0x3e8] sm:$0xff] }
 0x219   : > { %v3347_v11 = vpop.eup %3346  ;;  %v2404_v14 = vmul.f32 %v2276_v34, %v2020_v4  ;;  %v2278_v41 = vmul.f32 %v2150_v59, %v2150_v59  ;;  %v1639_v60 = vsub.f32 1.0, %v486_v2  ;;  %3352 = vlog2.f32 %v360_v57 }
 0x21a   : > { %v2021_v6 = vsub.f32 0.0, %v1893_v62  ;;  %v1766_v8 = vmul.f32 %v1638_v25, %v1382_v31  ;;  %v871_v9 = vmax.f32 %v735_v0, -100.0  ;;  %v1247_v38 = vmul.f32 0.6931472, %v3347_v11  ;;  %v490_v0 = vld [vmem:[%s3676_s30 + $0x3d8] sm:$0xff] }
 0x21b   : > { %v3349_v50 = vpop.eup %3348  ;;  %v2533_v27 = vmul.f32 %v3692_v7, %v2404_v14  ;;  %v2279_v13 = vmul.f32 %v2151_v3, %v2151_v3  ;;  %3354 = vlog2.f32 %v1001_v37  ;;  %v1002_v28 = vsub.f32 1.0, %v4459_v5 }
 0x21c   : > { %v2405_v19 = vmul.f32 %v2277_v32, %v2021_v6  ;;  %v1894_v12 = vadd.f32 %v1766_v8, %v1510_v61  ;;  %v1383_v1 = vmax.f32 %v1247_v38, -100.0  ;;  %v1511_v18 = vmul.f32 %v871_v9, %v486_v2 }
 0x21d   : > { %v3351_v39 = vpop.eup %3350  ;;  %2661 = vst [vmem:[%s3757_s24 + $0x3a0] sm:$0xff] %v2533_v27  ;;  %v737_v33 = vmul.f32 0.6931472, %v3349_v50  ;;  %v1640_v40 = vsub.f32 1.0, %v487_v23  ;;  %v2152_v22 = vsub.f32 %v4446_v15, %v487_v23  ;;  %3356 = vlog2.f32 %v4459_v5 }
 0x21e   : > { %v2534_v29 = vmul.f32 %v3692_v7, %v2405_v19  ;;  %v2022_v10 = vsub.f32 0.0, %v1894_v12  ;;  %v1767_v34 = vmul.f32 %v1639_v60, %v1383_v1  ;;  %v1249_v16 = vmul.f32 0.6931472, %v3351_v39 }
 0x21f   : > { %v3353_v48 = vpop.eup %3352  ;;  %v872_v43 = vmax.f32 %v737_v33, -100.0  ;;  %v2153_v63 = vsub.f32 %v360_v57, %v488_v26  ;;  %3358 = vlog2.f32 %v1002_v28  ;;  %v1003_v44 = vsub.f32 1.0, %v4465_v35 }
 0x220   : > { %2662 = vst [vmem:[%s3757_s24 + $0x3a8] sm:$0xff] %v2534_v29  ;;  %v2406_v36 = vmul.f32 %v2278_v41, %v2022_v10  ;;  %v1895_v45 = vadd.f32 %v1767_v34, %v1511_v18  ;;  %v1384_v15 = vmax.f32 %v1249_v16, -100.0  ;;  %v739_v46 = vmul.f32 0.6931472, %v3353_v48  ;;  %v491_v18 = vld [vmem:[%s3676_s30 + $0x3e0] sm:$0xff]  ;;  %v4501_v16 = vld [vmem:[%s3668_s18 + $0x3f8] sm:$0xff] }
 0x221   : > { %v3355_v49 = vpop.eup %3354  ;;  %v1512_v21 = vmul.f32 %v872_v43, %v487_v23  ;;  %v2280_v32 = vmul.f32 %v2152_v22, %v2152_v22  ;;  %3360 = vlog2.f32 %v4465_v35  ;;  %v1641_v56 = vsub.f32 1.0, %v488_v26  ;;  %v4492_v23 = vld [vmem:[%s3668_s18 + $0x3f0] sm:$0xff] }
 0x222   : > { %v2535_v17 = vmul.f32 %v3692_v7, %v2406_v36  ;;  %v2023_v24 = vsub.f32 0.0, %v1895_v45  ;;  %v1768_v51 = vmul.f32 %v1640_v40, %v1384_v15  ;;  %v873_v52 = vmax.f32 %v739_v46, -100.0  ;;  %v492_v46 = vld [vmem:[%s3676_s30 + $0x3e8] sm:$0xff] }
 0x223   : > { %v3357_v57 = vpop.eup %3356  ;;  %v1251_v58 = vmul.f32 0.6931472, %v3355_v49  ;;  %3362 = vlog2.f32 %v1003_v44  ;;  %v1004_v25 = vsub.f32 1.0, %v4475_v20  ;;  %v2281_v30 = vmul.f32 %v2153_v63, %v2153_v63 }
 0x224   : > { %2663 = vst [vmem:[%s3757_s24 + $0x3b0] sm:$0xff] %v2535_v17  ;;  %v2407_v59 = vmul.f32 %v2279_v13, %v2023_v24  ;;  %v1896_v47 = vadd.f32 %v1768_v51, %v1512_v21  ;;  %v741_v55 = vmul.f32 0.6931472, %v3357_v57  ;;  %v1513_v4 = vmul.f32 %v873_v52, %v488_v26 }
 0x225   : > { %v3359_v2 = vpop.eup %3358  ;;  %v1385_v42 = vmax.f32 %v1251_v58, -100.0  ;;  %v1642_v3 = vsub.f32 1.0, %v489_v53  ;;  %3364 = vlog2.f32 %v4475_v20  ;;  %v2154_v41 = vsub.f32 %v4459_v5, %v489_v53 }
 0x226   : > { %v2536_v37 = vmul.f32 %v3692_v7, %v2407_v59  ;;  %v2024_v62 = vsub.f32 0.0, %v1896_v47  ;;  %v874_v31 = vmax.f32 %v741_v55, -100.0  ;;  %v1253_v61 = vmul.f32 0.6931472, %v3359_v2 }
 0x227   : > { %v3361_v11 = vpop.eup %3360  ;;  %v1769_v14 = vmul.f32 %v1641_v56, %v1385_v42  ;;  %3366 = vlog2.f32 %v1004_v25  ;;  %v1005_v60 = vsub.f32 1.0, %v4483_v54  ;;  %v1643_v13 = vsub.f32 1.0, %v490_v0 }
 0x228   : > { %2664 = vst [vmem:[%s3757_s24 + $0x3b8] sm:$0xff] %v2536_v37  ;;  %v2408_v6 = vmul.f32 %v2280_v32, %v2024_v62  ;;  %v1386_v8 = vmax.f32 %v1253_v61, -100.0  ;;  %v1514_v9 = vmul.f32 %v874_v31, %v489_v53  ;;  %v743_v38 = vmul.f32 0.6931472, %v3361_v11  ;;  %v493_v62 = vld [vmem:[%s3676_s30 + $0x3f0] sm:$0xff] }
 0x229   : > { %v3363_v50 = vpop.eup %3362  ;;  %v1897_v27 = vadd.f32 %v1769_v14, %v1513_v4  ;;  %v2155_v28 = vsub.f32 %v4465_v35, %v490_v0  ;;  %3368 = vlog2.f32 %v4483_v54  ;;  %v2282_v40 = vmul.f32 %v2154_v41, %v2154_v41 }
 0x22a   : > { %v2537_v5 = vmul.f32 %v3692_v7, %v2408_v6  ;;  %v1770_v19 = vmul.f32 %v1642_v3, %v1386_v8  ;;  %v875_v12 = vmax.f32 %v743_v38, -100.0  ;;  %v1255_v1 = vmul.f32 0.6931472, %v3363_v50  ;;  %v494_v6 = vld [vmem:[%s3676_s30 + $0x3f8] sm:$0xff] }
 0x22b   : > { %v3365_v39 = vpop.eup %3364  ;;  %v2025_v33 = vsub.f32 0.0, %v1897_v27  ;;  %3370 = vlog2.f32 %v1005_v60  ;;  %v1006_v22 = vsub.f32 1.0, %v4492_v23  ;;  %v2283_v43 = vmul.f32 %v2155_v28, %v2155_v28 }
 0x22c   : > { %2665 = vst [vmem:[%s3757_s24 + $0x3c0] sm:$0xff] %v2537_v5  ;;  %v1898_v29 = vadd.f32 %v1770_v19, %v1514_v9  ;;  %v1387_v10 = vmax.f32 %v1255_v1, -100.0  ;;  %v1515_v35 = vmul.f32 %v875_v12, %v490_v0  ;;  %v745_v34 = vmul.f32 0.6931472, %v3365_v39 }
 0x22d   : > { %v3367_v26 = vpop.eup %3366  ;;  %v2409_v48 = vmul.f32 %v2281_v30, %v2025_v33  ;;  %v1644_v63 = vsub.f32 1.0, %v491_v18  ;;  %3372 = vlog2.f32 %v4492_v23  ;;  %v2156_v32 = vsub.f32 %v4475_v20, %v491_v18 }
 0x22e   : > { %v2026_v44 = vsub.f32 0.0, %v1898_v29  ;;  %v1771_v36 = vmul.f32 %v1643_v13, %v1387_v10  ;;  %v876_v45 = vmax.f32 %v745_v34, -100.0  ;;  %v1257_v15 = vmul.f32 0.6931472, %v3367_v26 }
 0x22f   : > { %v3369_v49 = vpop.eup %3368  ;;  %v2538_v21 = vmul.f32 %v3692_v7, %v2409_v48  ;;  %3374 = vlog2.f32 %v1006_v22  ;;  %v1007_v17 = vsub.f32 1.0, %v4501_v16  ;;  %v1645_v56 = vsub.f32 1.0, %v492_v46 }
 0x230   : > { %v2410_v24 = vmul.f32 %v2282_v40, %v2026_v44  ;;  %v1899_v51 = vadd.f32 %v1771_v36, %v1515_v35  ;;  %v1388_v52 = vmax.f32 %v1257_v15, -100.0  ;;  %v1516_v53 = vmul.f32 %v876_v45, %v491_v18 }
 0x231   : > { %v3371_v57 = vpop.eup %3370  ;;  %2666 = vst [vmem:[%s3757_s24 + $0x3c8] sm:$0xff] %v2538_v21  ;;  %v747_v58 = vmul.f32 0.6931472, %v3369_v49  ;;  %3376 = vlog2.f32 %v4501_v16  ;;  %v2284_v55 = vmul.f32 %v2156_v32, %v2156_v32  ;;  %v2157_v42 = vsub.f32 %v4483_v54, %v492_v46 }
 0x232   : > { %v2539_v25 = vmul.f32 %v3692_v7, %v2410_v24  ;;  %v2027_v59 = vsub.f32 0.0, %v1899_v51  ;;  %v1772_v47 = vmul.f32 %v1644_v63, %v1388_v52  ;;  %v1259_v20 = vmul.f32 0.6931472, %v3371_v57 }
 0x233   : > { %v3373_v30 = vpop.eup %3372  ;;  %v877_v2 = vmax.f32 %v747_v58, -100.0  ;;  %3378 = vlog2.f32 %v1007_v17  ;;  %v1646_v38 = vsub.f32 1.0, %v493_v62  ;;  %v2285_v27 = vmul.f32 %v2157_v42, %v2157_v42 }
 0x234   : > { %2667 = vst [vmem:[%s3757_s24 + $0x3d0] sm:$0xff] %v2539_v25  ;;  %v2411_v4 = vmul.f32 %v2283_v43, %v2027_v59  ;;  %v1900_v3 = vadd.f32 %v1772_v47, %v1516_v53  ;;  %v1389_v37 = vmax.f32 %v1259_v20, -100.0  ;;  %v749_v31 = vmul.f32 0.6931472, %v3373_v30 }
 0x235   : > { %v3375_v61 = vpop.eup %3374  ;;  %v1517_v0 = vmul.f32 %v877_v2, %v492_v46  ;;  %v2158_v12 = vsub.f32 %v4492_v23, %v493_v62  ;;  %v1647_v1 = vsub.f32 1.0, %v494_v6  ;;  %v2159_v34 = vsub.f32 %v4501_v16, %v494_v6 }
 0x236   : > { %v2540_v11 = vmul.f32 %v3692_v7, %v2411_v4  ;;  %v2028_v14 = vsub.f32 0.0, %v1900_v3  ;;  %v1773_v41 = vmul.f32 %v1645_v56, %v1389_v37  ;;  %v878_v60 = vmax.f32 %v749_v31, -100.0 }
 0x237   : > { %v3377_v8 = vpop.eup %3376  ;;  %v1261_v9 = vmul.f32 0.6931472, %v3375_v61  ;;  %v2286_v48 = vmul.f32 %v2158_v12, %v2158_v12  ;;  %v2287_v36 = vmul.f32 %v2159_v34, %v2159_v34 }
 0x238   : > { %2668 = vst [vmem:[%s3757_s24 + $0x3d8] sm:$0xff] %v2540_v11  ;;  %v2412_v54 = vmul.f32 %v2284_v55, %v2028_v14  ;;  %v1901_v50 = vadd.f32 %v1773_v41, %v1517_v0  ;;  %v751_v13 = vmul.f32 0.6931472, %v3377_v8  ;;  %v1518_v19 = vmul.f32 %v878_v60, %v493_v62 }
 0x239   : > { %v3379_v28 = vpop.eup %3378  ;;  %v1390_v5 = vmax.f32 %v1261_v9, -100.0 }
 0x23a   : > { %v2541_v18 = vmul.f32 %v3692_v7, %v2412_v54  ;;  %v2029_v39 = vsub.f32 0.0, %v1901_v50  ;;  %v879_v33 = vmax.f32 %v751_v13, -100.0  ;;  %v1263_v40 = vmul.f32 0.6931472, %v3379_v28 }
 0x23b   : > { %v1774_v22 = vmul.f32 %v1646_v38, %v1390_v5 }
 0x23c   : > { %2669 = vst [vmem:[%s3757_s24 + $0x3e0] sm:$0xff] %v2541_v18  ;;  %v2413_v29 = vmul.f32 %v2285_v27, %v2029_v39  ;;  %v1391_v10 = vmax.f32 %v1263_v40, -100.0  ;;  %v1519_v35 = vmul.f32 %v879_v33, %v494_v6 }
 0x23d   : > { %v1902_v26 = vadd.f32 %v1774_v22, %v1518_v19 }
 0x23e   : > { %v2542_v23 = vmul.f32 %v3692_v7, %v2413_v29  ;;  %v1775_v43 = vmul.f32 %v1647_v1, %v1391_v10 }
 0x23f   : > { %v2030_v63 = vsub.f32 0.0, %v1902_v26 }
 0x240   : > { %2670 = vst [vmem:[%s3757_s24 + $0x3e8] sm:$0xff] %v2542_v23  ;;  %v1903_v44 = vadd.f32 %v1775_v43, %v1519_v35 }
 0x241   : > { %v2414_v45 = vmul.f32 %v2286_v48, %v2030_v63 }
 0x242   : > { %v2031_v16 = vsub.f32 0.0, %v1903_v44 }
 0x243   : > { %v2543_v15 = vmul.f32 %v3692_v7, %v2414_v45 }
 0x244   : > { %v2415_v46 = vmul.f32 %v2287_v36, %v2031_v16 }
 0x245   : > { %2671 = vst [vmem:[%s3757_s24 + $0x3f0] sm:$0xff] %v2543_v15 }
 0x246   : > { %v2544_v49 = vmul.f32 %v3692_v7, %v2415_v46 }
 0x248   : > { %2672 = vst [vmem:[%s3757_s24 + $0x3f8] sm:$0xff] %v2544_v49 }
 0x249   : > { %3467 = shalt.err (!%p3464_p0)
}
 0x24a   : > { %s3514_s27 = smov 512   ;;  %s3515_s18 = smov 32  }
 0x24b   : > { %2817 = dma.vmem_to_hbm [thread:$0]  (%p3589_p11), %s2688_s23, 16384, %s2690_s0, %s2674_s6, %s3514_s27, %s3514_s27, %s3515_s18  }
 0x24c PF: > { %s2704_s9 = sand.u32 1, %s3498_s14   ;;  %p4571_p1 = scmp.ge.s32.totalorder %s3510_s17, 2 }
 0x24d   : > { %s2705_s30 = scalar_lea.sflag [#allocation5], %s2704_s9 }
 0x24e   : > { %p2827_p4 = pnand %p4571_p1, %p3593_p12 }
 0x250   : > { %p2828_p7 = pneg %p2827_p4 }
 0x252   : > { %3493 = dma.done.wait (%p2828_p7), %s2705_s30, 16384  }
 0x253   : > { %3495 = vsyncadd (%p2828_p7), %s2705_s30, 4294950912  ;;  %p20_p5 = scmp.ge.s32.totalorder %s3564_s19, 4   ;;  %s4572_s14 = smov %s3502_s15 }
 0x254   : > { %s4573_s15 = smov %s3506_s16  ;;  %s4574_s16 = smov %s3576_s22 }
 0x255   : > { %s4575_s17 = smov %s3564_s19  ;;  %22 = sbr.rel (!%p20_p5) target bundleno = 9 (0x9), region = 90 }
 0x25a   :  { %2711 = vsyncpa [#allocation4], 1 }
 0x25b   :  { %2713 = vsyncpa [#allocation4 + $0x1], 1 }
 0x25c   :  { %2714 = vsyncpa [#allocation7], 1 }
 0x25d   :  { %2716 = vsyncpa [#allocation7 + $0x1], 1 }
 0x25e   :  { %2717 = vsyncpa [#allocation5], 1 }
 0x25f   :  { %2719 = vsyncpa [#allocation5 + $0x1], 1 }

</bundles_post_ra>
